<compile_context>
chip_gen: v6e
topology: v6e:2x2x1
jax: 0.10.0
libtpu: 0.0.40
codegen_flags: <defaults>
</compile_context>

<pallas_src>
import jax
import jax.numpy as jnp
from jax import lax
from jax.experimental import pallas as pl
from jax.experimental.pallas import tpu as pltpu


def embeddings_kernel(ids_ref,      # (B, S) int32, scalar-prefetched into SMEM
                      tok_hbm,      # (V, H) token table, raw HBM ref (pl.ANY)
                      pos_ref,      # (TQ, H) position rows (auto-pipelined)
                      gamma_ref,    # (1, H)
                      beta_ref,     # (1, H)
                      out_ref,      # (TQ, H)
                      tok_buf,      # (2, TQ, H) VMEM double buffer (scratch)
                      sem):         # DMA semaphores, shape (2,)
    TQ, _ = out_ref.shape
    b = pl.program_id(0)
    s = pl.program_id(1)
    n_s = pl.num_programs(1)

    # One (1, H) row copy: HBM table row ids[b, base + r] -> tok_buf[slot, r].
    def row_copy(base, slot, r):
        tok_id = ids_ref[b, base + r]
        return pltpu.make_async_copy(
            tok_hbm.at[pl.ds(tok_id, 1), :],
            tok_buf.at[slot, pl.ds(r, 1), :],
            sem.at[slot])

    def issue(s_blk, slot):
        base = s_blk * TQ
        for r in range(TQ):
            row_copy(base, slot, r).start()

    def wait_all(s_blk, slot):
        base = s_blk * TQ
        for r in range(TQ):
            row_copy(base, slot, r).wait()

    slot = s % 2

    # Prime the double buffer at the first sequence block of each batch row.
    @pl.when(s == 0)
    def _():
        issue(0, 0)

    # Prefetch the next sequence block while we compute on the current one.
    @pl.when(s + 1 < n_s)
    def _():
        issue(s + 1, 1 - slot)

    # Wait for all TQ row gathers of the current block.
    wait_all(s, slot)

    # token + position embeddings, LayerNorm (biased var, eps=1e-12), affine.
    x = tok_buf[slot].astype(jnp.float32) + pos_ref[...].astype(jnp.float32)
    mean = jnp.mean(x, axis=-1, keepdims=True)
    xc = x - mean
    var = jnp.mean(xc * xc, axis=-1, keepdims=True)
    inv = lax.rsqrt(var + 1e-12)
    y = xc * inv * gamma_ref[...] + beta_ref[...]
    out_ref[...] = y.astype(out_ref.dtype)
    # Dropout: identity (eval semantics).


def embeddings_forward(input_ids, tok_table, pos_table, gamma, beta, *, tq=32):
    B, S = input_ids.shape
    V, H = tok_table.shape
    assert tq % 8 == 0, "TQ must be a multiple of 8 (sublane count)"
    assert S % tq == 0, "TQ must divide the sequence length"
    n_s = S // tq

    ids = input_ids.astype(jnp.int32)
    gamma2d = gamma.reshape(1, H).astype(jnp.float32)
    beta2d = beta.reshape(1, H).astype(jnp.float32)

    grid_spec = pltpu.PrefetchScalarGridSpec(
        num_scalar_prefetch=1,            # token ids land in SMEM
        grid=(B, n_s),
        in_specs=[
            # Token table: raw HBM ref, gathered manually row-by-row in-kernel.
            pl.BlockSpec(memory_space=pl.ANY),
            # Position rows for this sequence block (static layout).
            pl.BlockSpec((tq, H), lambda b, s, ids: (s, 0)),
            # LayerNorm gamma / beta (same block every step).
            pl.BlockSpec((1, H), lambda b, s, ids: (0, 0)),
            pl.BlockSpec((1, H), lambda b, s, ids: (0, 0)),
        ],
        out_specs=pl.BlockSpec((tq, H), lambda b, s, ids: (b * n_s + s, 0)),
        scratch_shapes=[
            pltpu.VMEM((2, tq, H), tok_table.dtype),   # token-row double buffer
            pltpu.SemaphoreType.DMA((2,)),             # one DMA sem per slot
        ],
    )

    out = pl.pallas_call(
        embeddings_kernel,
        out_shape=jax.ShapeDtypeStruct((B * S, H), jnp.float32),
        grid_spec=grid_spec,
        compiler_params=pltpu.CompilerParams(
            dimension_semantics=("parallel", "arbitrary")),
    )(ids, tok_table, pos_table, gamma2d, beta2d)

    return out.reshape(B, S, H)


def reference_forward(input_ids, tok_table, pos_table, gamma, beta):
    B, S = input_ids.shape
    tok = tok_table[input_ids].astype(jnp.float32)            # (B, S, H)
    pos = pos_table[jnp.arange(S)][None].astype(jnp.float32)  # (1, S, H)
    x = tok + pos
    mean = jnp.mean(x, axis=-1, keepdims=True)
    var = jnp.mean((x - mean) ** 2, axis=-1, keepdims=True)
    return (x - mean) * lax.rsqrt(var + 1e-12) * gamma + beta


if __name__ == "__main__":
    # Small, self-consistent config (analogue of DistilBERT's fields).
    VOCAB = 512          # config.vocab_size
    MAX_POS = 128        # config.max_position_embeddings
    HIDDEN = 128         # config.hidden_size (lane-dense: multiple of 128)
    B, S = 2, 64         # batch, sequence length
    TQ = 32              # tokens per grid step (multiple of 8, divides S)

    key = jax.random.PRNGKey(0)
    k_tok, k_pos, k_ids = jax.random.split(key, 3)

    tok_table = jax.random.normal(k_tok, (VOCAB, HIDDEN), jnp.float32) * 0.02
    pos_table = jax.random.normal(k_pos, (MAX_POS, HIDDEN), jnp.float32) * 0.02
    gamma = jnp.ones((HIDDEN,), jnp.float32)   # nn.LayerNorm default weight
    beta = jnp.zeros((HIDDEN,), jnp.float32)   # nn.LayerNorm default bias

    input_ids = jax.random.randint(k_ids, (B, S), 0, VOCAB, dtype=jnp.int32)

    out = embeddings_forward(input_ids, tok_table, pos_table, gamma, beta, tq=TQ)
    out = jax.block_until_ready(out)

    ref = reference_forward(input_ids, tok_table, pos_table, gamma, beta)
    assert out.shape == (B, S, HIDDEN)
    assert jnp.allclose(out, ref, atol=1e-5, rtol=1e-5), "mismatch vs reference"

    print("KERNEL_OK")
</pallas_src>

<mosaic_0001>
module attributes {stable_mosaic.version = 11 : i64} {
  func.func @embeddings_kernel(%arg0: i32, %arg1: i32, %arg2: memref<2x64xi32, #tpu.memory_space<smem>>, %arg3: memref<512x128xf32, #tpu.memory_space<any>>, %arg4: memref<32x128xf32, #tpu.memory_space<vmem>>, %arg5: memref<1x128xf32, #tpu.memory_space<vmem>>, %arg6: memref<1x128xf32, #tpu.memory_space<vmem>>, %arg7: memref<32x128xf32, #tpu.memory_space<vmem>>, %arg8: memref<2x32x128xf32, #tpu.memory_space<vmem>>, %arg9: memref<2x!tpu.dma_semaphore, #tpu.memory_space<semaphore_mem>>) attributes {dimension_semantics = [#tpu.dimension_semantics<parallel>, #tpu.dimension_semantics<arbitrary>], iteration_bounds = array<i64: 2, 2>, scalar_prefetch = 1 : i64, scratch_operands = 2 : i64, tpu.core_type = #tpu.core_type<tc>, window_params = [{}, {transform_indices = @transform_1, window_bounds = array<i64: 32, 128>}, {pipeline_mode = #tpu.pipeline_mode<synchronous>, transform_indices = @transform_2, window_bounds = array<i64: 1, 128>}, {pipeline_mode = #tpu.pipeline_mode<synchronous>, transform_indices = @transform_3, window_bounds = array<i64: 1, 128>}, {transform_indices = @transform_4, window_bounds = array<i64: 32, 128>}]} {
    %c2_i32 = arith.constant 2 : i32
    %c0_i32 = arith.constant 0 : i32
    %0 = arith.cmpi eq, %c2_i32, %c0_i32 : i32
    %c1_i32 = arith.constant 1 : i32
    %1 = arith.select %0, %c1_i32, %c2_i32 : i32
    %2 = arith.remsi %arg1, %1 : i32
    %c0_i32_0 = arith.constant 0 : i32
    %3 = arith.cmpi ne, %2, %c0_i32_0 : i32
    %c0_i32_1 = arith.constant 0 : i32
    %4 = arith.cmpi slt, %2, %c0_i32_1 : i32
    %c0_i32_2 = arith.constant 0 : i32
    %5 = arith.cmpi slt, %1, %c0_i32_2 : i32
    %6 = arith.xori %4, %5 : i1
    %7 = arith.andi %6, %3 : i1
    %8 = arith.addi %2, %1 : i32
    %9 = arith.select %7, %8, %2 : i32
    %c0_i32_3 = arith.constant 0 : i32
    %10 = arith.cmpi eq, %arg1, %c0_i32_3 : i32
    %11 = arith.extui %10 : i1 to i32
    %c0_i32_4 = arith.constant 0 : i32
    %12 = arith.cmpi ne, %11, %c0_i32_4 : i32
    scf.if %12 {
      %334 = arith.index_cast %arg0 : i32 to index
      %c0_120 = arith.constant 0 : index
      %335 = memref.load %arg2[%334, %c0_120] : memref<2x64xi32, #tpu.memory_space<smem>>
      %c0_i32_121 = arith.constant 0 : i32
      %c0_i32_122 = arith.constant 0 : i32
      %c0_i32_123 = arith.constant 0 : i32
      %336 = tpu.memref_slice %arg3[%335, %c0_i32_123] : memref<512x128xf32, #tpu.memory_space<any>> -> memref<1x128xf32, #tpu.memory_space<any>>
      %c0_i32_124 = arith.constant 0 : i32
      %c0_i32_125 = arith.constant 0 : i32
      %337 = tpu.memref_slice %arg8[%c0_i32_121, %c0_i32_124, %c0_i32_125] : memref<2x32x128xf32, #tpu.memory_space<vmem>> -> memref<1x1x128xf32, #tpu.memory_space<vmem>>
      %338 = tpu.memref_squeeze %337 : memref<1x1x128xf32, #tpu.memory_space<vmem>> -> memref<1x128xf32, #tpu.memory_space<vmem>>
      %339 = tpu.memref_slice %arg9[%c0_i32_122] : memref<2x!tpu.dma_semaphore, #tpu.memory_space<semaphore_mem>> -> memref<1x!tpu.dma_semaphore, #tpu.memory_space<semaphore_mem>>
      %340 = tpu.memref_squeeze %339 : memref<1x!tpu.dma_semaphore, #tpu.memory_space<semaphore_mem>> -> memref<!tpu.dma_semaphore, #tpu.memory_space<semaphore_mem>>
      tpu.enqueue_dma source(%336 : memref<1x128xf32, #tpu.memory_space<any>>) target(%338 : memref<1x128xf32, #tpu.memory_space<vmem>>) target_semaphore(%340 : memref<!tpu.dma_semaphore, #tpu.memory_space<semaphore_mem>>)
      %341 = arith.index_cast %arg0 : i32 to index
      %c1 = arith.constant 1 : index
      %342 = memref.load %arg2[%341, %c1] : memref<2x64xi32, #tpu.memory_space<smem>>
      %c0_i32_126 = arith.constant 0 : i32
      %c0_i32_127 = arith.constant 0 : i32
      %c0_i32_128 = arith.constant 0 : i32
      %343 = tpu.memref_slice %arg3[%342, %c0_i32_128] : memref<512x128xf32, #tpu.memory_space<any>> -> memref<1x128xf32, #tpu.memory_space<any>>
      %c1_i32_129 = arith.constant 1 : i32
      %c0_i32_130 = arith.constant 0 : i32
      %344 = tpu.memref_slice %arg8[%c0_i32_126, %c1_i32_129, %c0_i32_130] : memref<2x32x128xf32, #tpu.memory_space<vmem>> -> memref<1x1x128xf32, #tpu.memory_space<vmem>>
      %345 = tpu.memref_squeeze %344 : memref<1x1x128xf32, #tpu.memory_space<vmem>> -> memref<1x128xf32, #tpu.memory_space<vmem>>
      %346 = tpu.memref_slice %arg9[%c0_i32_127] : memref<2x!tpu.dma_semaphore, #tpu.memory_space<semaphore_mem>> -> memref<1x!tpu.dma_semaphore, #tpu.memory_space<semaphore_mem>>
      %347 = tpu.memref_squeeze %346 : memref<1x!tpu.dma_semaphore, #tpu.memory_space<semaphore_mem>> -> memref<!tpu.dma_semaphore, #tpu.memory_space<semaphore_mem>>
      tpu.enqueue_dma source(%343 : memref<1x128xf32, #tpu.memory_space<any>>) target(%345 : memref<1x128xf32, #tpu.memory_space<vmem>>) target_semaphore(%347 : memref<!tpu.dma_semaphore, #tpu.memory_space<semaphore_mem>>)
      %348 = arith.index_cast %arg0 : i32 to index
      %c2 = arith.constant 2 : index
      %349 = memref.load %arg2[%348, %c2] : memref<2x64xi32, #tpu.memory_space<smem>>
      %c0_i32_131 = arith.constant 0 : i32
      %c0_i32_132 = arith.constant 0 : i32
      %c0_i32_133 = arith.constant 0 : i32
      %350 = tpu.memref_slice %arg3[%349, %c0_i32_133] : memref<512x128xf32, #tpu.memory_space<any>> -> memref<1x128xf32, #tpu.memory_space<any>>
      %c2_i32_134 = arith.constant 2 : i32
      %c0_i32_135 = arith.constant 0 : i32
      %351 = tpu.memref_slice %arg8[%c0_i32_131, %c2_i32_134, %c0_i32_135] : memref<2x32x128xf32, #tpu.memory_space<vmem>> -> memref<1x1x128xf32, #tpu.memory_space<vmem>>
      %352 = tpu.memref_squeeze %351 : memref<1x1x128xf32, #tpu.memory_space<vmem>> -> memref<1x128xf32, #tpu.memory_space<vmem>>
      %353 = tpu.memref_slice %arg9[%c0_i32_132] : memref<2x!tpu.dma_semaphore, #tpu.memory_space<semaphore_mem>> -> memref<1x!tpu.dma_semaphore, #tpu.memory_space<semaphore_mem>>
      %354 = tpu.memref_squeeze %353 : memref<1x!tpu.dma_semaphore, #tpu.memory_space<semaphore_mem>> -> memref<!tpu.dma_semaphore, #tpu.memory_space<semaphore_mem>>
      tpu.enqueue_dma source(%350 : memref<1x128xf32, #tpu.memory_space<any>>) target(%352 : memref<1x128xf32, #tpu.memory_space<vmem>>) target_semaphore(%354 : memref<!tpu.dma_semaphore, #tpu.memory_space<semaphore_mem>>)
      %355 = arith.index_cast %arg0 : i32 to index
      %c3 = arith.constant 3 : index
      %356 = memref.load %arg2[%355, %c3] : memref<2x64xi32, #tpu.memory_space<smem>>
      %c0_i32_136 = arith.constant 0 : i32
      %c0_i32_137 = arith.constant 0 : i32
      %c0_i32_138 = arith.constant 0 : i32
      %357 = tpu.memref_slice %arg3[%356, %c0_i32_138] : memref<512x128xf32, #tpu.memory_space<any>> -> memref<1x128xf32, #tpu.memory_space<any>>
      %c3_i32_139 = arith.constant 3 : i32
      %c0_i32_140 = arith.constant 0 : i32
      %358 = tpu.memref_slice %arg8[%c0_i32_136, %c3_i32_139, %c0_i32_140] : memref<2x32x128xf32, #tpu.memory_space<vmem>> -> memref<1x1x128xf32, #tpu.memory_space<vmem>>
      %359 = tpu.memref_squeeze %358 : memref<1x1x128xf32, #tpu.memory_space<vmem>> -> memref<1x128xf32, #tpu.memory_space<vmem>>
      %360 = tpu.memref_slice %arg9[%c0_i32_137] : memref<2x!tpu.dma_semaphore, #tpu.memory_space<semaphore_mem>> -> memref<1x!tpu.dma_semaphore, #tpu.memory_space<semaphore_mem>>
      %361 = tpu.memref_squeeze %360 : memref<1x!tpu.dma_semaphore, #tpu.memory_space<semaphore_mem>> -> memref<!tpu.dma_semaphore, #tpu.memory_space<semaphore_mem>>
      tpu.enqueue_dma source(%357 : memref<1x128xf32, #tpu.memory_space<any>>) target(%359 : memref<1x128xf32, #tpu.memory_space<vmem>>) target_semaphore(%361 : memref<!tpu.dma_semaphore, #tpu.memory_space<semaphore_mem>>)
      %362 = arith.index_cast %arg0 : i32 to index
      %c4 = arith.constant 4 : index
      %363 = memref.load %arg2[%362, %c4] : memref<2x64xi32, #tpu.memory_space<smem>>
      %c0_i32_141 = arith.constant 0 : i32
      %c0_i32_142 = arith.constant 0 : i32
      %c0_i32_143 = arith.constant 0 : i32
      %364 = tpu.memref_slice %arg3[%363, %c0_i32_143] : memref<512x128xf32, #tpu.memory_space<any>> -> memref<1x128xf32, #tpu.memory_space<any>>
      %c4_i32_144 = arith.constant 4 : i32
      %c0_i32_145 = arith.constant 0 : i32
      %365 = tpu.memref_slice %arg8[%c0_i32_141, %c4_i32_144, %c0_i32_145] : memref<2x32x128xf32, #tpu.memory_space<vmem>> -> memref<1x1x128xf32, #tpu.memory_space<vmem>>
      %366 = tpu.memref_squeeze %365 : memref<1x1x128xf32, #tpu.memory_space<vmem>> -> memref<1x128xf32, #tpu.memory_space<vmem>>
      %367 = tpu.memref_slice %arg9[%c0_i32_142] : memref<2x!tpu.dma_semaphore, #tpu.memory_space<semaphore_mem>> -> memref<1x!tpu.dma_semaphore, #tpu.memory_space<semaphore_mem>>
      %368 = tpu.memref_squeeze %367 : memref<1x!tpu.dma_semaphore, #tpu.memory_space<semaphore_mem>> -> memref<!tpu.dma_semaphore, #tpu.memory_space<semaphore_mem>>
      tpu.enqueue_dma source(%364 : memref<1x128xf32, #tpu.memory_space<any>>) target(%366 : memref<1x128xf32, #tpu.memory_space<vmem>>) target_semaphore(%368 : memref<!tpu.dma_semaphore, #tpu.memory_space<semaphore_mem>>)
      %369 = arith.index_cast %arg0 : i32 to index
      %c5 = arith.constant 5 : index
      %370 = memref.load %arg2[%369, %c5] : memref<2x64xi32, #tpu.memory_space<smem>>
      %c0_i32_146 = arith.constant 0 : i32
      %c0_i32_147 = arith.constant 0 : i32
      %c0_i32_148 = arith.constant 0 : i32
      %371 = tpu.memref_slice %arg3[%370, %c0_i32_148] : memref<512x128xf32, #tpu.memory_space<any>> -> memref<1x128xf32, #tpu.memory_space<any>>
      %c5_i32_149 = arith.constant 5 : i32
      %c0_i32_150 = arith.constant 0 : i32
      %372 = tpu.memref_slice %arg8[%c0_i32_146, %c5_i32_149, %c0_i32_150] : memref<2x32x128xf32, #tpu.memory_space<vmem>> -> memref<1x1x128xf32, #tpu.memory_space<vmem>>
      %373 = tpu.memref_squeeze %372 : memref<1x1x128xf32, #tpu.memory_space<vmem>> -> memref<1x128xf32, #tpu.memory_space<vmem>>
      %374 = tpu.memref_slice %arg9[%c0_i32_147] : memref<2x!tpu.dma_semaphore, #tpu.memory_space<semaphore_mem>> -> memref<1x!tpu.dma_semaphore, #tpu.memory_space<semaphore_mem>>
      %375 = tpu.memref_squeeze %374 : memref<1x!tpu.dma_semaphore, #tpu.memory_space<semaphore_mem>> -> memref<!tpu.dma_semaphore, #tpu.memory_space<semaphore_mem>>
      tpu.enqueue_dma source(%371 : memref<1x128xf32, #tpu.memory_space<any>>) target(%373 : memref<1x128xf32, #tpu.memory_space<vmem>>) target_semaphore(%375 : memref<!tpu.dma_semaphore, #tpu.memory_space<semaphore_mem>>)
      %376 = arith.index_cast %arg0 : i32 to index
      %c6 = arith.constant 6 : index
      %377 = memref.load %arg2[%376, %c6] : memref<2x64xi32, #tpu.memory_space<smem>>
      %c0_i32_151 = arith.constant 0 : i32
      %c0_i32_152 = arith.constant 0 : i32
      %c0_i32_153 = arith.constant 0 : i32
      %378 = tpu.memref_slice %arg3[%377, %c0_i32_153] : memref<512x128xf32, #tpu.memory_space<any>> -> memref<1x128xf32, #tpu.memory_space<any>>
      %c6_i32_154 = arith.constant 6 : i32
      %c0_i32_155 = arith.constant 0 : i32
      %379 = tpu.memref_slice %arg8[%c0_i32_151, %c6_i32_154, %c0_i32_155] : memref<2x32x128xf32, #tpu.memory_space<vmem>> -> memref<1x1x128xf32, #tpu.memory_space<vmem>>
      %380 = tpu.memref_squeeze %379 : memref<1x1x128xf32, #tpu.memory_space<vmem>> -> memref<1x128xf32, #tpu.memory_space<vmem>>
      %381 = tpu.memref_slice %arg9[%c0_i32_152] : memref<2x!tpu.dma_semaphore, #tpu.memory_space<semaphore_mem>> -> memref<1x!tpu.dma_semaphore, #tpu.memory_space<semaphore_mem>>
      %382 = tpu.memref_squeeze %381 : memref<1x!tpu.dma_semaphore, #tpu.memory_space<semaphore_mem>> -> memref<!tpu.dma_semaphore, #tpu.memory_space<semaphore_mem>>
      tpu.enqueue_dma source(%378 : memref<1x128xf32, #tpu.memory_space<any>>) target(%380 : memref<1x128xf32, #tpu.memory_space<vmem>>) target_semaphore(%382 : memref<!tpu.dma_semaphore, #tpu.memory_space<semaphore_mem>>)
      %383 = arith.index_cast %arg0 : i32 to index
      %c7 = arith.constant 7 : index
      %384 = memref.load %arg2[%383, %c7] : memref<2x64xi32, #tpu.memory_space<smem>>
      %c0_i32_156 = arith.constant 0 : i32
      %c0_i32_157 = arith.constant 0 : i32
      %c0_i32_158 = arith.constant 0 : i32
      %385 = tpu.memref_slice %arg3[%384, %c0_i32_158] : memref<512x128xf32, #tpu.memory_space<any>> -> memref<1x128xf32, #tpu.memory_space<any>>
      %c7_i32_159 = arith.constant 7 : i32
      %c0_i32_160 = arith.constant 0 : i32
      %386 = tpu.memref_slice %arg8[%c0_i32_156, %c7_i32_159, %c0_i32_160] : memref<2x32x128xf32, #tpu.memory_space<vmem>> -> memref<1x1x128xf32, #tpu.memory_space<vmem>>
      %387 = tpu.memref_squeeze %386 : memref<1x1x128xf32, #tpu.memory_space<vmem>> -> memref<1x128xf32, #tpu.memory_space<vmem>>
      %388 = tpu.memref_slice %arg9[%c0_i32_157] : memref<2x!tpu.dma_semaphore, #tpu.memory_space<semaphore_mem>> -> memref<1x!tpu.dma_semaphore, #tpu.memory_space<semaphore_mem>>
      %389 = tpu.memref_squeeze %388 : memref<1x!tpu.dma_semaphore, #tpu.memory_space<semaphore_mem>> -> memref<!tpu.dma_semaphore, #tpu.memory_space<semaphore_mem>>
      tpu.enqueue_dma source(%385 : memref<1x128xf32, #tpu.memory_space<any>>) target(%387 : memref<1x128xf32, #tpu.memory_space<vmem>>) target_semaphore(%389 : memref<!tpu.dma_semaphore, #tpu.memory_space<semaphore_mem>>)
      %390 = arith.index_cast %arg0 : i32 to index
      %c8 = arith.constant 8 : index
      %391 = memref.load %arg2[%390, %c8] : memref<2x64xi32, #tpu.memory_space<smem>>
      %c0_i32_161 = arith.constant 0 : i32
      %c0_i32_162 = arith.constant 0 : i32
      %c0_i32_163 = arith.constant 0 : i32
      %392 = tpu.memref_slice %arg3[%391, %c0_i32_163] : memref<512x128xf32, #tpu.memory_space<any>> -> memref<1x128xf32, #tpu.memory_space<any>>
      %c8_i32_164 = arith.constant 8 : i32
      %c0_i32_165 = arith.constant 0 : i32
      %393 = tpu.memref_slice %arg8[%c0_i32_161, %c8_i32_164, %c0_i32_165] : memref<2x32x128xf32, #tpu.memory_space<vmem>> -> memref<1x1x128xf32, #tpu.memory_space<vmem>>
      %394 = tpu.memref_squeeze %393 : memref<1x1x128xf32, #tpu.memory_space<vmem>> -> memref<1x128xf32, #tpu.memory_space<vmem>>
      %395 = tpu.memref_slice %arg9[%c0_i32_162] : memref<2x!tpu.dma_semaphore, #tpu.memory_space<semaphore_mem>> -> memref<1x!tpu.dma_semaphore, #tpu.memory_space<semaphore_mem>>
      %396 = tpu.memref_squeeze %395 : memref<1x!tpu.dma_semaphore, #tpu.memory_space<semaphore_mem>> -> memref<!tpu.dma_semaphore, #tpu.memory_space<semaphore_mem>>
      tpu.enqueue_dma source(%392 : memref<1x128xf32, #tpu.memory_space<any>>) target(%394 : memref<1x128xf32, #tpu.memory_space<vmem>>) target_semaphore(%396 : memref<!tpu.dma_semaphore, #tpu.memory_space<semaphore_mem>>)
      %397 = arith.index_cast %arg0 : i32 to index
      %c9 = arith.constant 9 : index
      %398 = memref.load %arg2[%397, %c9] : memref<2x64xi32, #tpu.memory_space<smem>>
      %c0_i32_166 = arith.constant 0 : i32
      %c0_i32_167 = arith.constant 0 : i32
      %c0_i32_168 = arith.constant 0 : i32
      %399 = tpu.memref_slice %arg3[%398, %c0_i32_168] : memref<512x128xf32, #tpu.memory_space<any>> -> memref<1x128xf32, #tpu.memory_space<any>>
      %c9_i32_169 = arith.constant 9 : i32
      %c0_i32_170 = arith.constant 0 : i32
      %400 = tpu.memref_slice %arg8[%c0_i32_166, %c9_i32_169, %c0_i32_170] : memref<2x32x128xf32, #tpu.memory_space<vmem>> -> memref<1x1x128xf32, #tpu.memory_space<vmem>>
      %401 = tpu.memref_squeeze %400 : memref<1x1x128xf32, #tpu.memory_space<vmem>> -> memref<1x128xf32, #tpu.memory_space<vmem>>
      %402 = tpu.memref_slice %arg9[%c0_i32_167] : memref<2x!tpu.dma_semaphore, #tpu.memory_space<semaphore_mem>> -> memref<1x!tpu.dma_semaphore, #tpu.memory_space<semaphore_mem>>
      %403 = tpu.memref_squeeze %402 : memref<1x!tpu.dma_semaphore, #tpu.memory_space<semaphore_mem>> -> memref<!tpu.dma_semaphore, #tpu.memory_space<semaphore_mem>>
      tpu.enqueue_dma source(%399 : memref<1x128xf32, #tpu.memory_space<any>>) target(%401 : memref<1x128xf32, #tpu.memory_space<vmem>>) target_semaphore(%403 : memref<!tpu.dma_semaphore, #tpu.memory_space<semaphore_mem>>)
      %404 = arith.index_cast %arg0 : i32 to index
      %c10 = arith.constant 10 : index
      %405 = memref.load %arg2[%404, %c10] : memref<2x64xi32, #tpu.memory_space<smem>>
      %c0_i32_171 = arith.constant 0 : i32
      %c0_i32_172 = arith.constant 0 : i32
      %c0_i32_173 = arith.constant 0 : i32
      %406 = tpu.memref_slice %arg3[%405, %c0_i32_173] : memref<512x128xf32, #tpu.memory_space<any>> -> memref<1x128xf32, #tpu.memory_space<any>>
      %c10_i32_174 = arith.constant 10 : i32
      %c0_i32_175 = arith.constant 0 : i32
      %407 = tpu.memref_slice %arg8[%c0_i32_171, %c10_i32_174, %c0_i32_175] : memref<2x32x128xf32, #tpu.memory_space<vmem>> -> memref<1x1x128xf32, #tpu.memory_space<vmem>>
      %408 = tpu.memref_squeeze %407 : memref<1x1x128xf32, #tpu.memory_space<vmem>> -> memref<1x128xf32, #tpu.memory_space<vmem>>
      %409 = tpu.memref_slice %arg9[%c0_i32_172] : memref<2x!tpu.dma_semaphore, #tpu.memory_space<semaphore_mem>> -> memref<1x!tpu.dma_semaphore, #tpu.memory_space<semaphore_mem>>
      %410 = tpu.memref_squeeze %409 : memref<1x!tpu.dma_semaphore, #tpu.memory_space<semaphore_mem>> -> memref<!tpu.dma_semaphore, #tpu.memory_space<semaphore_mem>>
      tpu.enqueue_dma source(%406 : memref<1x128xf32, #tpu.memory_space<any>>) target(%408 : memref<1x128xf32, #tpu.memory_space<vmem>>) target_semaphore(%410 : memref<!tpu.dma_semaphore, #tpu.memory_space<semaphore_mem>>)
      %411 = arith.index_cast %arg0 : i32 to index
      %c11 = arith.constant 11 : index
      %412 = memref.load %arg2[%411, %c11] : memref<2x64xi32, #tpu.memory_space<smem>>
      %c0_i32_176 = arith.constant 0 : i32
      %c0_i32_177 = arith.constant 0 : i32
      %c0_i32_178 = arith.constant 0 : i32
      %413 = tpu.memref_slice %arg3[%412, %c0_i32_178] : memref<512x128xf32, #tpu.memory_space<any>> -> memref<1x128xf32, #tpu.memory_space<any>>
      %c11_i32_179 = arith.constant 11 : i32
      %c0_i32_180 = arith.constant 0 : i32
      %414 = tpu.memref_slice %arg8[%c0_i32_176, %c11_i32_179, %c0_i32_180] : memref<2x32x128xf32, #tpu.memory_space<vmem>> -> memref<1x1x128xf32, #tpu.memory_space<vmem>>
      %415 = tpu.memref_squeeze %414 : memref<1x1x128xf32, #tpu.memory_space<vmem>> -> memref<1x128xf32, #tpu.memory_space<vmem>>
      %416 = tpu.memref_slice %arg9[%c0_i32_177] : memref<2x!tpu.dma_semaphore, #tpu.memory_space<semaphore_mem>> -> memref<1x!tpu.dma_semaphore, #tpu.memory_space<semaphore_mem>>
      %417 = tpu.memref_squeeze %416 : memref<1x!tpu.dma_semaphore, #tpu.memory_space<semaphore_mem>> -> memref<!tpu.dma_semaphore, #tpu.memory_space<semaphore_mem>>
      tpu.enqueue_dma source(%413 : memref<1x128xf32, #tpu.memory_space<any>>) target(%415 : memref<1x128xf32, #tpu.memory_space<vmem>>) target_semaphore(%417 : memref<!tpu.dma_semaphore, #tpu.memory_space<semaphore_mem>>)
      %418 = arith.index_cast %arg0 : i32 to index
      %c12 = arith.constant 12 : index
      %419 = memref.load %arg2[%418, %c12] : memref<2x64xi32, #tpu.memory_space<smem>>
      %c0_i32_181 = arith.constant 0 : i32
      %c0_i32_182 = arith.constant 0 : i32
      %c0_i32_183 = arith.constant 0 : i32
      %420 = tpu.memref_slice %arg3[%419, %c0_i32_183] : memref<512x128xf32, #tpu.memory_space<any>> -> memref<1x128xf32, #tpu.memory_space<any>>
      %c12_i32_184 = arith.constant 12 : i32
      %c0_i32_185 = arith.constant 0 : i32
      %421 = tpu.memref_slice %arg8[%c0_i32_181, %c12_i32_184, %c0_i32_185] : memref<2x32x128xf32, #tpu.memory_space<vmem>> -> memref<1x1x128xf32, #tpu.memory_space<vmem>>
      %422 = tpu.memref_squeeze %421 : memref<1x1x128xf32, #tpu.memory_space<vmem>> -> memref<1x128xf32, #tpu.memory_space<vmem>>
      %423 = tpu.memref_slice %arg9[%c0_i32_182] : memref<2x!tpu.dma_semaphore, #tpu.memory_space<semaphore_mem>> -> memref<1x!tpu.dma_semaphore, #tpu.memory_space<semaphore_mem>>
      %424 = tpu.memref_squeeze %423 : memref<1x!tpu.dma_semaphore, #tpu.memory_space<semaphore_mem>> -> memref<!tpu.dma_semaphore, #tpu.memory_space<semaphore_mem>>
      tpu.enqueue_dma source(%420 : memref<1x128xf32, #tpu.memory_space<any>>) target(%422 : memref<1x128xf32, #tpu.memory_space<vmem>>) target_semaphore(%424 : memref<!tpu.dma_semaphore, #tpu.memory_space<semaphore_mem>>)
      %425 = arith.index_cast %arg0 : i32 to index
      %c13 = arith.constant 13 : index
      %426 = memref.load %arg2[%425, %c13] : memref<2x64xi32, #tpu.memory_space<smem>>
      %c0_i32_186 = arith.constant 0 : i32
      %c0_i32_187 = arith.constant 0 : i32
      %c0_i32_188 = arith.constant 0 : i32
      %427 = tpu.memref_slice %arg3[%426, %c0_i32_188] : memref<512x128xf32, #tpu.memory_space<any>> -> memref<1x128xf32, #tpu.memory_space<any>>
      %c13_i32_189 = arith.constant 13 : i32
      %c0_i32_190 = arith.constant 0 : i32
      %428 = tpu.memref_slice %arg8[%c0_i32_186, %c13_i32_189, %c0_i32_190] : memref<2x32x128xf32, #tpu.memory_space<vmem>> -> memref<1x1x128xf32, #tpu.memory_space<vmem>>
      %429 = tpu.memref_squeeze %428 : memref<1x1x128xf32, #tpu.memory_space<vmem>> -> memref<1x128xf32, #tpu.memory_space<vmem>>
      %430 = tpu.memref_slice %arg9[%c0_i32_187] : memref<2x!tpu.dma_semaphore, #tpu.memory_space<semaphore_mem>> -> memref<1x!tpu.dma_semaphore, #tpu.memory_space<semaphore_mem>>
      %431 = tpu.memref_squeeze %430 : memref<1x!tpu.dma_semaphore, #tpu.memory_space<semaphore_mem>> -> memref<!tpu.dma_semaphore, #tpu.memory_space<semaphore_mem>>
      tpu.enqueue_dma source(%427 : memref<1x128xf32, #tpu.memory_space<any>>) target(%429 : memref<1x128xf32, #tpu.memory_space<vmem>>) target_semaphore(%431 : memref<!tpu.dma_semaphore, #tpu.memory_space<semaphore_mem>>)
      %432 = arith.index_cast %arg0 : i32 to index
      %c14 = arith.constant 14 : index
      %433 = memref.load %arg2[%432, %c14] : memref<2x64xi32, #tpu.memory_space<smem>>
      %c0_i32_191 = arith.constant 0 : i32
      %c0_i32_192 = arith.constant 0 : i32
      %c0_i32_193 = arith.constant 0 : i32
      %434 = tpu.memref_slice %arg3[%433, %c0_i32_193] : memref<512x128xf32, #tpu.memory_space<any>> -> memref<1x128xf32, #tpu.memory_space<any>>
      %c14_i32_194 = arith.constant 14 : i32
      %c0_i32_195 = arith.constant 0 : i32
      %435 = tpu.memref_slice %arg8[%c0_i32_191, %c14_i32_194, %c0_i32_195] : memref<2x32x128xf32, #tpu.memory_space<vmem>> -> memref<1x1x128xf32, #tpu.memory_space<vmem>>
      %436 = tpu.memref_squeeze %435 : memref<1x1x128xf32, #tpu.memory_space<vmem>> -> memref<1x128xf32, #tpu.memory_space<vmem>>
      %437 = tpu.memref_slice %arg9[%c0_i32_192] : memref<2x!tpu.dma_semaphore, #tpu.memory_space<semaphore_mem>> -> memref<1x!tpu.dma_semaphore, #tpu.memory_space<semaphore_mem>>
      %438 = tpu.memref_squeeze %437 : memref<1x!tpu.dma_semaphore, #tpu.memory_space<semaphore_mem>> -> memref<!tpu.dma_semaphore, #tpu.memory_space<semaphore_mem>>
      tpu.enqueue_dma source(%434 : memref<1x128xf32, #tpu.memory_space<any>>) target(%436 : memref<1x128xf32, #tpu.memory_space<vmem>>) target_semaphore(%438 : memref<!tpu.dma_semaphore, #tpu.memory_space<semaphore_mem>>)
      %439 = arith.index_cast %arg0 : i32 to index
      %c15 = arith.constant 15 : index
      %440 = memref.load %arg2[%439, %c15] : memref<2x64xi32, #tpu.memory_space<smem>>
      %c0_i32_196 = arith.constant 0 : i32
      %c0_i32_197 = arith.constant 0 : i32
      %c0_i32_198 = arith.constant 0 : i32
      %441 = tpu.memref_slice %arg3[%440, %c0_i32_198] : memref<512x128xf32, #tpu.memory_space<any>> -> memref<1x128xf32, #tpu.memory_space<any>>
      %c15_i32_199 = arith.constant 15 : i32
      %c0_i32_200 = arith.constant 0 : i32
      %442 = tpu.memref_slice %arg8[%c0_i32_196, %c15_i32_199, %c0_i32_200] : memref<2x32x128xf32, #tpu.memory_space<vmem>> -> memref<1x1x128xf32, #tpu.memory_space<vmem>>
      %443 = tpu.memref_squeeze %442 : memref<1x1x128xf32, #tpu.memory_space<vmem>> -> memref<1x128xf32, #tpu.memory_space<vmem>>
      %444 = tpu.memref_slice %arg9[%c0_i32_197] : memref<2x!tpu.dma_semaphore, #tpu.memory_space<semaphore_mem>> -> memref<1x!tpu.dma_semaphore, #tpu.memory_space<semaphore_mem>>
      %445 = tpu.memref_squeeze %444 : memref<1x!tpu.dma_semaphore, #tpu.memory_space<semaphore_mem>> -> memref<!tpu.dma_semaphore, #tpu.memory_space<semaphore_mem>>
      tpu.enqueue_dma source(%441 : memref<1x128xf32, #tpu.memory_space<any>>) target(%443 : memref<1x128xf32, #tpu.memory_space<vmem>>) target_semaphore(%445 : memref<!tpu.dma_semaphore, #tpu.memory_space<semaphore_mem>>)
      %446 = arith.index_cast %arg0 : i32 to index
      %c16 = arith.constant 16 : index
      %447 = memref.load %arg2[%446, %c16] : memref<2x64xi32, #tpu.memory_space<smem>>
      %c0_i32_201 = arith.constant 0 : i32
      %c0_i32_202 = arith.constant 0 : i32
      %c0_i32_203 = arith.constant 0 : i32
      %448 = tpu.memref_slice %arg3[%447, %c0_i32_203] : memref<512x128xf32, #tpu.memory_space<any>> -> memref<1x128xf32, #tpu.memory_space<any>>
      %c16_i32_204 = arith.constant 16 : i32
      %c0_i32_205 = arith.constant 0 : i32
      %449 = tpu.memref_slice %arg8[%c0_i32_201, %c16_i32_204, %c0_i32_205] : memref<2x32x128xf32, #tpu.memory_space<vmem>> -> memref<1x1x128xf32, #tpu.memory_space<vmem>>
      %450 = tpu.memref_squeeze %449 : memref<1x1x128xf32, #tpu.memory_space<vmem>> -> memref<1x128xf32, #tpu.memory_space<vmem>>
      %451 = tpu.memref_slice %arg9[%c0_i32_202] : memref<2x!tpu.dma_semaphore, #tpu.memory_space<semaphore_mem>> -> memref<1x!tpu.dma_semaphore, #tpu.memory_space<semaphore_mem>>
      %452 = tpu.memref_squeeze %451 : memref<1x!tpu.dma_semaphore, #tpu.memory_space<semaphore_mem>> -> memref<!tpu.dma_semaphore, #tpu.memory_space<semaphore_mem>>
      tpu.enqueue_dma source(%448 : memref<1x128xf32, #tpu.memory_space<any>>) target(%450 : memref<1x128xf32, #tpu.memory_space<vmem>>) target_semaphore(%452 : memref<!tpu.dma_semaphore, #tpu.memory_space<semaphore_mem>>)
      %453 = arith.index_cast %arg0 : i32 to index
      %c17 = arith.constant 17 : index
      %454 = memref.load %arg2[%453, %c17] : memref<2x64xi32, #tpu.memory_space<smem>>
      %c0_i32_206 = arith.constant 0 : i32
      %c0_i32_207 = arith.constant 0 : i32
      %c0_i32_208 = arith.constant 0 : i32
      %455 = tpu.memref_slice %arg3[%454, %c0_i32_208] : memref<512x128xf32, #tpu.memory_space<any>> -> memref<1x128xf32, #tpu.memory_space<any>>
      %c17_i32_209 = arith.constant 17 : i32
      %c0_i32_210 = arith.constant 0 : i32
      %456 = tpu.memref_slice %arg8[%c0_i32_206, %c17_i32_209, %c0_i32_210] : memref<2x32x128xf32, #tpu.memory_space<vmem>> -> memref<1x1x128xf32, #tpu.memory_space<vmem>>
      %457 = tpu.memref_squeeze %456 : memref<1x1x128xf32, #tpu.memory_space<vmem>> -> memref<1x128xf32, #tpu.memory_space<vmem>>
      %458 = tpu.memref_slice %arg9[%c0_i32_207] : memref<2x!tpu.dma_semaphore, #tpu.memory_space<semaphore_mem>> -> memref<1x!tpu.dma_semaphore, #tpu.memory_space<semaphore_mem>>
      %459 = tpu.memref_squeeze %458 : memref<1x!tpu.dma_semaphore, #tpu.memory_space<semaphore_mem>> -> memref<!tpu.dma_semaphore, #tpu.memory_space<semaphore_mem>>
      tpu.enqueue_dma source(%455 : memref<1x128xf32, #tpu.memory_space<any>>) target(%457 : memref<1x128xf32, #tpu.memory_space<vmem>>) target_semaphore(%459 : memref<!tpu.dma_semaphore, #tpu.memory_space<semaphore_mem>>)
      %460 = arith.index_cast %arg0 : i32 to index
      %c18 = arith.constant 18 : index
      %461 = memref.load %arg2[%460, %c18] : memref<2x64xi32, #tpu.memory_space<smem>>
      %c0_i32_211 = arith.constant 0 : i32
      %c0_i32_212 = arith.constant 0 : i32
      %c0_i32_213 = arith.constant 0 : i32
      %462 = tpu.memref_slice %arg3[%461, %c0_i32_213] : memref<512x128xf32, #tpu.memory_space<any>> -> memref<1x128xf32, #tpu.memory_space<any>>
      %c18_i32_214 = arith.constant 18 : i32
      %c0_i32_215 = arith.constant 0 : i32
      %463 = tpu.memref_slice %arg8[%c0_i32_211, %c18_i32_214, %c0_i32_215] : memref<2x32x128xf32, #tpu.memory_space<vmem>> -> memref<1x1x128xf32, #tpu.memory_space<vmem>>
      %464 = tpu.memref_squeeze %463 : memref<1x1x128xf32, #tpu.memory_space<vmem>> -> memref<1x128xf32, #tpu.memory_space<vmem>>
      %465 = tpu.memref_slice %arg9[%c0_i32_212] : memref<2x!tpu.dma_semaphore, #tpu.memory_space<semaphore_mem>> -> memref<1x!tpu.dma_semaphore, #tpu.memory_space<semaphore_mem>>
      %466 = tpu.memref_squeeze %465 : memref<1x!tpu.dma_semaphore, #tpu.memory_space<semaphore_mem>> -> memref<!tpu.dma_semaphore, #tpu.memory_space<semaphore_mem>>
      tpu.enqueue_dma source(%462 : memref<1x128xf32, #tpu.memory_space<any>>) target(%464 : memref<1x128xf32, #tpu.memory_space<vmem>>) target_semaphore(%466 : memref<!tpu.dma_semaphore, #tpu.memory_space<semaphore_mem>>)
      %467 = arith.index_cast %arg0 : i32 to index
      %c19 = arith.constant 19 : index
      %468 = memref.load %arg2[%467, %c19] : memref<2x64xi32, #tpu.memory_space<smem>>
      %c0_i32_216 = arith.constant 0 : i32
      %c0_i32_217 = arith.constant 0 : i32
      %c0_i32_218 = arith.constant 0 : i32
      %469 = tpu.memref_slice %arg3[%468, %c0_i32_218] : memref<512x128xf32, #tpu.memory_space<any>> -> memref<1x128xf32, #tpu.memory_space<any>>
      %c19_i32_219 = arith.constant 19 : i32
      %c0_i32_220 = arith.constant 0 : i32
      %470 = tpu.memref_slice %arg8[%c0_i32_216, %c19_i32_219, %c0_i32_220] : memref<2x32x128xf32, #tpu.memory_space<vmem>> -> memref<1x1x128xf32, #tpu.memory_space<vmem>>
      %471 = tpu.memref_squeeze %470 : memref<1x1x128xf32, #tpu.memory_space<vmem>> -> memref<1x128xf32, #tpu.memory_space<vmem>>
      %472 = tpu.memref_slice %arg9[%c0_i32_217] : memref<2x!tpu.dma_semaphore, #tpu.memory_space<semaphore_mem>> -> memref<1x!tpu.dma_semaphore, #tpu.memory_space<semaphore_mem>>
      %473 = tpu.memref_squeeze %472 : memref<1x!tpu.dma_semaphore, #tpu.memory_space<semaphore_mem>> -> memref<!tpu.dma_semaphore, #tpu.memory_space<semaphore_mem>>
      tpu.enqueue_dma source(%469 : memref<1x128xf32, #tpu.memory_space<any>>) target(%471 : memref<1x128xf32, #tpu.memory_space<vmem>>) target_semaphore(%473 : memref<!tpu.dma_semaphore, #tpu.memory_space<semaphore_mem>>)
      %474 = arith.index_cast %arg0 : i32 to index
      %c20 = arith.constant 20 : index
      %475 = memref.load %arg2[%474, %c20] : memref<2x64xi32, #tpu.memory_space<smem>>
      %c0_i32_221 = arith.constant 0 : i32
      %c0_i32_222 = arith.constant 0 : i32
      %c0_i32_223 = arith.constant 0 : i32
      %476 = tpu.memref_slice %arg3[%475, %c0_i32_223] : memref<512x128xf32, #tpu.memory_space<any>> -> memref<1x128xf32, #tpu.memory_space<any>>
      %c20_i32_224 = arith.constant 20 : i32
      %c0_i32_225 = arith.constant 0 : i32
      %477 = tpu.memref_slice %arg8[%c0_i32_221, %c20_i32_224, %c0_i32_225] : memref<2x32x128xf32, #tpu.memory_space<vmem>> -> memref<1x1x128xf32, #tpu.memory_space<vmem>>
      %478 = tpu.memref_squeeze %477 : memref<1x1x128xf32, #tpu.memory_space<vmem>> -> memref<1x128xf32, #tpu.memory_space<vmem>>
      %479 = tpu.memref_slice %arg9[%c0_i32_222] : memref<2x!tpu.dma_semaphore, #tpu.memory_space<semaphore_mem>> -> memref<1x!tpu.dma_semaphore, #tpu.memory_space<semaphore_mem>>
      %480 = tpu.memref_squeeze %479 : memref<1x!tpu.dma_semaphore, #tpu.memory_space<semaphore_mem>> -> memref<!tpu.dma_semaphore, #tpu.memory_space<semaphore_mem>>
      tpu.enqueue_dma source(%476 : memref<1x128xf32, #tpu.memory_space<any>>) target(%478 : memref<1x128xf32, #tpu.memory_space<vmem>>) target_semaphore(%480 : memref<!tpu.dma_semaphore, #tpu.memory_space<semaphore_mem>>)
      %481 = arith.index_cast %arg0 : i32 to index
      %c21 = arith.constant 21 : index
      %482 = memref.load %arg2[%481, %c21] : memref<2x64xi32, #tpu.memory_space<smem>>
      %c0_i32_226 = arith.constant 0 : i32
      %c0_i32_227 = arith.constant 0 : i32
      %c0_i32_228 = arith.constant 0 : i32
      %483 = tpu.memref_slice %arg3[%482, %c0_i32_228] : memref<512x128xf32, #tpu.memory_space<any>> -> memref<1x128xf32, #tpu.memory_space<any>>
      %c21_i32_229 = arith.constant 21 : i32
      %c0_i32_230 = arith.constant 0 : i32
      %484 = tpu.memref_slice %arg8[%c0_i32_226, %c21_i32_229, %c0_i32_230] : memref<2x32x128xf32, #tpu.memory_space<vmem>> -> memref<1x1x128xf32, #tpu.memory_space<vmem>>
      %485 = tpu.memref_squeeze %484 : memref<1x1x128xf32, #tpu.memory_space<vmem>> -> memref<1x128xf32, #tpu.memory_space<vmem>>
      %486 = tpu.memref_slice %arg9[%c0_i32_227] : memref<2x!tpu.dma_semaphore, #tpu.memory_space<semaphore_mem>> -> memref<1x!tpu.dma_semaphore, #tpu.memory_space<semaphore_mem>>
      %487 = tpu.memref_squeeze %486 : memref<1x!tpu.dma_semaphore, #tpu.memory_space<semaphore_mem>> -> memref<!tpu.dma_semaphore, #tpu.memory_space<semaphore_mem>>
      tpu.enqueue_dma source(%483 : memref<1x128xf32, #tpu.memory_space<any>>) target(%485 : memref<1x128xf32, #tpu.memory_space<vmem>>) target_semaphore(%487 : memref<!tpu.dma_semaphore, #tpu.memory_space<semaphore_mem>>)
      %488 = arith.index_cast %arg0 : i32 to index
      %c22 = arith.constant 22 : index
      %489 = memref.load %arg2[%488, %c22] : memref<2x64xi32, #tpu.memory_space<smem>>
      %c0_i32_231 = arith.constant 0 : i32
      %c0_i32_232 = arith.constant 0 : i32
      %c0_i32_233 = arith.constant 0 : i32
      %490 = tpu.memref_slice %arg3[%489, %c0_i32_233] : memref<512x128xf32, #tpu.memory_space<any>> -> memref<1x128xf32, #tpu.memory_space<any>>
      %c22_i32_234 = arith.constant 22 : i32
      %c0_i32_235 = arith.constant 0 : i32
      %491 = tpu.memref_slice %arg8[%c0_i32_231, %c22_i32_234, %c0_i32_235] : memref<2x32x128xf32, #tpu.memory_space<vmem>> -> memref<1x1x128xf32, #tpu.memory_space<vmem>>
      %492 = tpu.memref_squeeze %491 : memref<1x1x128xf32, #tpu.memory_space<vmem>> -> memref<1x128xf32, #tpu.memory_space<vmem>>
      %493 = tpu.memref_slice %arg9[%c0_i32_232] : memref<2x!tpu.dma_semaphore, #tpu.memory_space<semaphore_mem>> -> memref<1x!tpu.dma_semaphore, #tpu.memory_space<semaphore_mem>>
      %494 = tpu.memref_squeeze %493 : memref<1x!tpu.dma_semaphore, #tpu.memory_space<semaphore_mem>> -> memref<!tpu.dma_semaphore, #tpu.memory_space<semaphore_mem>>
      tpu.enqueue_dma source(%490 : memref<1x128xf32, #tpu.memory_space<any>>) target(%492 : memref<1x128xf32, #tpu.memory_space<vmem>>) target_semaphore(%494 : memref<!tpu.dma_semaphore, #tpu.memory_space<semaphore_mem>>)
      %495 = arith.index_cast %arg0 : i32 to index
      %c23 = arith.constant 23 : index
      %496 = memref.load %arg2[%495, %c23] : memref<2x64xi32, #tpu.memory_space<smem>>
      %c0_i32_236 = arith.constant 0 : i32
      %c0_i32_237 = arith.constant 0 : i32
      %c0_i32_238 = arith.constant 0 : i32
      %497 = tpu.memref_slice %arg3[%496, %c0_i32_238] : memref<512x128xf32, #tpu.memory_space<any>> -> memref<1x128xf32, #tpu.memory_space<any>>
      %c23_i32_239 = arith.constant 23 : i32
      %c0_i32_240 = arith.constant 0 : i32
      %498 = tpu.memref_slice %arg8[%c0_i32_236, %c23_i32_239, %c0_i32_240] : memref<2x32x128xf32, #tpu.memory_space<vmem>> -> memref<1x1x128xf32, #tpu.memory_space<vmem>>
      %499 = tpu.memref_squeeze %498 : memref<1x1x128xf32, #tpu.memory_space<vmem>> -> memref<1x128xf32, #tpu.memory_space<vmem>>
      %500 = tpu.memref_slice %arg9[%c0_i32_237] : memref<2x!tpu.dma_semaphore, #tpu.memory_space<semaphore_mem>> -> memref<1x!tpu.dma_semaphore, #tpu.memory_space<semaphore_mem>>
      %501 = tpu.memref_squeeze %500 : memref<1x!tpu.dma_semaphore, #tpu.memory_space<semaphore_mem>> -> memref<!tpu.dma_semaphore, #tpu.memory_space<semaphore_mem>>
      tpu.enqueue_dma source(%497 : memref<1x128xf32, #tpu.memory_space<any>>) target(%499 : memref<1x128xf32, #tpu.memory_space<vmem>>) target_semaphore(%501 : memref<!tpu.dma_semaphore, #tpu.memory_space<semaphore_mem>>)
      %502 = arith.index_cast %arg0 : i32 to index
      %c24 = arith.constant 24 : index
      %503 = memref.load %arg2[%502, %c24] : memref<2x64xi32, #tpu.memory_space<smem>>
      %c0_i32_241 = arith.constant 0 : i32
      %c0_i32_242 = arith.constant 0 : i32
      %c0_i32_243 = arith.constant 0 : i32
      %504 = tpu.memref_slice %arg3[%503, %c0_i32_243] : memref<512x128xf32, #tpu.memory_space<any>> -> memref<1x128xf32, #tpu.memory_space<any>>
      %c24_i32_244 = arith.constant 24 : i32
      %c0_i32_245 = arith.constant 0 : i32
      %505 = tpu.memref_slice %arg8[%c0_i32_241, %c24_i32_244, %c0_i32_245] : memref<2x32x128xf32, #tpu.memory_space<vmem>> -> memref<1x1x128xf32, #tpu.memory_space<vmem>>
      %506 = tpu.memref_squeeze %505 : memref<1x1x128xf32, #tpu.memory_space<vmem>> -> memref<1x128xf32, #tpu.memory_space<vmem>>
      %507 = tpu.memref_slice %arg9[%c0_i32_242] : memref<2x!tpu.dma_semaphore, #tpu.memory_space<semaphore_mem>> -> memref<1x!tpu.dma_semaphore, #tpu.memory_space<semaphore_mem>>
      %508 = tpu.memref_squeeze %507 : memref<1x!tpu.dma_semaphore, #tpu.memory_space<semaphore_mem>> -> memref<!tpu.dma_semaphore, #tpu.memory_space<semaphore_mem>>
      tpu.enqueue_dma source(%504 : memref<1x128xf32, #tpu.memory_space<any>>) target(%506 : memref<1x128xf32, #tpu.memory_space<vmem>>) target_semaphore(%508 : memref<!tpu.dma_semaphore, #tpu.memory_space<semaphore_mem>>)
      %509 = arith.index_cast %arg0 : i32 to index
      %c25 = arith.constant 25 : index
      %510 = memref.load %arg2[%509, %c25] : memref<2x64xi32, #tpu.memory_space<smem>>
      %c0_i32_246 = arith.constant 0 : i32
      %c0_i32_247 = arith.constant 0 : i32
      %c0_i32_248 = arith.constant 0 : i32
      %511 = tpu.memref_slice %arg3[%510, %c0_i32_248] : memref<512x128xf32, #tpu.memory_space<any>> -> memref<1x128xf32, #tpu.memory_space<any>>
      %c25_i32_249 = arith.constant 25 : i32
      %c0_i32_250 = arith.constant 0 : i32
      %512 = tpu.memref_slice %arg8[%c0_i32_246, %c25_i32_249, %c0_i32_250] : memref<2x32x128xf32, #tpu.memory_space<vmem>> -> memref<1x1x128xf32, #tpu.memory_space<vmem>>
      %513 = tpu.memref_squeeze %512 : memref<1x1x128xf32, #tpu.memory_space<vmem>> -> memref<1x128xf32, #tpu.memory_space<vmem>>
      %514 = tpu.memref_slice %arg9[%c0_i32_247] : memref<2x!tpu.dma_semaphore, #tpu.memory_space<semaphore_mem>> -> memref<1x!tpu.dma_semaphore, #tpu.memory_space<semaphore_mem>>
      %515 = tpu.memref_squeeze %514 : memref<1x!tpu.dma_semaphore, #tpu.memory_space<semaphore_mem>> -> memref<!tpu.dma_semaphore, #tpu.memory_space<semaphore_mem>>
      tpu.enqueue_dma source(%511 : memref<1x128xf32, #tpu.memory_space<any>>) target(%513 : memref<1x128xf32, #tpu.memory_space<vmem>>) target_semaphore(%515 : memref<!tpu.dma_semaphore, #tpu.memory_space<semaphore_mem>>)
      %516 = arith.index_cast %arg0 : i32 to index
      %c26 = arith.constant 26 : index
      %517 = memref.load %arg2[%516, %c26] : memref<2x64xi32, #tpu.memory_space<smem>>
      %c0_i32_251 = arith.constant 0 : i32
      %c0_i32_252 = arith.constant 0 : i32
      %c0_i32_253 = arith.constant 0 : i32
      %518 = tpu.memref_slice %arg3[%517, %c0_i32_253] : memref<512x128xf32, #tpu.memory_space<any>> -> memref<1x128xf32, #tpu.memory_space<any>>
      %c26_i32_254 = arith.constant 26 : i32
      %c0_i32_255 = arith.constant 0 : i32
      %519 = tpu.memref_slice %arg8[%c0_i32_251, %c26_i32_254, %c0_i32_255] : memref<2x32x128xf32, #tpu.memory_space<vmem>> -> memref<1x1x128xf32, #tpu.memory_space<vmem>>
      %520 = tpu.memref_squeeze %519 : memref<1x1x128xf32, #tpu.memory_space<vmem>> -> memref<1x128xf32, #tpu.memory_space<vmem>>
      %521 = tpu.memref_slice %arg9[%c0_i32_252] : memref<2x!tpu.dma_semaphore, #tpu.memory_space<semaphore_mem>> -> memref<1x!tpu.dma_semaphore, #tpu.memory_space<semaphore_mem>>
      %522 = tpu.memref_squeeze %521 : memref<1x!tpu.dma_semaphore, #tpu.memory_space<semaphore_mem>> -> memref<!tpu.dma_semaphore, #tpu.memory_space<semaphore_mem>>
      tpu.enqueue_dma source(%518 : memref<1x128xf32, #tpu.memory_space<any>>) target(%520 : memref<1x128xf32, #tpu.memory_space<vmem>>) target_semaphore(%522 : memref<!tpu.dma_semaphore, #tpu.memory_space<semaphore_mem>>)
      %523 = arith.index_cast %arg0 : i32 to index
      %c27 = arith.constant 27 : index
      %524 = memref.load %arg2[%523, %c27] : memref<2x64xi32, #tpu.memory_space<smem>>
      %c0_i32_256 = arith.constant 0 : i32
      %c0_i32_257 = arith.constant 0 : i32
      %c0_i32_258 = arith.constant 0 : i32
      %525 = tpu.memref_slice %arg3[%524, %c0_i32_258] : memref<512x128xf32, #tpu.memory_space<any>> -> memref<1x128xf32, #tpu.memory_space<any>>
      %c27_i32_259 = arith.constant 27 : i32
      %c0_i32_260 = arith.constant 0 : i32
      %526 = tpu.memref_slice %arg8[%c0_i32_256, %c27_i32_259, %c0_i32_260] : memref<2x32x128xf32, #tpu.memory_space<vmem>> -> memref<1x1x128xf32, #tpu.memory_space<vmem>>
      %527 = tpu.memref_squeeze %526 : memref<1x1x128xf32, #tpu.memory_space<vmem>> -> memref<1x128xf32, #tpu.memory_space<vmem>>
      %528 = tpu.memref_slice %arg9[%c0_i32_257] : memref<2x!tpu.dma_semaphore, #tpu.memory_space<semaphore_mem>> -> memref<1x!tpu.dma_semaphore, #tpu.memory_space<semaphore_mem>>
      %529 = tpu.memref_squeeze %528 : memref<1x!tpu.dma_semaphore, #tpu.memory_space<semaphore_mem>> -> memref<!tpu.dma_semaphore, #tpu.memory_space<semaphore_mem>>
      tpu.enqueue_dma source(%525 : memref<1x128xf32, #tpu.memory_space<any>>) target(%527 : memref<1x128xf32, #tpu.memory_space<vmem>>) target_semaphore(%529 : memref<!tpu.dma_semaphore, #tpu.memory_space<semaphore_mem>>)
      %530 = arith.index_cast %arg0 : i32 to index
      %c28 = arith.constant 28 : index
      %531 = memref.load %arg2[%530, %c28] : memref<2x64xi32, #tpu.memory_space<smem>>
      %c0_i32_261 = arith.constant 0 : i32
      %c0_i32_262 = arith.constant 0 : i32
      %c0_i32_263 = arith.constant 0 : i32
      %532 = tpu.memref_slice %arg3[%531, %c0_i32_263] : memref<512x128xf32, #tpu.memory_space<any>> -> memref<1x128xf32, #tpu.memory_space<any>>
      %c28_i32_264 = arith.constant 28 : i32
      %c0_i32_265 = arith.constant 0 : i32
      %533 = tpu.memref_slice %arg8[%c0_i32_261, %c28_i32_264, %c0_i32_265] : memref<2x32x128xf32, #tpu.memory_space<vmem>> -> memref<1x1x128xf32, #tpu.memory_space<vmem>>
      %534 = tpu.memref_squeeze %533 : memref<1x1x128xf32, #tpu.memory_space<vmem>> -> memref<1x128xf32, #tpu.memory_space<vmem>>
      %535 = tpu.memref_slice %arg9[%c0_i32_262] : memref<2x!tpu.dma_semaphore, #tpu.memory_space<semaphore_mem>> -> memref<1x!tpu.dma_semaphore, #tpu.memory_space<semaphore_mem>>
      %536 = tpu.memref_squeeze %535 : memref<1x!tpu.dma_semaphore, #tpu.memory_space<semaphore_mem>> -> memref<!tpu.dma_semaphore, #tpu.memory_space<semaphore_mem>>
      tpu.enqueue_dma source(%532 : memref<1x128xf32, #tpu.memory_space<any>>) target(%534 : memref<1x128xf32, #tpu.memory_space<vmem>>) target_semaphore(%536 : memref<!tpu.dma_semaphore, #tpu.memory_space<semaphore_mem>>)
      %537 = arith.index_cast %arg0 : i32 to index
      %c29 = arith.constant 29 : index
      %538 = memref.load %arg2[%537, %c29] : memref<2x64xi32, #tpu.memory_space<smem>>
      %c0_i32_266 = arith.constant 0 : i32
      %c0_i32_267 = arith.constant 0 : i32
      %c0_i32_268 = arith.constant 0 : i32
      %539 = tpu.memref_slice %arg3[%538, %c0_i32_268] : memref<512x128xf32, #tpu.memory_space<any>> -> memref<1x128xf32, #tpu.memory_space<any>>
      %c29_i32_269 = arith.constant 29 : i32
      %c0_i32_270 = arith.constant 0 : i32
      %540 = tpu.memref_slice %arg8[%c0_i32_266, %c29_i32_269, %c0_i32_270] : memref<2x32x128xf32, #tpu.memory_space<vmem>> -> memref<1x1x128xf32, #tpu.memory_space<vmem>>
      %541 = tpu.memref_squeeze %540 : memref<1x1x128xf32, #tpu.memory_space<vmem>> -> memref<1x128xf32, #tpu.memory_space<vmem>>
      %542 = tpu.memref_slice %arg9[%c0_i32_267] : memref<2x!tpu.dma_semaphore, #tpu.memory_space<semaphore_mem>> -> memref<1x!tpu.dma_semaphore, #tpu.memory_space<semaphore_mem>>
      %543 = tpu.memref_squeeze %542 : memref<1x!tpu.dma_semaphore, #tpu.memory_space<semaphore_mem>> -> memref<!tpu.dma_semaphore, #tpu.memory_space<semaphore_mem>>
      tpu.enqueue_dma source(%539 : memref<1x128xf32, #tpu.memory_space<any>>) target(%541 : memref<1x128xf32, #tpu.memory_space<vmem>>) target_semaphore(%543 : memref<!tpu.dma_semaphore, #tpu.memory_space<semaphore_mem>>)
      %544 = arith.index_cast %arg0 : i32 to index
      %c30 = arith.constant 30 : index
      %545 = memref.load %arg2[%544, %c30] : memref<2x64xi32, #tpu.memory_space<smem>>
      %c0_i32_271 = arith.constant 0 : i32
      %c0_i32_272 = arith.constant 0 : i32
      %c0_i32_273 = arith.constant 0 : i32
      %546 = tpu.memref_slice %arg3[%545, %c0_i32_273] : memref<512x128xf32, #tpu.memory_space<any>> -> memref<1x128xf32, #tpu.memory_space<any>>
      %c30_i32_274 = arith.constant 30 : i32
      %c0_i32_275 = arith.constant 0 : i32
      %547 = tpu.memref_slice %arg8[%c0_i32_271, %c30_i32_274, %c0_i32_275] : memref<2x32x128xf32, #tpu.memory_space<vmem>> -> memref<1x1x128xf32, #tpu.memory_space<vmem>>
      %548 = tpu.memref_squeeze %547 : memref<1x1x128xf32, #tpu.memory_space<vmem>> -> memref<1x128xf32, #tpu.memory_space<vmem>>
      %549 = tpu.memref_slice %arg9[%c0_i32_272] : memref<2x!tpu.dma_semaphore, #tpu.memory_space<semaphore_mem>> -> memref<1x!tpu.dma_semaphore, #tpu.memory_space<semaphore_mem>>
      %550 = tpu.memref_squeeze %549 : memref<1x!tpu.dma_semaphore, #tpu.memory_space<semaphore_mem>> -> memref<!tpu.dma_semaphore, #tpu.memory_space<semaphore_mem>>
      tpu.enqueue_dma source(%546 : memref<1x128xf32, #tpu.memory_space<any>>) target(%548 : memref<1x128xf32, #tpu.memory_space<vmem>>) target_semaphore(%550 : memref<!tpu.dma_semaphore, #tpu.memory_space<semaphore_mem>>)
      %551 = arith.index_cast %arg0 : i32 to index
      %c31 = arith.constant 31 : index
      %552 = memref.load %arg2[%551, %c31] : memref<2x64xi32, #tpu.memory_space<smem>>
      %c0_i32_276 = arith.constant 0 : i32
      %c0_i32_277 = arith.constant 0 : i32
      %c0_i32_278 = arith.constant 0 : i32
      %553 = tpu.memref_slice %arg3[%552, %c0_i32_278] : memref<512x128xf32, #tpu.memory_space<any>> -> memref<1x128xf32, #tpu.memory_space<any>>
      %c31_i32_279 = arith.constant 31 : i32
      %c0_i32_280 = arith.constant 0 : i32
      %554 = tpu.memref_slice %arg8[%c0_i32_276, %c31_i32_279, %c0_i32_280] : memref<2x32x128xf32, #tpu.memory_space<vmem>> -> memref<1x1x128xf32, #tpu.memory_space<vmem>>
      %555 = tpu.memref_squeeze %554 : memref<1x1x128xf32, #tpu.memory_space<vmem>> -> memref<1x128xf32, #tpu.memory_space<vmem>>
      %556 = tpu.memref_slice %arg9[%c0_i32_277] : memref<2x!tpu.dma_semaphore, #tpu.memory_space<semaphore_mem>> -> memref<1x!tpu.dma_semaphore, #tpu.memory_space<semaphore_mem>>
      %557 = tpu.memref_squeeze %556 : memref<1x!tpu.dma_semaphore, #tpu.memory_space<semaphore_mem>> -> memref<!tpu.dma_semaphore, #tpu.memory_space<semaphore_mem>>
      tpu.enqueue_dma source(%553 : memref<1x128xf32, #tpu.memory_space<any>>) target(%555 : memref<1x128xf32, #tpu.memory_space<vmem>>) target_semaphore(%557 : memref<!tpu.dma_semaphore, #tpu.memory_space<semaphore_mem>>)
    } else {
    }
    %c1_i32_5 = arith.constant 1 : i32
    %13 = arith.addi %arg1, %c1_i32_5 : i32
    %c2_i32_6 = arith.constant 2 : i32
    %14 = arith.cmpi slt, %13, %c2_i32_6 : i32
    %15 = arith.extui %14 : i1 to i32
    %c0_i32_7 = arith.constant 0 : i32
    %16 = arith.cmpi ne, %15, %c0_i32_7 : i32
    scf.if %16 {
      %c1_i32_120 = arith.constant 1 : i32
      %334 = arith.addi %arg1, %c1_i32_120 : i32
      %c1_i32_121 = arith.constant 1 : i32
      %335 = arith.subi %c1_i32_121, %9 : i32
      %c32_i32_122 = arith.constant 32 : i32
      %336 = arith.muli %334, %c32_i32_122 : i32
      %c0_i32_123 = arith.constant 0 : i32
      %337 = arith.addi %336, %c0_i32_123 : i32
      %338 = arith.index_cast %arg0 : i32 to index
      %339 = arith.index_cast %337 : i32 to index
      %340 = memref.load %arg2[%338, %339] : memref<2x64xi32, #tpu.memory_space<smem>>
      %c0_i32_124 = arith.constant 0 : i32
      %341 = tpu.memref_slice %arg3[%340, %c0_i32_124] : memref<512x128xf32, #tpu.memory_space<any>> -> memref<1x128xf32, #tpu.memory_space<any>>
      %c0_i32_125 = arith.constant 0 : i32
      %c0_i32_126 = arith.constant 0 : i32
      %342 = tpu.memref_slice %arg8[%335, %c0_i32_125, %c0_i32_126] : memref<2x32x128xf32, #tpu.memory_space<vmem>> -> memref<1x1x128xf32, #tpu.memory_space<vmem>>
      %343 = tpu.memref_squeeze %342 : memref<1x1x128xf32, #tpu.memory_space<vmem>> -> memref<1x128xf32, #tpu.memory_space<vmem>>
      %344 = tpu.memref_slice %arg9[%335] : memref<2x!tpu.dma_semaphore, #tpu.memory_space<semaphore_mem>> -> memref<1x!tpu.dma_semaphore, #tpu.memory_space<semaphore_mem>>
      %345 = tpu.memref_squeeze %344 : memref<1x!tpu.dma_semaphore, #tpu.memory_space<semaphore_mem>> -> memref<!tpu.dma_semaphore, #tpu.memory_space<semaphore_mem>>
      tpu.enqueue_dma source(%341 : memref<1x128xf32, #tpu.memory_space<any>>) target(%343 : memref<1x128xf32, #tpu.memory_space<vmem>>) target_semaphore(%345 : memref<!tpu.dma_semaphore, #tpu.memory_space<semaphore_mem>>)
      %c1_i32_127 = arith.constant 1 : i32
      %346 = arith.addi %336, %c1_i32_127 : i32
      %347 = arith.index_cast %arg0 : i32 to index
      %348 = arith.index_cast %346 : i32 to index
      %349 = memref.load %arg2[%347, %348] : memref<2x64xi32, #tpu.memory_space<smem>>
      %c0_i32_128 = arith.constant 0 : i32
      %350 = tpu.memref_slice %arg3[%349, %c0_i32_128] : memref<512x128xf32, #tpu.memory_space<any>> -> memref<1x128xf32, #tpu.memory_space<any>>
      %c1_i32_129 = arith.constant 1 : i32
      %c0_i32_130 = arith.constant 0 : i32
      %351 = tpu.memref_slice %arg8[%335, %c1_i32_129, %c0_i32_130] : memref<2x32x128xf32, #tpu.memory_space<vmem>> -> memref<1x1x128xf32, #tpu.memory_space<vmem>>
      %352 = tpu.memref_squeeze %351 : memref<1x1x128xf32, #tpu.memory_space<vmem>> -> memref<1x128xf32, #tpu.memory_space<vmem>>
      %353 = tpu.memref_slice %arg9[%335] : memref<2x!tpu.dma_semaphore, #tpu.memory_space<semaphore_mem>> -> memref<1x!tpu.dma_semaphore, #tpu.memory_space<semaphore_mem>>
      %354 = tpu.memref_squeeze %353 : memref<1x!tpu.dma_semaphore, #tpu.memory_space<semaphore_mem>> -> memref<!tpu.dma_semaphore, #tpu.memory_space<semaphore_mem>>
      tpu.enqueue_dma source(%350 : memref<1x128xf32, #tpu.memory_space<any>>) target(%352 : memref<1x128xf32, #tpu.memory_space<vmem>>) target_semaphore(%354 : memref<!tpu.dma_semaphore, #tpu.memory_space<semaphore_mem>>)
      %c2_i32_131 = arith.constant 2 : i32
      %355 = arith.addi %336, %c2_i32_131 : i32
      %356 = arith.index_cast %arg0 : i32 to index
      %357 = arith.index_cast %355 : i32 to index
      %358 = memref.load %arg2[%356, %357] : memref<2x64xi32, #tpu.memory_space<smem>>
      %c0_i32_132 = arith.constant 0 : i32
      %359 = tpu.memref_slice %arg3[%358, %c0_i32_132] : memref<512x128xf32, #tpu.memory_space<any>> -> memref<1x128xf32, #tpu.memory_space<any>>
      %c2_i32_133 = arith.constant 2 : i32
      %c0_i32_134 = arith.constant 0 : i32
      %360 = tpu.memref_slice %arg8[%335, %c2_i32_133, %c0_i32_134] : memref<2x32x128xf32, #tpu.memory_space<vmem>> -> memref<1x1x128xf32, #tpu.memory_space<vmem>>
      %361 = tpu.memref_squeeze %360 : memref<1x1x128xf32, #tpu.memory_space<vmem>> -> memref<1x128xf32, #tpu.memory_space<vmem>>
      %362 = tpu.memref_slice %arg9[%335] : memref<2x!tpu.dma_semaphore, #tpu.memory_space<semaphore_mem>> -> memref<1x!tpu.dma_semaphore, #tpu.memory_space<semaphore_mem>>
      %363 = tpu.memref_squeeze %362 : memref<1x!tpu.dma_semaphore, #tpu.memory_space<semaphore_mem>> -> memref<!tpu.dma_semaphore, #tpu.memory_space<semaphore_mem>>
      tpu.enqueue_dma source(%359 : memref<1x128xf32, #tpu.memory_space<any>>) target(%361 : memref<1x128xf32, #tpu.memory_space<vmem>>) target_semaphore(%363 : memref<!tpu.dma_semaphore, #tpu.memory_space<semaphore_mem>>)
      %c3_i32_135 = arith.constant 3 : i32
      %364 = arith.addi %336, %c3_i32_135 : i32
      %365 = arith.index_cast %arg0 : i32 to index
      %366 = arith.index_cast %364 : i32 to index
      %367 = memref.load %arg2[%365, %366] : memref<2x64xi32, #tpu.memory_space<smem>>
      %c0_i32_136 = arith.constant 0 : i32
      %368 = tpu.memref_slice %arg3[%367, %c0_i32_136] : memref<512x128xf32, #tpu.memory_space<any>> -> memref<1x128xf32, #tpu.memory_space<any>>
      %c3_i32_137 = arith.constant 3 : i32
      %c0_i32_138 = arith.constant 0 : i32
      %369 = tpu.memref_slice %arg8[%335, %c3_i32_137, %c0_i32_138] : memref<2x32x128xf32, #tpu.memory_space<vmem>> -> memref<1x1x128xf32, #tpu.memory_space<vmem>>
      %370 = tpu.memref_squeeze %369 : memref<1x1x128xf32, #tpu.memory_space<vmem>> -> memref<1x128xf32, #tpu.memory_space<vmem>>
      %371 = tpu.memref_slice %arg9[%335] : memref<2x!tpu.dma_semaphore, #tpu.memory_space<semaphore_mem>> -> memref<1x!tpu.dma_semaphore, #tpu.memory_space<semaphore_mem>>
      %372 = tpu.memref_squeeze %371 : memref<1x!tpu.dma_semaphore, #tpu.memory_space<semaphore_mem>> -> memref<!tpu.dma_semaphore, #tpu.memory_space<semaphore_mem>>
      tpu.enqueue_dma source(%368 : memref<1x128xf32, #tpu.memory_space<any>>) target(%370 : memref<1x128xf32, #tpu.memory_space<vmem>>) target_semaphore(%372 : memref<!tpu.dma_semaphore, #tpu.memory_space<semaphore_mem>>)
      %c4_i32_139 = arith.constant 4 : i32
      %373 = arith.addi %336, %c4_i32_139 : i32
      %374 = arith.index_cast %arg0 : i32 to index
      %375 = arith.index_cast %373 : i32 to index
      %376 = memref.load %arg2[%374, %375] : memref<2x64xi32, #tpu.memory_space<smem>>
      %c0_i32_140 = arith.constant 0 : i32
      %377 = tpu.memref_slice %arg3[%376, %c0_i32_140] : memref<512x128xf32, #tpu.memory_space<any>> -> memref<1x128xf32, #tpu.memory_space<any>>
      %c4_i32_141 = arith.constant 4 : i32
      %c0_i32_142 = arith.constant 0 : i32
      %378 = tpu.memref_slice %arg8[%335, %c4_i32_141, %c0_i32_142] : memref<2x32x128xf32, #tpu.memory_space<vmem>> -> memref<1x1x128xf32, #tpu.memory_space<vmem>>
      %379 = tpu.memref_squeeze %378 : memref<1x1x128xf32, #tpu.memory_space<vmem>> -> memref<1x128xf32, #tpu.memory_space<vmem>>
      %380 = tpu.memref_slice %arg9[%335] : memref<2x!tpu.dma_semaphore, #tpu.memory_space<semaphore_mem>> -> memref<1x!tpu.dma_semaphore, #tpu.memory_space<semaphore_mem>>
      %381 = tpu.memref_squeeze %380 : memref<1x!tpu.dma_semaphore, #tpu.memory_space<semaphore_mem>> -> memref<!tpu.dma_semaphore, #tpu.memory_space<semaphore_mem>>
      tpu.enqueue_dma source(%377 : memref<1x128xf32, #tpu.memory_space<any>>) target(%379 : memref<1x128xf32, #tpu.memory_space<vmem>>) target_semaphore(%381 : memref<!tpu.dma_semaphore, #tpu.memory_space<semaphore_mem>>)
      %c5_i32_143 = arith.constant 5 : i32
      %382 = arith.addi %336, %c5_i32_143 : i32
      %383 = arith.index_cast %arg0 : i32 to index
      %384 = arith.index_cast %382 : i32 to index
      %385 = memref.load %arg2[%383, %384] : memref<2x64xi32, #tpu.memory_space<smem>>
      %c0_i32_144 = arith.constant 0 : i32
      %386 = tpu.memref_slice %arg3[%385, %c0_i32_144] : memref<512x128xf32, #tpu.memory_space<any>> -> memref<1x128xf32, #tpu.memory_space<any>>
      %c5_i32_145 = arith.constant 5 : i32
      %c0_i32_146 = arith.constant 0 : i32
      %387 = tpu.memref_slice %arg8[%335, %c5_i32_145, %c0_i32_146] : memref<2x32x128xf32, #tpu.memory_space<vmem>> -> memref<1x1x128xf32, #tpu.memory_space<vmem>>
      %388 = tpu.memref_squeeze %387 : memref<1x1x128xf32, #tpu.memory_space<vmem>> -> memref<1x128xf32, #tpu.memory_space<vmem>>
      %389 = tpu.memref_slice %arg9[%335] : memref<2x!tpu.dma_semaphore, #tpu.memory_space<semaphore_mem>> -> memref<1x!tpu.dma_semaphore, #tpu.memory_space<semaphore_mem>>
      %390 = tpu.memref_squeeze %389 : memref<1x!tpu.dma_semaphore, #tpu.memory_space<semaphore_mem>> -> memref<!tpu.dma_semaphore, #tpu.memory_space<semaphore_mem>>
      tpu.enqueue_dma source(%386 : memref<1x128xf32, #tpu.memory_space<any>>) target(%388 : memref<1x128xf32, #tpu.memory_space<vmem>>) target_semaphore(%390 : memref<!tpu.dma_semaphore, #tpu.memory_space<semaphore_mem>>)
      %c6_i32_147 = arith.constant 6 : i32
      %391 = arith.addi %336, %c6_i32_147 : i32
      %392 = arith.index_cast %arg0 : i32 to index
      %393 = arith.index_cast %391 : i32 to index
      %394 = memref.load %arg2[%392, %393] : memref<2x64xi32, #tpu.memory_space<smem>>
      %c0_i32_148 = arith.constant 0 : i32
      %395 = tpu.memref_slice %arg3[%394, %c0_i32_148] : memref<512x128xf32, #tpu.memory_space<any>> -> memref<1x128xf32, #tpu.memory_space<any>>
      %c6_i32_149 = arith.constant 6 : i32
      %c0_i32_150 = arith.constant 0 : i32
      %396 = tpu.memref_slice %arg8[%335, %c6_i32_149, %c0_i32_150] : memref<2x32x128xf32, #tpu.memory_space<vmem>> -> memref<1x1x128xf32, #tpu.memory_space<vmem>>
      %397 = tpu.memref_squeeze %396 : memref<1x1x128xf32, #tpu.memory_space<vmem>> -> memref<1x128xf32, #tpu.memory_space<vmem>>
      %398 = tpu.memref_slice %arg9[%335] : memref<2x!tpu.dma_semaphore, #tpu.memory_space<semaphore_mem>> -> memref<1x!tpu.dma_semaphore, #tpu.memory_space<semaphore_mem>>
      %399 = tpu.memref_squeeze %398 : memref<1x!tpu.dma_semaphore, #tpu.memory_space<semaphore_mem>> -> memref<!tpu.dma_semaphore, #tpu.memory_space<semaphore_mem>>
      tpu.enqueue_dma source(%395 : memref<1x128xf32, #tpu.memory_space<any>>) target(%397 : memref<1x128xf32, #tpu.memory_space<vmem>>) target_semaphore(%399 : memref<!tpu.dma_semaphore, #tpu.memory_space<semaphore_mem>>)
      %c7_i32_151 = arith.constant 7 : i32
      %400 = arith.addi %336, %c7_i32_151 : i32
      %401 = arith.index_cast %arg0 : i32 to index
      %402 = arith.index_cast %400 : i32 to index
      %403 = memref.load %arg2[%401, %402] : memref<2x64xi32, #tpu.memory_space<smem>>
      %c0_i32_152 = arith.constant 0 : i32
      %404 = tpu.memref_slice %arg3[%403, %c0_i32_152] : memref<512x128xf32, #tpu.memory_space<any>> -> memref<1x128xf32, #tpu.memory_space<any>>
      %c7_i32_153 = arith.constant 7 : i32
      %c0_i32_154 = arith.constant 0 : i32
      %405 = tpu.memref_slice %arg8[%335, %c7_i32_153, %c0_i32_154] : memref<2x32x128xf32, #tpu.memory_space<vmem>> -> memref<1x1x128xf32, #tpu.memory_space<vmem>>
      %406 = tpu.memref_squeeze %405 : memref<1x1x128xf32, #tpu.memory_space<vmem>> -> memref<1x128xf32, #tpu.memory_space<vmem>>
      %407 = tpu.memref_slice %arg9[%335] : memref<2x!tpu.dma_semaphore, #tpu.memory_space<semaphore_mem>> -> memref<1x!tpu.dma_semaphore, #tpu.memory_space<semaphore_mem>>
      %408 = tpu.memref_squeeze %407 : memref<1x!tpu.dma_semaphore, #tpu.memory_space<semaphore_mem>> -> memref<!tpu.dma_semaphore, #tpu.memory_space<semaphore_mem>>
      tpu.enqueue_dma source(%404 : memref<1x128xf32, #tpu.memory_space<any>>) target(%406 : memref<1x128xf32, #tpu.memory_space<vmem>>) target_semaphore(%408 : memref<!tpu.dma_semaphore, #tpu.memory_space<semaphore_mem>>)
      %c8_i32_155 = arith.constant 8 : i32
      %409 = arith.addi %336, %c8_i32_155 : i32
      %410 = arith.index_cast %arg0 : i32 to index
      %411 = arith.index_cast %409 : i32 to index
      %412 = memref.load %arg2[%410, %411] : memref<2x64xi32, #tpu.memory_space<smem>>
      %c0_i32_156 = arith.constant 0 : i32
      %413 = tpu.memref_slice %arg3[%412, %c0_i32_156] : memref<512x128xf32, #tpu.memory_space<any>> -> memref<1x128xf32, #tpu.memory_space<any>>
      %c8_i32_157 = arith.constant 8 : i32
      %c0_i32_158 = arith.constant 0 : i32
      %414 = tpu.memref_slice %arg8[%335, %c8_i32_157, %c0_i32_158] : memref<2x32x128xf32, #tpu.memory_space<vmem>> -> memref<1x1x128xf32, #tpu.memory_space<vmem>>
      %415 = tpu.memref_squeeze %414 : memref<1x1x128xf32, #tpu.memory_space<vmem>> -> memref<1x128xf32, #tpu.memory_space<vmem>>
      %416 = tpu.memref_slice %arg9[%335] : memref<2x!tpu.dma_semaphore, #tpu.memory_space<semaphore_mem>> -> memref<1x!tpu.dma_semaphore, #tpu.memory_space<semaphore_mem>>
      %417 = tpu.memref_squeeze %416 : memref<1x!tpu.dma_semaphore, #tpu.memory_space<semaphore_mem>> -> memref<!tpu.dma_semaphore, #tpu.memory_space<semaphore_mem>>
      tpu.enqueue_dma source(%413 : memref<1x128xf32, #tpu.memory_space<any>>) target(%415 : memref<1x128xf32, #tpu.memory_space<vmem>>) target_semaphore(%417 : memref<!tpu.dma_semaphore, #tpu.memory_space<semaphore_mem>>)
      %c9_i32_159 = arith.constant 9 : i32
      %418 = arith.addi %336, %c9_i32_159 : i32
      %419 = arith.index_cast %arg0 : i32 to index
      %420 = arith.index_cast %418 : i32 to index
      %421 = memref.load %arg2[%419, %420] : memref<2x64xi32, #tpu.memory_space<smem>>
      %c0_i32_160 = arith.constant 0 : i32
      %422 = tpu.memref_slice %arg3[%421, %c0_i32_160] : memref<512x128xf32, #tpu.memory_space<any>> -> memref<1x128xf32, #tpu.memory_space<any>>
      %c9_i32_161 = arith.constant 9 : i32
      %c0_i32_162 = arith.constant 0 : i32
      %423 = tpu.memref_slice %arg8[%335, %c9_i32_161, %c0_i32_162] : memref<2x32x128xf32, #tpu.memory_space<vmem>> -> memref<1x1x128xf32, #tpu.memory_space<vmem>>
      %424 = tpu.memref_squeeze %423 : memref<1x1x128xf32, #tpu.memory_space<vmem>> -> memref<1x128xf32, #tpu.memory_space<vmem>>
      %425 = tpu.memref_slice %arg9[%335] : memref<2x!tpu.dma_semaphore, #tpu.memory_space<semaphore_mem>> -> memref<1x!tpu.dma_semaphore, #tpu.memory_space<semaphore_mem>>
      %426 = tpu.memref_squeeze %425 : memref<1x!tpu.dma_semaphore, #tpu.memory_space<semaphore_mem>> -> memref<!tpu.dma_semaphore, #tpu.memory_space<semaphore_mem>>
      tpu.enqueue_dma source(%422 : memref<1x128xf32, #tpu.memory_space<any>>) target(%424 : memref<1x128xf32, #tpu.memory_space<vmem>>) target_semaphore(%426 : memref<!tpu.dma_semaphore, #tpu.memory_space<semaphore_mem>>)
      %c10_i32_163 = arith.constant 10 : i32
      %427 = arith.addi %336, %c10_i32_163 : i32
      %428 = arith.index_cast %arg0 : i32 to index
      %429 = arith.index_cast %427 : i32 to index
      %430 = memref.load %arg2[%428, %429] : memref<2x64xi32, #tpu.memory_space<smem>>
      %c0_i32_164 = arith.constant 0 : i32
      %431 = tpu.memref_slice %arg3[%430, %c0_i32_164] : memref<512x128xf32, #tpu.memory_space<any>> -> memref<1x128xf32, #tpu.memory_space<any>>
      %c10_i32_165 = arith.constant 10 : i32
      %c0_i32_166 = arith.constant 0 : i32
      %432 = tpu.memref_slice %arg8[%335, %c10_i32_165, %c0_i32_166] : memref<2x32x128xf32, #tpu.memory_space<vmem>> -> memref<1x1x128xf32, #tpu.memory_space<vmem>>
      %433 = tpu.memref_squeeze %432 : memref<1x1x128xf32, #tpu.memory_space<vmem>> -> memref<1x128xf32, #tpu.memory_space<vmem>>
      %434 = tpu.memref_slice %arg9[%335] : memref<2x!tpu.dma_semaphore, #tpu.memory_space<semaphore_mem>> -> memref<1x!tpu.dma_semaphore, #tpu.memory_space<semaphore_mem>>
      %435 = tpu.memref_squeeze %434 : memref<1x!tpu.dma_semaphore, #tpu.memory_space<semaphore_mem>> -> memref<!tpu.dma_semaphore, #tpu.memory_space<semaphore_mem>>
      tpu.enqueue_dma source(%431 : memref<1x128xf32, #tpu.memory_space<any>>) target(%433 : memref<1x128xf32, #tpu.memory_space<vmem>>) target_semaphore(%435 : memref<!tpu.dma_semaphore, #tpu.memory_space<semaphore_mem>>)
      %c11_i32_167 = arith.constant 11 : i32
      %436 = arith.addi %336, %c11_i32_167 : i32
      %437 = arith.index_cast %arg0 : i32 to index
      %438 = arith.index_cast %436 : i32 to index
      %439 = memref.load %arg2[%437, %438] : memref<2x64xi32, #tpu.memory_space<smem>>
      %c0_i32_168 = arith.constant 0 : i32
      %440 = tpu.memref_slice %arg3[%439, %c0_i32_168] : memref<512x128xf32, #tpu.memory_space<any>> -> memref<1x128xf32, #tpu.memory_space<any>>
      %c11_i32_169 = arith.constant 11 : i32
      %c0_i32_170 = arith.constant 0 : i32
      %441 = tpu.memref_slice %arg8[%335, %c11_i32_169, %c0_i32_170] : memref<2x32x128xf32, #tpu.memory_space<vmem>> -> memref<1x1x128xf32, #tpu.memory_space<vmem>>
      %442 = tpu.memref_squeeze %441 : memref<1x1x128xf32, #tpu.memory_space<vmem>> -> memref<1x128xf32, #tpu.memory_space<vmem>>
      %443 = tpu.memref_slice %arg9[%335] : memref<2x!tpu.dma_semaphore, #tpu.memory_space<semaphore_mem>> -> memref<1x!tpu.dma_semaphore, #tpu.memory_space<semaphore_mem>>
      %444 = tpu.memref_squeeze %443 : memref<1x!tpu.dma_semaphore, #tpu.memory_space<semaphore_mem>> -> memref<!tpu.dma_semaphore, #tpu.memory_space<semaphore_mem>>
      tpu.enqueue_dma source(%440 : memref<1x128xf32, #tpu.memory_space<any>>) target(%442 : memref<1x128xf32, #tpu.memory_space<vmem>>) target_semaphore(%444 : memref<!tpu.dma_semaphore, #tpu.memory_space<semaphore_mem>>)
      %c12_i32_171 = arith.constant 12 : i32
      %445 = arith.addi %336, %c12_i32_171 : i32
      %446 = arith.index_cast %arg0 : i32 to index
      %447 = arith.index_cast %445 : i32 to index
      %448 = memref.load %arg2[%446, %447] : memref<2x64xi32, #tpu.memory_space<smem>>
      %c0_i32_172 = arith.constant 0 : i32
      %449 = tpu.memref_slice %arg3[%448, %c0_i32_172] : memref<512x128xf32, #tpu.memory_space<any>> -> memref<1x128xf32, #tpu.memory_space<any>>
      %c12_i32_173 = arith.constant 12 : i32
      %c0_i32_174 = arith.constant 0 : i32
      %450 = tpu.memref_slice %arg8[%335, %c12_i32_173, %c0_i32_174] : memref<2x32x128xf32, #tpu.memory_space<vmem>> -> memref<1x1x128xf32, #tpu.memory_space<vmem>>
      %451 = tpu.memref_squeeze %450 : memref<1x1x128xf32, #tpu.memory_space<vmem>> -> memref<1x128xf32, #tpu.memory_space<vmem>>
      %452 = tpu.memref_slice %arg9[%335] : memref<2x!tpu.dma_semaphore, #tpu.memory_space<semaphore_mem>> -> memref<1x!tpu.dma_semaphore, #tpu.memory_space<semaphore_mem>>
      %453 = tpu.memref_squeeze %452 : memref<1x!tpu.dma_semaphore, #tpu.memory_space<semaphore_mem>> -> memref<!tpu.dma_semaphore, #tpu.memory_space<semaphore_mem>>
      tpu.enqueue_dma source(%449 : memref<1x128xf32, #tpu.memory_space<any>>) target(%451 : memref<1x128xf32, #tpu.memory_space<vmem>>) target_semaphore(%453 : memref<!tpu.dma_semaphore, #tpu.memory_space<semaphore_mem>>)
      %c13_i32_175 = arith.constant 13 : i32
      %454 = arith.addi %336, %c13_i32_175 : i32
      %455 = arith.index_cast %arg0 : i32 to index
      %456 = arith.index_cast %454 : i32 to index
      %457 = memref.load %arg2[%455, %456] : memref<2x64xi32, #tpu.memory_space<smem>>
      %c0_i32_176 = arith.constant 0 : i32
      %458 = tpu.memref_slice %arg3[%457, %c0_i32_176] : memref<512x128xf32, #tpu.memory_space<any>> -> memref<1x128xf32, #tpu.memory_space<any>>
      %c13_i32_177 = arith.constant 13 : i32
      %c0_i32_178 = arith.constant 0 : i32
      %459 = tpu.memref_slice %arg8[%335, %c13_i32_177, %c0_i32_178] : memref<2x32x128xf32, #tpu.memory_space<vmem>> -> memref<1x1x128xf32, #tpu.memory_space<vmem>>
      %460 = tpu.memref_squeeze %459 : memref<1x1x128xf32, #tpu.memory_space<vmem>> -> memref<1x128xf32, #tpu.memory_space<vmem>>
      %461 = tpu.memref_slice %arg9[%335] : memref<2x!tpu.dma_semaphore, #tpu.memory_space<semaphore_mem>> -> memref<1x!tpu.dma_semaphore, #tpu.memory_space<semaphore_mem>>
      %462 = tpu.memref_squeeze %461 : memref<1x!tpu.dma_semaphore, #tpu.memory_space<semaphore_mem>> -> memref<!tpu.dma_semaphore, #tpu.memory_space<semaphore_mem>>
      tpu.enqueue_dma source(%458 : memref<1x128xf32, #tpu.memory_space<any>>) target(%460 : memref<1x128xf32, #tpu.memory_space<vmem>>) target_semaphore(%462 : memref<!tpu.dma_semaphore, #tpu.memory_space<semaphore_mem>>)
      %c14_i32_179 = arith.constant 14 : i32
      %463 = arith.addi %336, %c14_i32_179 : i32
      %464 = arith.index_cast %arg0 : i32 to index
      %465 = arith.index_cast %463 : i32 to index
      %466 = memref.load %arg2[%464, %465] : memref<2x64xi32, #tpu.memory_space<smem>>
      %c0_i32_180 = arith.constant 0 : i32
      %467 = tpu.memref_slice %arg3[%466, %c0_i32_180] : memref<512x128xf32, #tpu.memory_space<any>> -> memref<1x128xf32, #tpu.memory_space<any>>
      %c14_i32_181 = arith.constant 14 : i32
      %c0_i32_182 = arith.constant 0 : i32
      %468 = tpu.memref_slice %arg8[%335, %c14_i32_181, %c0_i32_182] : memref<2x32x128xf32, #tpu.memory_space<vmem>> -> memref<1x1x128xf32, #tpu.memory_space<vmem>>
      %469 = tpu.memref_squeeze %468 : memref<1x1x128xf32, #tpu.memory_space<vmem>> -> memref<1x128xf32, #tpu.memory_space<vmem>>
      %470 = tpu.memref_slice %arg9[%335] : memref<2x!tpu.dma_semaphore, #tpu.memory_space<semaphore_mem>> -> memref<1x!tpu.dma_semaphore, #tpu.memory_space<semaphore_mem>>
      %471 = tpu.memref_squeeze %470 : memref<1x!tpu.dma_semaphore, #tpu.memory_space<semaphore_mem>> -> memref<!tpu.dma_semaphore, #tpu.memory_space<semaphore_mem>>
      tpu.enqueue_dma source(%467 : memref<1x128xf32, #tpu.memory_space<any>>) target(%469 : memref<1x128xf32, #tpu.memory_space<vmem>>) target_semaphore(%471 : memref<!tpu.dma_semaphore, #tpu.memory_space<semaphore_mem>>)
      %c15_i32_183 = arith.constant 15 : i32
      %472 = arith.addi %336, %c15_i32_183 : i32
      %473 = arith.index_cast %arg0 : i32 to index
      %474 = arith.index_cast %472 : i32 to index
      %475 = memref.load %arg2[%473, %474] : memref<2x64xi32, #tpu.memory_space<smem>>
      %c0_i32_184 = arith.constant 0 : i32
      %476 = tpu.memref_slice %arg3[%475, %c0_i32_184] : memref<512x128xf32, #tpu.memory_space<any>> -> memref<1x128xf32, #tpu.memory_space<any>>
      %c15_i32_185 = arith.constant 15 : i32
      %c0_i32_186 = arith.constant 0 : i32
      %477 = tpu.memref_slice %arg8[%335, %c15_i32_185, %c0_i32_186] : memref<2x32x128xf32, #tpu.memory_space<vmem>> -> memref<1x1x128xf32, #tpu.memory_space<vmem>>
      %478 = tpu.memref_squeeze %477 : memref<1x1x128xf32, #tpu.memory_space<vmem>> -> memref<1x128xf32, #tpu.memory_space<vmem>>
      %479 = tpu.memref_slice %arg9[%335] : memref<2x!tpu.dma_semaphore, #tpu.memory_space<semaphore_mem>> -> memref<1x!tpu.dma_semaphore, #tpu.memory_space<semaphore_mem>>
      %480 = tpu.memref_squeeze %479 : memref<1x!tpu.dma_semaphore, #tpu.memory_space<semaphore_mem>> -> memref<!tpu.dma_semaphore, #tpu.memory_space<semaphore_mem>>
      tpu.enqueue_dma source(%476 : memref<1x128xf32, #tpu.memory_space<any>>) target(%478 : memref<1x128xf32, #tpu.memory_space<vmem>>) target_semaphore(%480 : memref<!tpu.dma_semaphore, #tpu.memory_space<semaphore_mem>>)
      %c16_i32_187 = arith.constant 16 : i32
      %481 = arith.addi %336, %c16_i32_187 : i32
      %482 = arith.index_cast %arg0 : i32 to index
      %483 = arith.index_cast %481 : i32 to index
      %484 = memref.load %arg2[%482, %483] : memref<2x64xi32, #tpu.memory_space<smem>>
      %c0_i32_188 = arith.constant 0 : i32
      %485 = tpu.memref_slice %arg3[%484, %c0_i32_188] : memref<512x128xf32, #tpu.memory_space<any>> -> memref<1x128xf32, #tpu.memory_space<any>>
      %c16_i32_189 = arith.constant 16 : i32
      %c0_i32_190 = arith.constant 0 : i32
      %486 = tpu.memref_slice %arg8[%335, %c16_i32_189, %c0_i32_190] : memref<2x32x128xf32, #tpu.memory_space<vmem>> -> memref<1x1x128xf32, #tpu.memory_space<vmem>>
      %487 = tpu.memref_squeeze %486 : memref<1x1x128xf32, #tpu.memory_space<vmem>> -> memref<1x128xf32, #tpu.memory_space<vmem>>
      %488 = tpu.memref_slice %arg9[%335] : memref<2x!tpu.dma_semaphore, #tpu.memory_space<semaphore_mem>> -> memref<1x!tpu.dma_semaphore, #tpu.memory_space<semaphore_mem>>
      %489 = tpu.memref_squeeze %488 : memref<1x!tpu.dma_semaphore, #tpu.memory_space<semaphore_mem>> -> memref<!tpu.dma_semaphore, #tpu.memory_space<semaphore_mem>>
      tpu.enqueue_dma source(%485 : memref<1x128xf32, #tpu.memory_space<any>>) target(%487 : memref<1x128xf32, #tpu.memory_space<vmem>>) target_semaphore(%489 : memref<!tpu.dma_semaphore, #tpu.memory_space<semaphore_mem>>)
      %c17_i32_191 = arith.constant 17 : i32
      %490 = arith.addi %336, %c17_i32_191 : i32
      %491 = arith.index_cast %arg0 : i32 to index
      %492 = arith.index_cast %490 : i32 to index
      %493 = memref.load %arg2[%491, %492] : memref<2x64xi32, #tpu.memory_space<smem>>
      %c0_i32_192 = arith.constant 0 : i32
      %494 = tpu.memref_slice %arg3[%493, %c0_i32_192] : memref<512x128xf32, #tpu.memory_space<any>> -> memref<1x128xf32, #tpu.memory_space<any>>
      %c17_i32_193 = arith.constant 17 : i32
      %c0_i32_194 = arith.constant 0 : i32
      %495 = tpu.memref_slice %arg8[%335, %c17_i32_193, %c0_i32_194] : memref<2x32x128xf32, #tpu.memory_space<vmem>> -> memref<1x1x128xf32, #tpu.memory_space<vmem>>
      %496 = tpu.memref_squeeze %495 : memref<1x1x128xf32, #tpu.memory_space<vmem>> -> memref<1x128xf32, #tpu.memory_space<vmem>>
      %497 = tpu.memref_slice %arg9[%335] : memref<2x!tpu.dma_semaphore, #tpu.memory_space<semaphore_mem>> -> memref<1x!tpu.dma_semaphore, #tpu.memory_space<semaphore_mem>>
      %498 = tpu.memref_squeeze %497 : memref<1x!tpu.dma_semaphore, #tpu.memory_space<semaphore_mem>> -> memref<!tpu.dma_semaphore, #tpu.memory_space<semaphore_mem>>
      tpu.enqueue_dma source(%494 : memref<1x128xf32, #tpu.memory_space<any>>) target(%496 : memref<1x128xf32, #tpu.memory_space<vmem>>) target_semaphore(%498 : memref<!tpu.dma_semaphore, #tpu.memory_space<semaphore_mem>>)
      %c18_i32_195 = arith.constant 18 : i32
      %499 = arith.addi %336, %c18_i32_195 : i32
      %500 = arith.index_cast %arg0 : i32 to index
      %501 = arith.index_cast %499 : i32 to index
      %502 = memref.load %arg2[%500, %501] : memref<2x64xi32, #tpu.memory_space<smem>>
      %c0_i32_196 = arith.constant 0 : i32
      %503 = tpu.memref_slice %arg3[%502, %c0_i32_196] : memref<512x128xf32, #tpu.memory_space<any>> -> memref<1x128xf32, #tpu.memory_space<any>>
      %c18_i32_197 = arith.constant 18 : i32
      %c0_i32_198 = arith.constant 0 : i32
      %504 = tpu.memref_slice %arg8[%335, %c18_i32_197, %c0_i32_198] : memref<2x32x128xf32, #tpu.memory_space<vmem>> -> memref<1x1x128xf32, #tpu.memory_space<vmem>>
      %505 = tpu.memref_squeeze %504 : memref<1x1x128xf32, #tpu.memory_space<vmem>> -> memref<1x128xf32, #tpu.memory_space<vmem>>
      %506 = tpu.memref_slice %arg9[%335] : memref<2x!tpu.dma_semaphore, #tpu.memory_space<semaphore_mem>> -> memref<1x!tpu.dma_semaphore, #tpu.memory_space<semaphore_mem>>
      %507 = tpu.memref_squeeze %506 : memref<1x!tpu.dma_semaphore, #tpu.memory_space<semaphore_mem>> -> memref<!tpu.dma_semaphore, #tpu.memory_space<semaphore_mem>>
      tpu.enqueue_dma source(%503 : memref<1x128xf32, #tpu.memory_space<any>>) target(%505 : memref<1x128xf32, #tpu.memory_space<vmem>>) target_semaphore(%507 : memref<!tpu.dma_semaphore, #tpu.memory_space<semaphore_mem>>)
      %c19_i32_199 = arith.constant 19 : i32
      %508 = arith.addi %336, %c19_i32_199 : i32
      %509 = arith.index_cast %arg0 : i32 to index
      %510 = arith.index_cast %508 : i32 to index
      %511 = memref.load %arg2[%509, %510] : memref<2x64xi32, #tpu.memory_space<smem>>
      %c0_i32_200 = arith.constant 0 : i32
      %512 = tpu.memref_slice %arg3[%511, %c0_i32_200] : memref<512x128xf32, #tpu.memory_space<any>> -> memref<1x128xf32, #tpu.memory_space<any>>
      %c19_i32_201 = arith.constant 19 : i32
      %c0_i32_202 = arith.constant 0 : i32
      %513 = tpu.memref_slice %arg8[%335, %c19_i32_201, %c0_i32_202] : memref<2x32x128xf32, #tpu.memory_space<vmem>> -> memref<1x1x128xf32, #tpu.memory_space<vmem>>
      %514 = tpu.memref_squeeze %513 : memref<1x1x128xf32, #tpu.memory_space<vmem>> -> memref<1x128xf32, #tpu.memory_space<vmem>>
      %515 = tpu.memref_slice %arg9[%335] : memref<2x!tpu.dma_semaphore, #tpu.memory_space<semaphore_mem>> -> memref<1x!tpu.dma_semaphore, #tpu.memory_space<semaphore_mem>>
      %516 = tpu.memref_squeeze %515 : memref<1x!tpu.dma_semaphore, #tpu.memory_space<semaphore_mem>> -> memref<!tpu.dma_semaphore, #tpu.memory_space<semaphore_mem>>
      tpu.enqueue_dma source(%512 : memref<1x128xf32, #tpu.memory_space<any>>) target(%514 : memref<1x128xf32, #tpu.memory_space<vmem>>) target_semaphore(%516 : memref<!tpu.dma_semaphore, #tpu.memory_space<semaphore_mem>>)
      %c20_i32_203 = arith.constant 20 : i32
      %517 = arith.addi %336, %c20_i32_203 : i32
      %518 = arith.index_cast %arg0 : i32 to index
      %519 = arith.index_cast %517 : i32 to index
      %520 = memref.load %arg2[%518, %519] : memref<2x64xi32, #tpu.memory_space<smem>>
      %c0_i32_204 = arith.constant 0 : i32
      %521 = tpu.memref_slice %arg3[%520, %c0_i32_204] : memref<512x128xf32, #tpu.memory_space<any>> -> memref<1x128xf32, #tpu.memory_space<any>>
      %c20_i32_205 = arith.constant 20 : i32
      %c0_i32_206 = arith.constant 0 : i32
      %522 = tpu.memref_slice %arg8[%335, %c20_i32_205, %c0_i32_206] : memref<2x32x128xf32, #tpu.memory_space<vmem>> -> memref<1x1x128xf32, #tpu.memory_space<vmem>>
      %523 = tpu.memref_squeeze %522 : memref<1x1x128xf32, #tpu.memory_space<vmem>> -> memref<1x128xf32, #tpu.memory_space<vmem>>
      %524 = tpu.memref_slice %arg9[%335] : memref<2x!tpu.dma_semaphore, #tpu.memory_space<semaphore_mem>> -> memref<1x!tpu.dma_semaphore, #tpu.memory_space<semaphore_mem>>
      %525 = tpu.memref_squeeze %524 : memref<1x!tpu.dma_semaphore, #tpu.memory_space<semaphore_mem>> -> memref<!tpu.dma_semaphore, #tpu.memory_space<semaphore_mem>>
      tpu.enqueue_dma source(%521 : memref<1x128xf32, #tpu.memory_space<any>>) target(%523 : memref<1x128xf32, #tpu.memory_space<vmem>>) target_semaphore(%525 : memref<!tpu.dma_semaphore, #tpu.memory_space<semaphore_mem>>)
      %c21_i32_207 = arith.constant 21 : i32
      %526 = arith.addi %336, %c21_i32_207 : i32
      %527 = arith.index_cast %arg0 : i32 to index
      %528 = arith.index_cast %526 : i32 to index
      %529 = memref.load %arg2[%527, %528] : memref<2x64xi32, #tpu.memory_space<smem>>
      %c0_i32_208 = arith.constant 0 : i32
      %530 = tpu.memref_slice %arg3[%529, %c0_i32_208] : memref<512x128xf32, #tpu.memory_space<any>> -> memref<1x128xf32, #tpu.memory_space<any>>
      %c21_i32_209 = arith.constant 21 : i32
      %c0_i32_210 = arith.constant 0 : i32
      %531 = tpu.memref_slice %arg8[%335, %c21_i32_209, %c0_i32_210] : memref<2x32x128xf32, #tpu.memory_space<vmem>> -> memref<1x1x128xf32, #tpu.memory_space<vmem>>
      %532 = tpu.memref_squeeze %531 : memref<1x1x128xf32, #tpu.memory_space<vmem>> -> memref<1x128xf32, #tpu.memory_space<vmem>>
      %533 = tpu.memref_slice %arg9[%335] : memref<2x!tpu.dma_semaphore, #tpu.memory_space<semaphore_mem>> -> memref<1x!tpu.dma_semaphore, #tpu.memory_space<semaphore_mem>>
      %534 = tpu.memref_squeeze %533 : memref<1x!tpu.dma_semaphore, #tpu.memory_space<semaphore_mem>> -> memref<!tpu.dma_semaphore, #tpu.memory_space<semaphore_mem>>
      tpu.enqueue_dma source(%530 : memref<1x128xf32, #tpu.memory_space<any>>) target(%532 : memref<1x128xf32, #tpu.memory_space<vmem>>) target_semaphore(%534 : memref<!tpu.dma_semaphore, #tpu.memory_space<semaphore_mem>>)
      %c22_i32_211 = arith.constant 22 : i32
      %535 = arith.addi %336, %c22_i32_211 : i32
      %536 = arith.index_cast %arg0 : i32 to index
      %537 = arith.index_cast %535 : i32 to index
      %538 = memref.load %arg2[%536, %537] : memref<2x64xi32, #tpu.memory_space<smem>>
      %c0_i32_212 = arith.constant 0 : i32
      %539 = tpu.memref_slice %arg3[%538, %c0_i32_212] : memref<512x128xf32, #tpu.memory_space<any>> -> memref<1x128xf32, #tpu.memory_space<any>>
      %c22_i32_213 = arith.constant 22 : i32
      %c0_i32_214 = arith.constant 0 : i32
      %540 = tpu.memref_slice %arg8[%335, %c22_i32_213, %c0_i32_214] : memref<2x32x128xf32, #tpu.memory_space<vmem>> -> memref<1x1x128xf32, #tpu.memory_space<vmem>>
      %541 = tpu.memref_squeeze %540 : memref<1x1x128xf32, #tpu.memory_space<vmem>> -> memref<1x128xf32, #tpu.memory_space<vmem>>
      %542 = tpu.memref_slice %arg9[%335] : memref<2x!tpu.dma_semaphore, #tpu.memory_space<semaphore_mem>> -> memref<1x!tpu.dma_semaphore, #tpu.memory_space<semaphore_mem>>
      %543 = tpu.memref_squeeze %542 : memref<1x!tpu.dma_semaphore, #tpu.memory_space<semaphore_mem>> -> memref<!tpu.dma_semaphore, #tpu.memory_space<semaphore_mem>>
      tpu.enqueue_dma source(%539 : memref<1x128xf32, #tpu.memory_space<any>>) target(%541 : memref<1x128xf32, #tpu.memory_space<vmem>>) target_semaphore(%543 : memref<!tpu.dma_semaphore, #tpu.memory_space<semaphore_mem>>)
      %c23_i32_215 = arith.constant 23 : i32
      %544 = arith.addi %336, %c23_i32_215 : i32
      %545 = arith.index_cast %arg0 : i32 to index
      %546 = arith.index_cast %544 : i32 to index
      %547 = memref.load %arg2[%545, %546] : memref<2x64xi32, #tpu.memory_space<smem>>
      %c0_i32_216 = arith.constant 0 : i32
      %548 = tpu.memref_slice %arg3[%547, %c0_i32_216] : memref<512x128xf32, #tpu.memory_space<any>> -> memref<1x128xf32, #tpu.memory_space<any>>
      %c23_i32_217 = arith.constant 23 : i32
      %c0_i32_218 = arith.constant 0 : i32
      %549 = tpu.memref_slice %arg8[%335, %c23_i32_217, %c0_i32_218] : memref<2x32x128xf32, #tpu.memory_space<vmem>> -> memref<1x1x128xf32, #tpu.memory_space<vmem>>
      %550 = tpu.memref_squeeze %549 : memref<1x1x128xf32, #tpu.memory_space<vmem>> -> memref<1x128xf32, #tpu.memory_space<vmem>>
      %551 = tpu.memref_slice %arg9[%335] : memref<2x!tpu.dma_semaphore, #tpu.memory_space<semaphore_mem>> -> memref<1x!tpu.dma_semaphore, #tpu.memory_space<semaphore_mem>>
      %552 = tpu.memref_squeeze %551 : memref<1x!tpu.dma_semaphore, #tpu.memory_space<semaphore_mem>> -> memref<!tpu.dma_semaphore, #tpu.memory_space<semaphore_mem>>
      tpu.enqueue_dma source(%548 : memref<1x128xf32, #tpu.memory_space<any>>) target(%550 : memref<1x128xf32, #tpu.memory_space<vmem>>) target_semaphore(%552 : memref<!tpu.dma_semaphore, #tpu.memory_space<semaphore_mem>>)
      %c24_i32_219 = arith.constant 24 : i32
      %553 = arith.addi %336, %c24_i32_219 : i32
      %554 = arith.index_cast %arg0 : i32 to index
      %555 = arith.index_cast %553 : i32 to index
      %556 = memref.load %arg2[%554, %555] : memref<2x64xi32, #tpu.memory_space<smem>>
      %c0_i32_220 = arith.constant 0 : i32
      %557 = tpu.memref_slice %arg3[%556, %c0_i32_220] : memref<512x128xf32, #tpu.memory_space<any>> -> memref<1x128xf32, #tpu.memory_space<any>>
      %c24_i32_221 = arith.constant 24 : i32
      %c0_i32_222 = arith.constant 0 : i32
      %558 = tpu.memref_slice %arg8[%335, %c24_i32_221, %c0_i32_222] : memref<2x32x128xf32, #tpu.memory_space<vmem>> -> memref<1x1x128xf32, #tpu.memory_space<vmem>>
      %559 = tpu.memref_squeeze %558 : memref<1x1x128xf32, #tpu.memory_space<vmem>> -> memref<1x128xf32, #tpu.memory_space<vmem>>
      %560 = tpu.memref_slice %arg9[%335] : memref<2x!tpu.dma_semaphore, #tpu.memory_space<semaphore_mem>> -> memref<1x!tpu.dma_semaphore, #tpu.memory_space<semaphore_mem>>
      %561 = tpu.memref_squeeze %560 : memref<1x!tpu.dma_semaphore, #tpu.memory_space<semaphore_mem>> -> memref<!tpu.dma_semaphore, #tpu.memory_space<semaphore_mem>>
      tpu.enqueue_dma source(%557 : memref<1x128xf32, #tpu.memory_space<any>>) target(%559 : memref<1x128xf32, #tpu.memory_space<vmem>>) target_semaphore(%561 : memref<!tpu.dma_semaphore, #tpu.memory_space<semaphore_mem>>)
      %c25_i32_223 = arith.constant 25 : i32
      %562 = arith.addi %336, %c25_i32_223 : i32
      %563 = arith.index_cast %arg0 : i32 to index
      %564 = arith.index_cast %562 : i32 to index
      %565 = memref.load %arg2[%563, %564] : memref<2x64xi32, #tpu.memory_space<smem>>
      %c0_i32_224 = arith.constant 0 : i32
      %566 = tpu.memref_slice %arg3[%565, %c0_i32_224] : memref<512x128xf32, #tpu.memory_space<any>> -> memref<1x128xf32, #tpu.memory_space<any>>
      %c25_i32_225 = arith.constant 25 : i32
      %c0_i32_226 = arith.constant 0 : i32
      %567 = tpu.memref_slice %arg8[%335, %c25_i32_225, %c0_i32_226] : memref<2x32x128xf32, #tpu.memory_space<vmem>> -> memref<1x1x128xf32, #tpu.memory_space<vmem>>
      %568 = tpu.memref_squeeze %567 : memref<1x1x128xf32, #tpu.memory_space<vmem>> -> memref<1x128xf32, #tpu.memory_space<vmem>>
      %569 = tpu.memref_slice %arg9[%335] : memref<2x!tpu.dma_semaphore, #tpu.memory_space<semaphore_mem>> -> memref<1x!tpu.dma_semaphore, #tpu.memory_space<semaphore_mem>>
      %570 = tpu.memref_squeeze %569 : memref<1x!tpu.dma_semaphore, #tpu.memory_space<semaphore_mem>> -> memref<!tpu.dma_semaphore, #tpu.memory_space<semaphore_mem>>
      tpu.enqueue_dma source(%566 : memref<1x128xf32, #tpu.memory_space<any>>) target(%568 : memref<1x128xf32, #tpu.memory_space<vmem>>) target_semaphore(%570 : memref<!tpu.dma_semaphore, #tpu.memory_space<semaphore_mem>>)
      %c26_i32_227 = arith.constant 26 : i32
      %571 = arith.addi %336, %c26_i32_227 : i32
      %572 = arith.index_cast %arg0 : i32 to index
      %573 = arith.index_cast %571 : i32 to index
      %574 = memref.load %arg2[%572, %573] : memref<2x64xi32, #tpu.memory_space<smem>>
      %c0_i32_228 = arith.constant 0 : i32
      %575 = tpu.memref_slice %arg3[%574, %c0_i32_228] : memref<512x128xf32, #tpu.memory_space<any>> -> memref<1x128xf32, #tpu.memory_space<any>>
      %c26_i32_229 = arith.constant 26 : i32
      %c0_i32_230 = arith.constant 0 : i32
      %576 = tpu.memref_slice %arg8[%335, %c26_i32_229, %c0_i32_230] : memref<2x32x128xf32, #tpu.memory_space<vmem>> -> memref<1x1x128xf32, #tpu.memory_space<vmem>>
      %577 = tpu.memref_squeeze %576 : memref<1x1x128xf32, #tpu.memory_space<vmem>> -> memref<1x128xf32, #tpu.memory_space<vmem>>
      %578 = tpu.memref_slice %arg9[%335] : memref<2x!tpu.dma_semaphore, #tpu.memory_space<semaphore_mem>> -> memref<1x!tpu.dma_semaphore, #tpu.memory_space<semaphore_mem>>
      %579 = tpu.memref_squeeze %578 : memref<1x!tpu.dma_semaphore, #tpu.memory_space<semaphore_mem>> -> memref<!tpu.dma_semaphore, #tpu.memory_space<semaphore_mem>>
      tpu.enqueue_dma source(%575 : memref<1x128xf32, #tpu.memory_space<any>>) target(%577 : memref<1x128xf32, #tpu.memory_space<vmem>>) target_semaphore(%579 : memref<!tpu.dma_semaphore, #tpu.memory_space<semaphore_mem>>)
      %c27_i32_231 = arith.constant 27 : i32
      %580 = arith.addi %336, %c27_i32_231 : i32
      %581 = arith.index_cast %arg0 : i32 to index
      %582 = arith.index_cast %580 : i32 to index
      %583 = memref.load %arg2[%581, %582] : memref<2x64xi32, #tpu.memory_space<smem>>
      %c0_i32_232 = arith.constant 0 : i32
      %584 = tpu.memref_slice %arg3[%583, %c0_i32_232] : memref<512x128xf32, #tpu.memory_space<any>> -> memref<1x128xf32, #tpu.memory_space<any>>
      %c27_i32_233 = arith.constant 27 : i32
      %c0_i32_234 = arith.constant 0 : i32
      %585 = tpu.memref_slice %arg8[%335, %c27_i32_233, %c0_i32_234] : memref<2x32x128xf32, #tpu.memory_space<vmem>> -> memref<1x1x128xf32, #tpu.memory_space<vmem>>
      %586 = tpu.memref_squeeze %585 : memref<1x1x128xf32, #tpu.memory_space<vmem>> -> memref<1x128xf32, #tpu.memory_space<vmem>>
      %587 = tpu.memref_slice %arg9[%335] : memref<2x!tpu.dma_semaphore, #tpu.memory_space<semaphore_mem>> -> memref<1x!tpu.dma_semaphore, #tpu.memory_space<semaphore_mem>>
      %588 = tpu.memref_squeeze %587 : memref<1x!tpu.dma_semaphore, #tpu.memory_space<semaphore_mem>> -> memref<!tpu.dma_semaphore, #tpu.memory_space<semaphore_mem>>
      tpu.enqueue_dma source(%584 : memref<1x128xf32, #tpu.memory_space<any>>) target(%586 : memref<1x128xf32, #tpu.memory_space<vmem>>) target_semaphore(%588 : memref<!tpu.dma_semaphore, #tpu.memory_space<semaphore_mem>>)
      %c28_i32_235 = arith.constant 28 : i32
      %589 = arith.addi %336, %c28_i32_235 : i32
      %590 = arith.index_cast %arg0 : i32 to index
      %591 = arith.index_cast %589 : i32 to index
      %592 = memref.load %arg2[%590, %591] : memref<2x64xi32, #tpu.memory_space<smem>>
      %c0_i32_236 = arith.constant 0 : i32
      %593 = tpu.memref_slice %arg3[%592, %c0_i32_236] : memref<512x128xf32, #tpu.memory_space<any>> -> memref<1x128xf32, #tpu.memory_space<any>>
      %c28_i32_237 = arith.constant 28 : i32
      %c0_i32_238 = arith.constant 0 : i32
      %594 = tpu.memref_slice %arg8[%335, %c28_i32_237, %c0_i32_238] : memref<2x32x128xf32, #tpu.memory_space<vmem>> -> memref<1x1x128xf32, #tpu.memory_space<vmem>>
      %595 = tpu.memref_squeeze %594 : memref<1x1x128xf32, #tpu.memory_space<vmem>> -> memref<1x128xf32, #tpu.memory_space<vmem>>
      %596 = tpu.memref_slice %arg9[%335] : memref<2x!tpu.dma_semaphore, #tpu.memory_space<semaphore_mem>> -> memref<1x!tpu.dma_semaphore, #tpu.memory_space<semaphore_mem>>
      %597 = tpu.memref_squeeze %596 : memref<1x!tpu.dma_semaphore, #tpu.memory_space<semaphore_mem>> -> memref<!tpu.dma_semaphore, #tpu.memory_space<semaphore_mem>>
      tpu.enqueue_dma source(%593 : memref<1x128xf32, #tpu.memory_space<any>>) target(%595 : memref<1x128xf32, #tpu.memory_space<vmem>>) target_semaphore(%597 : memref<!tpu.dma_semaphore, #tpu.memory_space<semaphore_mem>>)
      %c29_i32_239 = arith.constant 29 : i32
      %598 = arith.addi %336, %c29_i32_239 : i32
      %599 = arith.index_cast %arg0 : i32 to index
      %600 = arith.index_cast %598 : i32 to index
      %601 = memref.load %arg2[%599, %600] : memref<2x64xi32, #tpu.memory_space<smem>>
      %c0_i32_240 = arith.constant 0 : i32
      %602 = tpu.memref_slice %arg3[%601, %c0_i32_240] : memref<512x128xf32, #tpu.memory_space<any>> -> memref<1x128xf32, #tpu.memory_space<any>>
      %c29_i32_241 = arith.constant 29 : i32
      %c0_i32_242 = arith.constant 0 : i32
      %603 = tpu.memref_slice %arg8[%335, %c29_i32_241, %c0_i32_242] : memref<2x32x128xf32, #tpu.memory_space<vmem>> -> memref<1x1x128xf32, #tpu.memory_space<vmem>>
      %604 = tpu.memref_squeeze %603 : memref<1x1x128xf32, #tpu.memory_space<vmem>> -> memref<1x128xf32, #tpu.memory_space<vmem>>
      %605 = tpu.memref_slice %arg9[%335] : memref<2x!tpu.dma_semaphore, #tpu.memory_space<semaphore_mem>> -> memref<1x!tpu.dma_semaphore, #tpu.memory_space<semaphore_mem>>
      %606 = tpu.memref_squeeze %605 : memref<1x!tpu.dma_semaphore, #tpu.memory_space<semaphore_mem>> -> memref<!tpu.dma_semaphore, #tpu.memory_space<semaphore_mem>>
      tpu.enqueue_dma source(%602 : memref<1x128xf32, #tpu.memory_space<any>>) target(%604 : memref<1x128xf32, #tpu.memory_space<vmem>>) target_semaphore(%606 : memref<!tpu.dma_semaphore, #tpu.memory_space<semaphore_mem>>)
      %c30_i32_243 = arith.constant 30 : i32
      %607 = arith.addi %336, %c30_i32_243 : i32
      %608 = arith.index_cast %arg0 : i32 to index
      %609 = arith.index_cast %607 : i32 to index
      %610 = memref.load %arg2[%608, %609] : memref<2x64xi32, #tpu.memory_space<smem>>
      %c0_i32_244 = arith.constant 0 : i32
      %611 = tpu.memref_slice %arg3[%610, %c0_i32_244] : memref<512x128xf32, #tpu.memory_space<any>> -> memref<1x128xf32, #tpu.memory_space<any>>
      %c30_i32_245 = arith.constant 30 : i32
      %c0_i32_246 = arith.constant 0 : i32
      %612 = tpu.memref_slice %arg8[%335, %c30_i32_245, %c0_i32_246] : memref<2x32x128xf32, #tpu.memory_space<vmem>> -> memref<1x1x128xf32, #tpu.memory_space<vmem>>
      %613 = tpu.memref_squeeze %612 : memref<1x1x128xf32, #tpu.memory_space<vmem>> -> memref<1x128xf32, #tpu.memory_space<vmem>>
      %614 = tpu.memref_slice %arg9[%335] : memref<2x!tpu.dma_semaphore, #tpu.memory_space<semaphore_mem>> -> memref<1x!tpu.dma_semaphore, #tpu.memory_space<semaphore_mem>>
      %615 = tpu.memref_squeeze %614 : memref<1x!tpu.dma_semaphore, #tpu.memory_space<semaphore_mem>> -> memref<!tpu.dma_semaphore, #tpu.memory_space<semaphore_mem>>
      tpu.enqueue_dma source(%611 : memref<1x128xf32, #tpu.memory_space<any>>) target(%613 : memref<1x128xf32, #tpu.memory_space<vmem>>) target_semaphore(%615 : memref<!tpu.dma_semaphore, #tpu.memory_space<semaphore_mem>>)
      %c31_i32_247 = arith.constant 31 : i32
      %616 = arith.addi %336, %c31_i32_247 : i32
      %617 = arith.index_cast %arg0 : i32 to index
      %618 = arith.index_cast %616 : i32 to index
      %619 = memref.load %arg2[%617, %618] : memref<2x64xi32, #tpu.memory_space<smem>>
      %c0_i32_248 = arith.constant 0 : i32
      %620 = tpu.memref_slice %arg3[%619, %c0_i32_248] : memref<512x128xf32, #tpu.memory_space<any>> -> memref<1x128xf32, #tpu.memory_space<any>>
      %c31_i32_249 = arith.constant 31 : i32
      %c0_i32_250 = arith.constant 0 : i32
      %621 = tpu.memref_slice %arg8[%335, %c31_i32_249, %c0_i32_250] : memref<2x32x128xf32, #tpu.memory_space<vmem>> -> memref<1x1x128xf32, #tpu.memory_space<vmem>>
      %622 = tpu.memref_squeeze %621 : memref<1x1x128xf32, #tpu.memory_space<vmem>> -> memref<1x128xf32, #tpu.memory_space<vmem>>
      %623 = tpu.memref_slice %arg9[%335] : memref<2x!tpu.dma_semaphore, #tpu.memory_space<semaphore_mem>> -> memref<1x!tpu.dma_semaphore, #tpu.memory_space<semaphore_mem>>
      %624 = tpu.memref_squeeze %623 : memref<1x!tpu.dma_semaphore, #tpu.memory_space<semaphore_mem>> -> memref<!tpu.dma_semaphore, #tpu.memory_space<semaphore_mem>>
      tpu.enqueue_dma source(%620 : memref<1x128xf32, #tpu.memory_space<any>>) target(%622 : memref<1x128xf32, #tpu.memory_space<vmem>>) target_semaphore(%624 : memref<!tpu.dma_semaphore, #tpu.memory_space<semaphore_mem>>)
    } else {
    }
    %c32_i32 = arith.constant 32 : i32
    %17 = arith.muli %arg1, %c32_i32 : i32
    %c0_i32_8 = arith.constant 0 : i32
    %18 = arith.addi %17, %c0_i32_8 : i32
    %19 = arith.index_cast %arg0 : i32 to index
    %20 = arith.index_cast %18 : i32 to index
    %21 = memref.load %arg2[%19, %20] : memref<2x64xi32, #tpu.memory_space<smem>>
    %c0_i32_9 = arith.constant 0 : i32
    %22 = tpu.memref_slice %arg3[%21, %c0_i32_9] : memref<512x128xf32, #tpu.memory_space<any>> -> memref<1x128xf32, #tpu.memory_space<any>>
    %c0_i32_10 = arith.constant 0 : i32
    %c0_i32_11 = arith.constant 0 : i32
    %23 = tpu.memref_slice %arg8[%9, %c0_i32_10, %c0_i32_11] : memref<2x32x128xf32, #tpu.memory_space<vmem>> -> memref<1x1x128xf32, #tpu.memory_space<vmem>>
    %24 = tpu.memref_squeeze %23 : memref<1x1x128xf32, #tpu.memory_space<vmem>> -> memref<1x128xf32, #tpu.memory_space<vmem>>
    %25 = tpu.memref_slice %arg9[%9] : memref<2x!tpu.dma_semaphore, #tpu.memory_space<semaphore_mem>> -> memref<1x!tpu.dma_semaphore, #tpu.memory_space<semaphore_mem>>
    %26 = tpu.memref_squeeze %25 : memref<1x!tpu.dma_semaphore, #tpu.memory_space<semaphore_mem>> -> memref<!tpu.dma_semaphore, #tpu.memory_space<semaphore_mem>>
    tpu.wait_dma2 semaphore(%26 : memref<!tpu.dma_semaphore, #tpu.memory_space<semaphore_mem>>) src(%22 : memref<1x128xf32, #tpu.memory_space<any>>) dst(%24 : memref<1x128xf32, #tpu.memory_space<vmem>>)
    %c1_i32_12 = arith.constant 1 : i32
    %27 = arith.addi %17, %c1_i32_12 : i32
    %28 = arith.index_cast %arg0 : i32 to index
    %29 = arith.index_cast %27 : i32 to index
    %30 = memref.load %arg2[%28, %29] : memref<2x64xi32, #tpu.memory_space<smem>>
    %c0_i32_13 = arith.constant 0 : i32
    %31 = tpu.memref_slice %arg3[%30, %c0_i32_13] : memref<512x128xf32, #tpu.memory_space<any>> -> memref<1x128xf32, #tpu.memory_space<any>>
    %c1_i32_14 = arith.constant 1 : i32
    %c0_i32_15 = arith.constant 0 : i32
    %32 = tpu.memref_slice %arg8[%9, %c1_i32_14, %c0_i32_15] : memref<2x32x128xf32, #tpu.memory_space<vmem>> -> memref<1x1x128xf32, #tpu.memory_space<vmem>>
    %33 = tpu.memref_squeeze %32 : memref<1x1x128xf32, #tpu.memory_space<vmem>> -> memref<1x128xf32, #tpu.memory_space<vmem>>
    %34 = tpu.memref_slice %arg9[%9] : memref<2x!tpu.dma_semaphore, #tpu.memory_space<semaphore_mem>> -> memref<1x!tpu.dma_semaphore, #tpu.memory_space<semaphore_mem>>
    %35 = tpu.memref_squeeze %34 : memref<1x!tpu.dma_semaphore, #tpu.memory_space<semaphore_mem>> -> memref<!tpu.dma_semaphore, #tpu.memory_space<semaphore_mem>>
    tpu.wait_dma2 semaphore(%35 : memref<!tpu.dma_semaphore, #tpu.memory_space<semaphore_mem>>) src(%31 : memref<1x128xf32, #tpu.memory_space<any>>) dst(%33 : memref<1x128xf32, #tpu.memory_space<vmem>>)
    %c2_i32_16 = arith.constant 2 : i32
    %36 = arith.addi %17, %c2_i32_16 : i32
    %37 = arith.index_cast %arg0 : i32 to index
    %38 = arith.index_cast %36 : i32 to index
    %39 = memref.load %arg2[%37, %38] : memref<2x64xi32, #tpu.memory_space<smem>>
    %c0_i32_17 = arith.constant 0 : i32
    %40 = tpu.memref_slice %arg3[%39, %c0_i32_17] : memref<512x128xf32, #tpu.memory_space<any>> -> memref<1x128xf32, #tpu.memory_space<any>>
    %c2_i32_18 = arith.constant 2 : i32
    %c0_i32_19 = arith.constant 0 : i32
    %41 = tpu.memref_slice %arg8[%9, %c2_i32_18, %c0_i32_19] : memref<2x32x128xf32, #tpu.memory_space<vmem>> -> memref<1x1x128xf32, #tpu.memory_space<vmem>>
    %42 = tpu.memref_squeeze %41 : memref<1x1x128xf32, #tpu.memory_space<vmem>> -> memref<1x128xf32, #tpu.memory_space<vmem>>
    %43 = tpu.memref_slice %arg9[%9] : memref<2x!tpu.dma_semaphore, #tpu.memory_space<semaphore_mem>> -> memref<1x!tpu.dma_semaphore, #tpu.memory_space<semaphore_mem>>
    %44 = tpu.memref_squeeze %43 : memref<1x!tpu.dma_semaphore, #tpu.memory_space<semaphore_mem>> -> memref<!tpu.dma_semaphore, #tpu.memory_space<semaphore_mem>>
    tpu.wait_dma2 semaphore(%44 : memref<!tpu.dma_semaphore, #tpu.memory_space<semaphore_mem>>) src(%40 : memref<1x128xf32, #tpu.memory_space<any>>) dst(%42 : memref<1x128xf32, #tpu.memory_space<vmem>>)
    %c3_i32 = arith.constant 3 : i32
    %45 = arith.addi %17, %c3_i32 : i32
    %46 = arith.index_cast %arg0 : i32 to index
    %47 = arith.index_cast %45 : i32 to index
    %48 = memref.load %arg2[%46, %47] : memref<2x64xi32, #tpu.memory_space<smem>>
    %c0_i32_20 = arith.constant 0 : i32
    %49 = tpu.memref_slice %arg3[%48, %c0_i32_20] : memref<512x128xf32, #tpu.memory_space<any>> -> memref<1x128xf32, #tpu.memory_space<any>>
    %c3_i32_21 = arith.constant 3 : i32
    %c0_i32_22 = arith.constant 0 : i32
    %50 = tpu.memref_slice %arg8[%9, %c3_i32_21, %c0_i32_22] : memref<2x32x128xf32, #tpu.memory_space<vmem>> -> memref<1x1x128xf32, #tpu.memory_space<vmem>>
    %51 = tpu.memref_squeeze %50 : memref<1x1x128xf32, #tpu.memory_space<vmem>> -> memref<1x128xf32, #tpu.memory_space<vmem>>
    %52 = tpu.memref_slice %arg9[%9] : memref<2x!tpu.dma_semaphore, #tpu.memory_space<semaphore_mem>> -> memref<1x!tpu.dma_semaphore, #tpu.memory_space<semaphore_mem>>
    %53 = tpu.memref_squeeze %52 : memref<1x!tpu.dma_semaphore, #tpu.memory_space<semaphore_mem>> -> memref<!tpu.dma_semaphore, #tpu.memory_space<semaphore_mem>>
    tpu.wait_dma2 semaphore(%53 : memref<!tpu.dma_semaphore, #tpu.memory_space<semaphore_mem>>) src(%49 : memref<1x128xf32, #tpu.memory_space<any>>) dst(%51 : memref<1x128xf32, #tpu.memory_space<vmem>>)
    %c4_i32 = arith.constant 4 : i32
    %54 = arith.addi %17, %c4_i32 : i32
    %55 = arith.index_cast %arg0 : i32 to index
    %56 = arith.index_cast %54 : i32 to index
    %57 = memref.load %arg2[%55, %56] : memref<2x64xi32, #tpu.memory_space<smem>>
    %c0_i32_23 = arith.constant 0 : i32
    %58 = tpu.memref_slice %arg3[%57, %c0_i32_23] : memref<512x128xf32, #tpu.memory_space<any>> -> memref<1x128xf32, #tpu.memory_space<any>>
    %c4_i32_24 = arith.constant 4 : i32
    %c0_i32_25 = arith.constant 0 : i32
    %59 = tpu.memref_slice %arg8[%9, %c4_i32_24, %c0_i32_25] : memref<2x32x128xf32, #tpu.memory_space<vmem>> -> memref<1x1x128xf32, #tpu.memory_space<vmem>>
    %60 = tpu.memref_squeeze %59 : memref<1x1x128xf32, #tpu.memory_space<vmem>> -> memref<1x128xf32, #tpu.memory_space<vmem>>
    %61 = tpu.memref_slice %arg9[%9] : memref<2x!tpu.dma_semaphore, #tpu.memory_space<semaphore_mem>> -> memref<1x!tpu.dma_semaphore, #tpu.memory_space<semaphore_mem>>
    %62 = tpu.memref_squeeze %61 : memref<1x!tpu.dma_semaphore, #tpu.memory_space<semaphore_mem>> -> memref<!tpu.dma_semaphore, #tpu.memory_space<semaphore_mem>>
    tpu.wait_dma2 semaphore(%62 : memref<!tpu.dma_semaphore, #tpu.memory_space<semaphore_mem>>) src(%58 : memref<1x128xf32, #tpu.memory_space<any>>) dst(%60 : memref<1x128xf32, #tpu.memory_space<vmem>>)
    %c5_i32 = arith.constant 5 : i32
    %63 = arith.addi %17, %c5_i32 : i32
    %64 = arith.index_cast %arg0 : i32 to index
    %65 = arith.index_cast %63 : i32 to index
    %66 = memref.load %arg2[%64, %65] : memref<2x64xi32, #tpu.memory_space<smem>>
    %c0_i32_26 = arith.constant 0 : i32
    %67 = tpu.memref_slice %arg3[%66, %c0_i32_26] : memref<512x128xf32, #tpu.memory_space<any>> -> memref<1x128xf32, #tpu.memory_space<any>>
    %c5_i32_27 = arith.constant 5 : i32
    %c0_i32_28 = arith.constant 0 : i32
    %68 = tpu.memref_slice %arg8[%9, %c5_i32_27, %c0_i32_28] : memref<2x32x128xf32, #tpu.memory_space<vmem>> -> memref<1x1x128xf32, #tpu.memory_space<vmem>>
    %69 = tpu.memref_squeeze %68 : memref<1x1x128xf32, #tpu.memory_space<vmem>> -> memref<1x128xf32, #tpu.memory_space<vmem>>
    %70 = tpu.memref_slice %arg9[%9] : memref<2x!tpu.dma_semaphore, #tpu.memory_space<semaphore_mem>> -> memref<1x!tpu.dma_semaphore, #tpu.memory_space<semaphore_mem>>
    %71 = tpu.memref_squeeze %70 : memref<1x!tpu.dma_semaphore, #tpu.memory_space<semaphore_mem>> -> memref<!tpu.dma_semaphore, #tpu.memory_space<semaphore_mem>>
    tpu.wait_dma2 semaphore(%71 : memref<!tpu.dma_semaphore, #tpu.memory_space<semaphore_mem>>) src(%67 : memref<1x128xf32, #tpu.memory_space<any>>) dst(%69 : memref<1x128xf32, #tpu.memory_space<vmem>>)
    %c6_i32 = arith.constant 6 : i32
    %72 = arith.addi %17, %c6_i32 : i32
    %73 = arith.index_cast %arg0 : i32 to index
    %74 = arith.index_cast %72 : i32 to index
    %75 = memref.load %arg2[%73, %74] : memref<2x64xi32, #tpu.memory_space<smem>>
    %c0_i32_29 = arith.constant 0 : i32
    %76 = tpu.memref_slice %arg3[%75, %c0_i32_29] : memref<512x128xf32, #tpu.memory_space<any>> -> memref<1x128xf32, #tpu.memory_space<any>>
    %c6_i32_30 = arith.constant 6 : i32
    %c0_i32_31 = arith.constant 0 : i32
    %77 = tpu.memref_slice %arg8[%9, %c6_i32_30, %c0_i32_31] : memref<2x32x128xf32, #tpu.memory_space<vmem>> -> memref<1x1x128xf32, #tpu.memory_space<vmem>>
    %78 = tpu.memref_squeeze %77 : memref<1x1x128xf32, #tpu.memory_space<vmem>> -> memref<1x128xf32, #tpu.memory_space<vmem>>
    %79 = tpu.memref_slice %arg9[%9] : memref<2x!tpu.dma_semaphore, #tpu.memory_space<semaphore_mem>> -> memref<1x!tpu.dma_semaphore, #tpu.memory_space<semaphore_mem>>
    %80 = tpu.memref_squeeze %79 : memref<1x!tpu.dma_semaphore, #tpu.memory_space<semaphore_mem>> -> memref<!tpu.dma_semaphore, #tpu.memory_space<semaphore_mem>>
    tpu.wait_dma2 semaphore(%80 : memref<!tpu.dma_semaphore, #tpu.memory_space<semaphore_mem>>) src(%76 : memref<1x128xf32, #tpu.memory_space<any>>) dst(%78 : memref<1x128xf32, #tpu.memory_space<vmem>>)
    %c7_i32 = arith.constant 7 : i32
    %81 = arith.addi %17, %c7_i32 : i32
    %82 = arith.index_cast %arg0 : i32 to index
    %83 = arith.index_cast %81 : i32 to index
    %84 = memref.load %arg2[%82, %83] : memref<2x64xi32, #tpu.memory_space<smem>>
    %c0_i32_32 = arith.constant 0 : i32
    %85 = tpu.memref_slice %arg3[%84, %c0_i32_32] : memref<512x128xf32, #tpu.memory_space<any>> -> memref<1x128xf32, #tpu.memory_space<any>>
    %c7_i32_33 = arith.constant 7 : i32
    %c0_i32_34 = arith.constant 0 : i32
    %86 = tpu.memref_slice %arg8[%9, %c7_i32_33, %c0_i32_34] : memref<2x32x128xf32, #tpu.memory_space<vmem>> -> memref<1x1x128xf32, #tpu.memory_space<vmem>>
    %87 = tpu.memref_squeeze %86 : memref<1x1x128xf32, #tpu.memory_space<vmem>> -> memref<1x128xf32, #tpu.memory_space<vmem>>
    %88 = tpu.memref_slice %arg9[%9] : memref<2x!tpu.dma_semaphore, #tpu.memory_space<semaphore_mem>> -> memref<1x!tpu.dma_semaphore, #tpu.memory_space<semaphore_mem>>
    %89 = tpu.memref_squeeze %88 : memref<1x!tpu.dma_semaphore, #tpu.memory_space<semaphore_mem>> -> memref<!tpu.dma_semaphore, #tpu.memory_space<semaphore_mem>>
    tpu.wait_dma2 semaphore(%89 : memref<!tpu.dma_semaphore, #tpu.memory_space<semaphore_mem>>) src(%85 : memref<1x128xf32, #tpu.memory_space<any>>) dst(%87 : memref<1x128xf32, #tpu.memory_space<vmem>>)
    %c8_i32 = arith.constant 8 : i32
    %90 = arith.addi %17, %c8_i32 : i32
    %91 = arith.index_cast %arg0 : i32 to index
    %92 = arith.index_cast %90 : i32 to index
    %93 = memref.load %arg2[%91, %92] : memref<2x64xi32, #tpu.memory_space<smem>>
    %c0_i32_35 = arith.constant 0 : i32
    %94 = tpu.memref_slice %arg3[%93, %c0_i32_35] : memref<512x128xf32, #tpu.memory_space<any>> -> memref<1x128xf32, #tpu.memory_space<any>>
    %c8_i32_36 = arith.constant 8 : i32
    %c0_i32_37 = arith.constant 0 : i32
    %95 = tpu.memref_slice %arg8[%9, %c8_i32_36, %c0_i32_37] : memref<2x32x128xf32, #tpu.memory_space<vmem>> -> memref<1x1x128xf32, #tpu.memory_space<vmem>>
    %96 = tpu.memref_squeeze %95 : memref<1x1x128xf32, #tpu.memory_space<vmem>> -> memref<1x128xf32, #tpu.memory_space<vmem>>
    %97 = tpu.memref_slice %arg9[%9] : memref<2x!tpu.dma_semaphore, #tpu.memory_space<semaphore_mem>> -> memref<1x!tpu.dma_semaphore, #tpu.memory_space<semaphore_mem>>
    %98 = tpu.memref_squeeze %97 : memref<1x!tpu.dma_semaphore, #tpu.memory_space<semaphore_mem>> -> memref<!tpu.dma_semaphore, #tpu.memory_space<semaphore_mem>>
    tpu.wait_dma2 semaphore(%98 : memref<!tpu.dma_semaphore, #tpu.memory_space<semaphore_mem>>) src(%94 : memref<1x128xf32, #tpu.memory_space<any>>) dst(%96 : memref<1x128xf32, #tpu.memory_space<vmem>>)
    %c9_i32 = arith.constant 9 : i32
    %99 = arith.addi %17, %c9_i32 : i32
    %100 = arith.index_cast %arg0 : i32 to index
    %101 = arith.index_cast %99 : i32 to index
    %102 = memref.load %arg2[%100, %101] : memref<2x64xi32, #tpu.memory_space<smem>>
    %c0_i32_38 = arith.constant 0 : i32
    %103 = tpu.memref_slice %arg3[%102, %c0_i32_38] : memref<512x128xf32, #tpu.memory_space<any>> -> memref<1x128xf32, #tpu.memory_space<any>>
    %c9_i32_39 = arith.constant 9 : i32
    %c0_i32_40 = arith.constant 0 : i32
    %104 = tpu.memref_slice %arg8[%9, %c9_i32_39, %c0_i32_40] : memref<2x32x128xf32, #tpu.memory_space<vmem>> -> memref<1x1x128xf32, #tpu.memory_space<vmem>>
    %105 = tpu.memref_squeeze %104 : memref<1x1x128xf32, #tpu.memory_space<vmem>> -> memref<1x128xf32, #tpu.memory_space<vmem>>
    %106 = tpu.memref_slice %arg9[%9] : memref<2x!tpu.dma_semaphore, #tpu.memory_space<semaphore_mem>> -> memref<1x!tpu.dma_semaphore, #tpu.memory_space<semaphore_mem>>
    %107 = tpu.memref_squeeze %106 : memref<1x!tpu.dma_semaphore, #tpu.memory_space<semaphore_mem>> -> memref<!tpu.dma_semaphore, #tpu.memory_space<semaphore_mem>>
    tpu.wait_dma2 semaphore(%107 : memref<!tpu.dma_semaphore, #tpu.memory_space<semaphore_mem>>) src(%103 : memref<1x128xf32, #tpu.memory_space<any>>) dst(%105 : memref<1x128xf32, #tpu.memory_space<vmem>>)
    %c10_i32 = arith.constant 10 : i32
    %108 = arith.addi %17, %c10_i32 : i32
    %109 = arith.index_cast %arg0 : i32 to index
    %110 = arith.index_cast %108 : i32 to index
    %111 = memref.load %arg2[%109, %110] : memref<2x64xi32, #tpu.memory_space<smem>>
    %c0_i32_41 = arith.constant 0 : i32
    %112 = tpu.memref_slice %arg3[%111, %c0_i32_41] : memref<512x128xf32, #tpu.memory_space<any>> -> memref<1x128xf32, #tpu.memory_space<any>>
    %c10_i32_42 = arith.constant 10 : i32
    %c0_i32_43 = arith.constant 0 : i32
    %113 = tpu.memref_slice %arg8[%9, %c10_i32_42, %c0_i32_43] : memref<2x32x128xf32, #tpu.memory_space<vmem>> -> memref<1x1x128xf32, #tpu.memory_space<vmem>>
    %114 = tpu.memref_squeeze %113 : memref<1x1x128xf32, #tpu.memory_space<vmem>> -> memref<1x128xf32, #tpu.memory_space<vmem>>
    %115 = tpu.memref_slice %arg9[%9] : memref<2x!tpu.dma_semaphore, #tpu.memory_space<semaphore_mem>> -> memref<1x!tpu.dma_semaphore, #tpu.memory_space<semaphore_mem>>
    %116 = tpu.memref_squeeze %115 : memref<1x!tpu.dma_semaphore, #tpu.memory_space<semaphore_mem>> -> memref<!tpu.dma_semaphore, #tpu.memory_space<semaphore_mem>>
    tpu.wait_dma2 semaphore(%116 : memref<!tpu.dma_semaphore, #tpu.memory_space<semaphore_mem>>) src(%112 : memref<1x128xf32, #tpu.memory_space<any>>) dst(%114 : memref<1x128xf32, #tpu.memory_space<vmem>>)
    %c11_i32 = arith.constant 11 : i32
    %117 = arith.addi %17, %c11_i32 : i32
    %118 = arith.index_cast %arg0 : i32 to index
    %119 = arith.index_cast %117 : i32 to index
    %120 = memref.load %arg2[%118, %119] : memref<2x64xi32, #tpu.memory_space<smem>>
    %c0_i32_44 = arith.constant 0 : i32
    %121 = tpu.memref_slice %arg3[%120, %c0_i32_44] : memref<512x128xf32, #tpu.memory_space<any>> -> memref<1x128xf32, #tpu.memory_space<any>>
    %c11_i32_45 = arith.constant 11 : i32
    %c0_i32_46 = arith.constant 0 : i32
    %122 = tpu.memref_slice %arg8[%9, %c11_i32_45, %c0_i32_46] : memref<2x32x128xf32, #tpu.memory_space<vmem>> -> memref<1x1x128xf32, #tpu.memory_space<vmem>>
    %123 = tpu.memref_squeeze %122 : memref<1x1x128xf32, #tpu.memory_space<vmem>> -> memref<1x128xf32, #tpu.memory_space<vmem>>
    %124 = tpu.memref_slice %arg9[%9] : memref<2x!tpu.dma_semaphore, #tpu.memory_space<semaphore_mem>> -> memref<1x!tpu.dma_semaphore, #tpu.memory_space<semaphore_mem>>
    %125 = tpu.memref_squeeze %124 : memref<1x!tpu.dma_semaphore, #tpu.memory_space<semaphore_mem>> -> memref<!tpu.dma_semaphore, #tpu.memory_space<semaphore_mem>>
    tpu.wait_dma2 semaphore(%125 : memref<!tpu.dma_semaphore, #tpu.memory_space<semaphore_mem>>) src(%121 : memref<1x128xf32, #tpu.memory_space<any>>) dst(%123 : memref<1x128xf32, #tpu.memory_space<vmem>>)
    %c12_i32 = arith.constant 12 : i32
    %126 = arith.addi %17, %c12_i32 : i32
    %127 = arith.index_cast %arg0 : i32 to index
    %128 = arith.index_cast %126 : i32 to index
    %129 = memref.load %arg2[%127, %128] : memref<2x64xi32, #tpu.memory_space<smem>>
    %c0_i32_47 = arith.constant 0 : i32
    %130 = tpu.memref_slice %arg3[%129, %c0_i32_47] : memref<512x128xf32, #tpu.memory_space<any>> -> memref<1x128xf32, #tpu.memory_space<any>>
    %c12_i32_48 = arith.constant 12 : i32
    %c0_i32_49 = arith.constant 0 : i32
    %131 = tpu.memref_slice %arg8[%9, %c12_i32_48, %c0_i32_49] : memref<2x32x128xf32, #tpu.memory_space<vmem>> -> memref<1x1x128xf32, #tpu.memory_space<vmem>>
    %132 = tpu.memref_squeeze %131 : memref<1x1x128xf32, #tpu.memory_space<vmem>> -> memref<1x128xf32, #tpu.memory_space<vmem>>
    %133 = tpu.memref_slice %arg9[%9] : memref<2x!tpu.dma_semaphore, #tpu.memory_space<semaphore_mem>> -> memref<1x!tpu.dma_semaphore, #tpu.memory_space<semaphore_mem>>
    %134 = tpu.memref_squeeze %133 : memref<1x!tpu.dma_semaphore, #tpu.memory_space<semaphore_mem>> -> memref<!tpu.dma_semaphore, #tpu.memory_space<semaphore_mem>>
    tpu.wait_dma2 semaphore(%134 : memref<!tpu.dma_semaphore, #tpu.memory_space<semaphore_mem>>) src(%130 : memref<1x128xf32, #tpu.memory_space<any>>) dst(%132 : memref<1x128xf32, #tpu.memory_space<vmem>>)
    %c13_i32 = arith.constant 13 : i32
    %135 = arith.addi %17, %c13_i32 : i32
    %136 = arith.index_cast %arg0 : i32 to index
    %137 = arith.index_cast %135 : i32 to index
    %138 = memref.load %arg2[%136, %137] : memref<2x64xi32, #tpu.memory_space<smem>>
    %c0_i32_50 = arith.constant 0 : i32
    %139 = tpu.memref_slice %arg3[%138, %c0_i32_50] : memref<512x128xf32, #tpu.memory_space<any>> -> memref<1x128xf32, #tpu.memory_space<any>>
    %c13_i32_51 = arith.constant 13 : i32
    %c0_i32_52 = arith.constant 0 : i32
    %140 = tpu.memref_slice %arg8[%9, %c13_i32_51, %c0_i32_52] : memref<2x32x128xf32, #tpu.memory_space<vmem>> -> memref<1x1x128xf32, #tpu.memory_space<vmem>>
    %141 = tpu.memref_squeeze %140 : memref<1x1x128xf32, #tpu.memory_space<vmem>> -> memref<1x128xf32, #tpu.memory_space<vmem>>
    %142 = tpu.memref_slice %arg9[%9] : memref<2x!tpu.dma_semaphore, #tpu.memory_space<semaphore_mem>> -> memref<1x!tpu.dma_semaphore, #tpu.memory_space<semaphore_mem>>
    %143 = tpu.memref_squeeze %142 : memref<1x!tpu.dma_semaphore, #tpu.memory_space<semaphore_mem>> -> memref<!tpu.dma_semaphore, #tpu.memory_space<semaphore_mem>>
    tpu.wait_dma2 semaphore(%143 : memref<!tpu.dma_semaphore, #tpu.memory_space<semaphore_mem>>) src(%139 : memref<1x128xf32, #tpu.memory_space<any>>) dst(%141 : memref<1x128xf32, #tpu.memory_space<vmem>>)
    %c14_i32 = arith.constant 14 : i32
    %144 = arith.addi %17, %c14_i32 : i32
    %145 = arith.index_cast %arg0 : i32 to index
    %146 = arith.index_cast %144 : i32 to index
    %147 = memref.load %arg2[%145, %146] : memref<2x64xi32, #tpu.memory_space<smem>>
    %c0_i32_53 = arith.constant 0 : i32
    %148 = tpu.memref_slice %arg3[%147, %c0_i32_53] : memref<512x128xf32, #tpu.memory_space<any>> -> memref<1x128xf32, #tpu.memory_space<any>>
    %c14_i32_54 = arith.constant 14 : i32
    %c0_i32_55 = arith.constant 0 : i32
    %149 = tpu.memref_slice %arg8[%9, %c14_i32_54, %c0_i32_55] : memref<2x32x128xf32, #tpu.memory_space<vmem>> -> memref<1x1x128xf32, #tpu.memory_space<vmem>>
    %150 = tpu.memref_squeeze %149 : memref<1x1x128xf32, #tpu.memory_space<vmem>> -> memref<1x128xf32, #tpu.memory_space<vmem>>
    %151 = tpu.memref_slice %arg9[%9] : memref<2x!tpu.dma_semaphore, #tpu.memory_space<semaphore_mem>> -> memref<1x!tpu.dma_semaphore, #tpu.memory_space<semaphore_mem>>
    %152 = tpu.memref_squeeze %151 : memref<1x!tpu.dma_semaphore, #tpu.memory_space<semaphore_mem>> -> memref<!tpu.dma_semaphore, #tpu.memory_space<semaphore_mem>>
    tpu.wait_dma2 semaphore(%152 : memref<!tpu.dma_semaphore, #tpu.memory_space<semaphore_mem>>) src(%148 : memref<1x128xf32, #tpu.memory_space<any>>) dst(%150 : memref<1x128xf32, #tpu.memory_space<vmem>>)
    %c15_i32 = arith.constant 15 : i32
    %153 = arith.addi %17, %c15_i32 : i32
    %154 = arith.index_cast %arg0 : i32 to index
    %155 = arith.index_cast %153 : i32 to index
    %156 = memref.load %arg2[%154, %155] : memref<2x64xi32, #tpu.memory_space<smem>>
    %c0_i32_56 = arith.constant 0 : i32
    %157 = tpu.memref_slice %arg3[%156, %c0_i32_56] : memref<512x128xf32, #tpu.memory_space<any>> -> memref<1x128xf32, #tpu.memory_space<any>>
    %c15_i32_57 = arith.constant 15 : i32
    %c0_i32_58 = arith.constant 0 : i32
    %158 = tpu.memref_slice %arg8[%9, %c15_i32_57, %c0_i32_58] : memref<2x32x128xf32, #tpu.memory_space<vmem>> -> memref<1x1x128xf32, #tpu.memory_space<vmem>>
    %159 = tpu.memref_squeeze %158 : memref<1x1x128xf32, #tpu.memory_space<vmem>> -> memref<1x128xf32, #tpu.memory_space<vmem>>
    %160 = tpu.memref_slice %arg9[%9] : memref<2x!tpu.dma_semaphore, #tpu.memory_space<semaphore_mem>> -> memref<1x!tpu.dma_semaphore, #tpu.memory_space<semaphore_mem>>
    %161 = tpu.memref_squeeze %160 : memref<1x!tpu.dma_semaphore, #tpu.memory_space<semaphore_mem>> -> memref<!tpu.dma_semaphore, #tpu.memory_space<semaphore_mem>>
    tpu.wait_dma2 semaphore(%161 : memref<!tpu.dma_semaphore, #tpu.memory_space<semaphore_mem>>) src(%157 : memref<1x128xf32, #tpu.memory_space<any>>) dst(%159 : memref<1x128xf32, #tpu.memory_space<vmem>>)
    %c16_i32 = arith.constant 16 : i32
    %162 = arith.addi %17, %c16_i32 : i32
    %163 = arith.index_cast %arg0 : i32 to index
    %164 = arith.index_cast %162 : i32 to index
    %165 = memref.load %arg2[%163, %164] : memref<2x64xi32, #tpu.memory_space<smem>>
    %c0_i32_59 = arith.constant 0 : i32
    %166 = tpu.memref_slice %arg3[%165, %c0_i32_59] : memref<512x128xf32, #tpu.memory_space<any>> -> memref<1x128xf32, #tpu.memory_space<any>>
    %c16_i32_60 = arith.constant 16 : i32
    %c0_i32_61 = arith.constant 0 : i32
    %167 = tpu.memref_slice %arg8[%9, %c16_i32_60, %c0_i32_61] : memref<2x32x128xf32, #tpu.memory_space<vmem>> -> memref<1x1x128xf32, #tpu.memory_space<vmem>>
    %168 = tpu.memref_squeeze %167 : memref<1x1x128xf32, #tpu.memory_space<vmem>> -> memref<1x128xf32, #tpu.memory_space<vmem>>
    %169 = tpu.memref_slice %arg9[%9] : memref<2x!tpu.dma_semaphore, #tpu.memory_space<semaphore_mem>> -> memref<1x!tpu.dma_semaphore, #tpu.memory_space<semaphore_mem>>
    %170 = tpu.memref_squeeze %169 : memref<1x!tpu.dma_semaphore, #tpu.memory_space<semaphore_mem>> -> memref<!tpu.dma_semaphore, #tpu.memory_space<semaphore_mem>>
    tpu.wait_dma2 semaphore(%170 : memref<!tpu.dma_semaphore, #tpu.memory_space<semaphore_mem>>) src(%166 : memref<1x128xf32, #tpu.memory_space<any>>) dst(%168 : memref<1x128xf32, #tpu.memory_space<vmem>>)
    %c17_i32 = arith.constant 17 : i32
    %171 = arith.addi %17, %c17_i32 : i32
    %172 = arith.index_cast %arg0 : i32 to index
    %173 = arith.index_cast %171 : i32 to index
    %174 = memref.load %arg2[%172, %173] : memref<2x64xi32, #tpu.memory_space<smem>>
    %c0_i32_62 = arith.constant 0 : i32
    %175 = tpu.memref_slice %arg3[%174, %c0_i32_62] : memref<512x128xf32, #tpu.memory_space<any>> -> memref<1x128xf32, #tpu.memory_space<any>>
    %c17_i32_63 = arith.constant 17 : i32
    %c0_i32_64 = arith.constant 0 : i32
    %176 = tpu.memref_slice %arg8[%9, %c17_i32_63, %c0_i32_64] : memref<2x32x128xf32, #tpu.memory_space<vmem>> -> memref<1x1x128xf32, #tpu.memory_space<vmem>>
    %177 = tpu.memref_squeeze %176 : memref<1x1x128xf32, #tpu.memory_space<vmem>> -> memref<1x128xf32, #tpu.memory_space<vmem>>
    %178 = tpu.memref_slice %arg9[%9] : memref<2x!tpu.dma_semaphore, #tpu.memory_space<semaphore_mem>> -> memref<1x!tpu.dma_semaphore, #tpu.memory_space<semaphore_mem>>
    %179 = tpu.memref_squeeze %178 : memref<1x!tpu.dma_semaphore, #tpu.memory_space<semaphore_mem>> -> memref<!tpu.dma_semaphore, #tpu.memory_space<semaphore_mem>>
    tpu.wait_dma2 semaphore(%179 : memref<!tpu.dma_semaphore, #tpu.memory_space<semaphore_mem>>) src(%175 : memref<1x128xf32, #tpu.memory_space<any>>) dst(%177 : memref<1x128xf32, #tpu.memory_space<vmem>>)
    %c18_i32 = arith.constant 18 : i32
    %180 = arith.addi %17, %c18_i32 : i32
    %181 = arith.index_cast %arg0 : i32 to index
    %182 = arith.index_cast %180 : i32 to index
    %183 = memref.load %arg2[%181, %182] : memref<2x64xi32, #tpu.memory_space<smem>>
    %c0_i32_65 = arith.constant 0 : i32
    %184 = tpu.memref_slice %arg3[%183, %c0_i32_65] : memref<512x128xf32, #tpu.memory_space<any>> -> memref<1x128xf32, #tpu.memory_space<any>>
    %c18_i32_66 = arith.constant 18 : i32
    %c0_i32_67 = arith.constant 0 : i32
    %185 = tpu.memref_slice %arg8[%9, %c18_i32_66, %c0_i32_67] : memref<2x32x128xf32, #tpu.memory_space<vmem>> -> memref<1x1x128xf32, #tpu.memory_space<vmem>>
    %186 = tpu.memref_squeeze %185 : memref<1x1x128xf32, #tpu.memory_space<vmem>> -> memref<1x128xf32, #tpu.memory_space<vmem>>
    %187 = tpu.memref_slice %arg9[%9] : memref<2x!tpu.dma_semaphore, #tpu.memory_space<semaphore_mem>> -> memref<1x!tpu.dma_semaphore, #tpu.memory_space<semaphore_mem>>
    %188 = tpu.memref_squeeze %187 : memref<1x!tpu.dma_semaphore, #tpu.memory_space<semaphore_mem>> -> memref<!tpu.dma_semaphore, #tpu.memory_space<semaphore_mem>>
    tpu.wait_dma2 semaphore(%188 : memref<!tpu.dma_semaphore, #tpu.memory_space<semaphore_mem>>) src(%184 : memref<1x128xf32, #tpu.memory_space<any>>) dst(%186 : memref<1x128xf32, #tpu.memory_space<vmem>>)
    %c19_i32 = arith.constant 19 : i32
    %189 = arith.addi %17, %c19_i32 : i32
    %190 = arith.index_cast %arg0 : i32 to index
    %191 = arith.index_cast %189 : i32 to index
    %192 = memref.load %arg2[%190, %191] : memref<2x64xi32, #tpu.memory_space<smem>>
    %c0_i32_68 = arith.constant 0 : i32
    %193 = tpu.memref_slice %arg3[%192, %c0_i32_68] : memref<512x128xf32, #tpu.memory_space<any>> -> memref<1x128xf32, #tpu.memory_space<any>>
    %c19_i32_69 = arith.constant 19 : i32
    %c0_i32_70 = arith.constant 0 : i32
    %194 = tpu.memref_slice %arg8[%9, %c19_i32_69, %c0_i32_70] : memref<2x32x128xf32, #tpu.memory_space<vmem>> -> memref<1x1x128xf32, #tpu.memory_space<vmem>>
    %195 = tpu.memref_squeeze %194 : memref<1x1x128xf32, #tpu.memory_space<vmem>> -> memref<1x128xf32, #tpu.memory_space<vmem>>
    %196 = tpu.memref_slice %arg9[%9] : memref<2x!tpu.dma_semaphore, #tpu.memory_space<semaphore_mem>> -> memref<1x!tpu.dma_semaphore, #tpu.memory_space<semaphore_mem>>
    %197 = tpu.memref_squeeze %196 : memref<1x!tpu.dma_semaphore, #tpu.memory_space<semaphore_mem>> -> memref<!tpu.dma_semaphore, #tpu.memory_space<semaphore_mem>>
    tpu.wait_dma2 semaphore(%197 : memref<!tpu.dma_semaphore, #tpu.memory_space<semaphore_mem>>) src(%193 : memref<1x128xf32, #tpu.memory_space<any>>) dst(%195 : memref<1x128xf32, #tpu.memory_space<vmem>>)
    %c20_i32 = arith.constant 20 : i32
    %198 = arith.addi %17, %c20_i32 : i32
    %199 = arith.index_cast %arg0 : i32 to index
    %200 = arith.index_cast %198 : i32 to index
    %201 = memref.load %arg2[%199, %200] : memref<2x64xi32, #tpu.memory_space<smem>>
    %c0_i32_71 = arith.constant 0 : i32
    %202 = tpu.memref_slice %arg3[%201, %c0_i32_71] : memref<512x128xf32, #tpu.memory_space<any>> -> memref<1x128xf32, #tpu.memory_space<any>>
    %c20_i32_72 = arith.constant 20 : i32
    %c0_i32_73 = arith.constant 0 : i32
    %203 = tpu.memref_slice %arg8[%9, %c20_i32_72, %c0_i32_73] : memref<2x32x128xf32, #tpu.memory_space<vmem>> -> memref<1x1x128xf32, #tpu.memory_space<vmem>>
    %204 = tpu.memref_squeeze %203 : memref<1x1x128xf32, #tpu.memory_space<vmem>> -> memref<1x128xf32, #tpu.memory_space<vmem>>
    %205 = tpu.memref_slice %arg9[%9] : memref<2x!tpu.dma_semaphore, #tpu.memory_space<semaphore_mem>> -> memref<1x!tpu.dma_semaphore, #tpu.memory_space<semaphore_mem>>
    %206 = tpu.memref_squeeze %205 : memref<1x!tpu.dma_semaphore, #tpu.memory_space<semaphore_mem>> -> memref<!tpu.dma_semaphore, #tpu.memory_space<semaphore_mem>>
    tpu.wait_dma2 semaphore(%206 : memref<!tpu.dma_semaphore, #tpu.memory_space<semaphore_mem>>) src(%202 : memref<1x128xf32, #tpu.memory_space<any>>) dst(%204 : memref<1x128xf32, #tpu.memory_space<vmem>>)
    %c21_i32 = arith.constant 21 : i32
    %207 = arith.addi %17, %c21_i32 : i32
    %208 = arith.index_cast %arg0 : i32 to index
    %209 = arith.index_cast %207 : i32 to index
    %210 = memref.load %arg2[%208, %209] : memref<2x64xi32, #tpu.memory_space<smem>>
    %c0_i32_74 = arith.constant 0 : i32
    %211 = tpu.memref_slice %arg3[%210, %c0_i32_74] : memref<512x128xf32, #tpu.memory_space<any>> -> memref<1x128xf32, #tpu.memory_space<any>>
    %c21_i32_75 = arith.constant 21 : i32
    %c0_i32_76 = arith.constant 0 : i32
    %212 = tpu.memref_slice %arg8[%9, %c21_i32_75, %c0_i32_76] : memref<2x32x128xf32, #tpu.memory_space<vmem>> -> memref<1x1x128xf32, #tpu.memory_space<vmem>>
    %213 = tpu.memref_squeeze %212 : memref<1x1x128xf32, #tpu.memory_space<vmem>> -> memref<1x128xf32, #tpu.memory_space<vmem>>
    %214 = tpu.memref_slice %arg9[%9] : memref<2x!tpu.dma_semaphore, #tpu.memory_space<semaphore_mem>> -> memref<1x!tpu.dma_semaphore, #tpu.memory_space<semaphore_mem>>
    %215 = tpu.memref_squeeze %214 : memref<1x!tpu.dma_semaphore, #tpu.memory_space<semaphore_mem>> -> memref<!tpu.dma_semaphore, #tpu.memory_space<semaphore_mem>>
    tpu.wait_dma2 semaphore(%215 : memref<!tpu.dma_semaphore, #tpu.memory_space<semaphore_mem>>) src(%211 : memref<1x128xf32, #tpu.memory_space<any>>) dst(%213 : memref<1x128xf32, #tpu.memory_space<vmem>>)
    %c22_i32 = arith.constant 22 : i32
    %216 = arith.addi %17, %c22_i32 : i32
    %217 = arith.index_cast %arg0 : i32 to index
    %218 = arith.index_cast %216 : i32 to index
    %219 = memref.load %arg2[%217, %218] : memref<2x64xi32, #tpu.memory_space<smem>>
    %c0_i32_77 = arith.constant 0 : i32
    %220 = tpu.memref_slice %arg3[%219, %c0_i32_77] : memref<512x128xf32, #tpu.memory_space<any>> -> memref<1x128xf32, #tpu.memory_space<any>>
    %c22_i32_78 = arith.constant 22 : i32
    %c0_i32_79 = arith.constant 0 : i32
    %221 = tpu.memref_slice %arg8[%9, %c22_i32_78, %c0_i32_79] : memref<2x32x128xf32, #tpu.memory_space<vmem>> -> memref<1x1x128xf32, #tpu.memory_space<vmem>>
    %222 = tpu.memref_squeeze %221 : memref<1x1x128xf32, #tpu.memory_space<vmem>> -> memref<1x128xf32, #tpu.memory_space<vmem>>
    %223 = tpu.memref_slice %arg9[%9] : memref<2x!tpu.dma_semaphore, #tpu.memory_space<semaphore_mem>> -> memref<1x!tpu.dma_semaphore, #tpu.memory_space<semaphore_mem>>
    %224 = tpu.memref_squeeze %223 : memref<1x!tpu.dma_semaphore, #tpu.memory_space<semaphore_mem>> -> memref<!tpu.dma_semaphore, #tpu.memory_space<semaphore_mem>>
    tpu.wait_dma2 semaphore(%224 : memref<!tpu.dma_semaphore, #tpu.memory_space<semaphore_mem>>) src(%220 : memref<1x128xf32, #tpu.memory_space<any>>) dst(%222 : memref<1x128xf32, #tpu.memory_space<vmem>>)
    %c23_i32 = arith.constant 23 : i32
    %225 = arith.addi %17, %c23_i32 : i32
    %226 = arith.index_cast %arg0 : i32 to index
    %227 = arith.index_cast %225 : i32 to index
    %228 = memref.load %arg2[%226, %227] : memref<2x64xi32, #tpu.memory_space<smem>>
    %c0_i32_80 = arith.constant 0 : i32
    %229 = tpu.memref_slice %arg3[%228, %c0_i32_80] : memref<512x128xf32, #tpu.memory_space<any>> -> memref<1x128xf32, #tpu.memory_space<any>>
    %c23_i32_81 = arith.constant 23 : i32
    %c0_i32_82 = arith.constant 0 : i32
    %230 = tpu.memref_slice %arg8[%9, %c23_i32_81, %c0_i32_82] : memref<2x32x128xf32, #tpu.memory_space<vmem>> -> memref<1x1x128xf32, #tpu.memory_space<vmem>>
    %231 = tpu.memref_squeeze %230 : memref<1x1x128xf32, #tpu.memory_space<vmem>> -> memref<1x128xf32, #tpu.memory_space<vmem>>
    %232 = tpu.memref_slice %arg9[%9] : memref<2x!tpu.dma_semaphore, #tpu.memory_space<semaphore_mem>> -> memref<1x!tpu.dma_semaphore, #tpu.memory_space<semaphore_mem>>
    %233 = tpu.memref_squeeze %232 : memref<1x!tpu.dma_semaphore, #tpu.memory_space<semaphore_mem>> -> memref<!tpu.dma_semaphore, #tpu.memory_space<semaphore_mem>>
    tpu.wait_dma2 semaphore(%233 : memref<!tpu.dma_semaphore, #tpu.memory_space<semaphore_mem>>) src(%229 : memref<1x128xf32, #tpu.memory_space<any>>) dst(%231 : memref<1x128xf32, #tpu.memory_space<vmem>>)
    %c24_i32 = arith.constant 24 : i32
    %234 = arith.addi %17, %c24_i32 : i32
    %235 = arith.index_cast %arg0 : i32 to index
    %236 = arith.index_cast %234 : i32 to index
    %237 = memref.load %arg2[%235, %236] : memref<2x64xi32, #tpu.memory_space<smem>>
    %c0_i32_83 = arith.constant 0 : i32
    %238 = tpu.memref_slice %arg3[%237, %c0_i32_83] : memref<512x128xf32, #tpu.memory_space<any>> -> memref<1x128xf32, #tpu.memory_space<any>>
    %c24_i32_84 = arith.constant 24 : i32
    %c0_i32_85 = arith.constant 0 : i32
    %239 = tpu.memref_slice %arg8[%9, %c24_i32_84, %c0_i32_85] : memref<2x32x128xf32, #tpu.memory_space<vmem>> -> memref<1x1x128xf32, #tpu.memory_space<vmem>>
    %240 = tpu.memref_squeeze %239 : memref<1x1x128xf32, #tpu.memory_space<vmem>> -> memref<1x128xf32, #tpu.memory_space<vmem>>
    %241 = tpu.memref_slice %arg9[%9] : memref<2x!tpu.dma_semaphore, #tpu.memory_space<semaphore_mem>> -> memref<1x!tpu.dma_semaphore, #tpu.memory_space<semaphore_mem>>
    %242 = tpu.memref_squeeze %241 : memref<1x!tpu.dma_semaphore, #tpu.memory_space<semaphore_mem>> -> memref<!tpu.dma_semaphore, #tpu.memory_space<semaphore_mem>>
    tpu.wait_dma2 semaphore(%242 : memref<!tpu.dma_semaphore, #tpu.memory_space<semaphore_mem>>) src(%238 : memref<1x128xf32, #tpu.memory_space<any>>) dst(%240 : memref<1x128xf32, #tpu.memory_space<vmem>>)
    %c25_i32 = arith.constant 25 : i32
    %243 = arith.addi %17, %c25_i32 : i32
    %244 = arith.index_cast %arg0 : i32 to index
    %245 = arith.index_cast %243 : i32 to index
    %246 = memref.load %arg2[%244, %245] : memref<2x64xi32, #tpu.memory_space<smem>>
    %c0_i32_86 = arith.constant 0 : i32
    %247 = tpu.memref_slice %arg3[%246, %c0_i32_86] : memref<512x128xf32, #tpu.memory_space<any>> -> memref<1x128xf32, #tpu.memory_space<any>>
    %c25_i32_87 = arith.constant 25 : i32
    %c0_i32_88 = arith.constant 0 : i32
    %248 = tpu.memref_slice %arg8[%9, %c25_i32_87, %c0_i32_88] : memref<2x32x128xf32, #tpu.memory_space<vmem>> -> memref<1x1x128xf32, #tpu.memory_space<vmem>>
    %249 = tpu.memref_squeeze %248 : memref<1x1x128xf32, #tpu.memory_space<vmem>> -> memref<1x128xf32, #tpu.memory_space<vmem>>
    %250 = tpu.memref_slice %arg9[%9] : memref<2x!tpu.dma_semaphore, #tpu.memory_space<semaphore_mem>> -> memref<1x!tpu.dma_semaphore, #tpu.memory_space<semaphore_mem>>
    %251 = tpu.memref_squeeze %250 : memref<1x!tpu.dma_semaphore, #tpu.memory_space<semaphore_mem>> -> memref<!tpu.dma_semaphore, #tpu.memory_space<semaphore_mem>>
    tpu.wait_dma2 semaphore(%251 : memref<!tpu.dma_semaphore, #tpu.memory_space<semaphore_mem>>) src(%247 : memref<1x128xf32, #tpu.memory_space<any>>) dst(%249 : memref<1x128xf32, #tpu.memory_space<vmem>>)
    %c26_i32 = arith.constant 26 : i32
    %252 = arith.addi %17, %c26_i32 : i32
    %253 = arith.index_cast %arg0 : i32 to index
    %254 = arith.index_cast %252 : i32 to index
    %255 = memref.load %arg2[%253, %254] : memref<2x64xi32, #tpu.memory_space<smem>>
    %c0_i32_89 = arith.constant 0 : i32
    %256 = tpu.memref_slice %arg3[%255, %c0_i32_89] : memref<512x128xf32, #tpu.memory_space<any>> -> memref<1x128xf32, #tpu.memory_space<any>>
    %c26_i32_90 = arith.constant 26 : i32
    %c0_i32_91 = arith.constant 0 : i32
    %257 = tpu.memref_slice %arg8[%9, %c26_i32_90, %c0_i32_91] : memref<2x32x128xf32, #tpu.memory_space<vmem>> -> memref<1x1x128xf32, #tpu.memory_space<vmem>>
    %258 = tpu.memref_squeeze %257 : memref<1x1x128xf32, #tpu.memory_space<vmem>> -> memref<1x128xf32, #tpu.memory_space<vmem>>
    %259 = tpu.memref_slice %arg9[%9] : memref<2x!tpu.dma_semaphore, #tpu.memory_space<semaphore_mem>> -> memref<1x!tpu.dma_semaphore, #tpu.memory_space<semaphore_mem>>
    %260 = tpu.memref_squeeze %259 : memref<1x!tpu.dma_semaphore, #tpu.memory_space<semaphore_mem>> -> memref<!tpu.dma_semaphore, #tpu.memory_space<semaphore_mem>>
    tpu.wait_dma2 semaphore(%260 : memref<!tpu.dma_semaphore, #tpu.memory_space<semaphore_mem>>) src(%256 : memref<1x128xf32, #tpu.memory_space<any>>) dst(%258 : memref<1x128xf32, #tpu.memory_space<vmem>>)
    %c27_i32 = arith.constant 27 : i32
    %261 = arith.addi %17, %c27_i32 : i32
    %262 = arith.index_cast %arg0 : i32 to index
    %263 = arith.index_cast %261 : i32 to index
    %264 = memref.load %arg2[%262, %263] : memref<2x64xi32, #tpu.memory_space<smem>>
    %c0_i32_92 = arith.constant 0 : i32
    %265 = tpu.memref_slice %arg3[%264, %c0_i32_92] : memref<512x128xf32, #tpu.memory_space<any>> -> memref<1x128xf32, #tpu.memory_space<any>>
    %c27_i32_93 = arith.constant 27 : i32
    %c0_i32_94 = arith.constant 0 : i32
    %266 = tpu.memref_slice %arg8[%9, %c27_i32_93, %c0_i32_94] : memref<2x32x128xf32, #tpu.memory_space<vmem>> -> memref<1x1x128xf32, #tpu.memory_space<vmem>>
    %267 = tpu.memref_squeeze %266 : memref<1x1x128xf32, #tpu.memory_space<vmem>> -> memref<1x128xf32, #tpu.memory_space<vmem>>
    %268 = tpu.memref_slice %arg9[%9] : memref<2x!tpu.dma_semaphore, #tpu.memory_space<semaphore_mem>> -> memref<1x!tpu.dma_semaphore, #tpu.memory_space<semaphore_mem>>
    %269 = tpu.memref_squeeze %268 : memref<1x!tpu.dma_semaphore, #tpu.memory_space<semaphore_mem>> -> memref<!tpu.dma_semaphore, #tpu.memory_space<semaphore_mem>>
    tpu.wait_dma2 semaphore(%269 : memref<!tpu.dma_semaphore, #tpu.memory_space<semaphore_mem>>) src(%265 : memref<1x128xf32, #tpu.memory_space<any>>) dst(%267 : memref<1x128xf32, #tpu.memory_space<vmem>>)
    %c28_i32 = arith.constant 28 : i32
    %270 = arith.addi %17, %c28_i32 : i32
    %271 = arith.index_cast %arg0 : i32 to index
    %272 = arith.index_cast %270 : i32 to index
    %273 = memref.load %arg2[%271, %272] : memref<2x64xi32, #tpu.memory_space<smem>>
    %c0_i32_95 = arith.constant 0 : i32
    %274 = tpu.memref_slice %arg3[%273, %c0_i32_95] : memref<512x128xf32, #tpu.memory_space<any>> -> memref<1x128xf32, #tpu.memory_space<any>>
    %c28_i32_96 = arith.constant 28 : i32
    %c0_i32_97 = arith.constant 0 : i32
    %275 = tpu.memref_slice %arg8[%9, %c28_i32_96, %c0_i32_97] : memref<2x32x128xf32, #tpu.memory_space<vmem>> -> memref<1x1x128xf32, #tpu.memory_space<vmem>>
    %276 = tpu.memref_squeeze %275 : memref<1x1x128xf32, #tpu.memory_space<vmem>> -> memref<1x128xf32, #tpu.memory_space<vmem>>
    %277 = tpu.memref_slice %arg9[%9] : memref<2x!tpu.dma_semaphore, #tpu.memory_space<semaphore_mem>> -> memref<1x!tpu.dma_semaphore, #tpu.memory_space<semaphore_mem>>
    %278 = tpu.memref_squeeze %277 : memref<1x!tpu.dma_semaphore, #tpu.memory_space<semaphore_mem>> -> memref<!tpu.dma_semaphore, #tpu.memory_space<semaphore_mem>>
    tpu.wait_dma2 semaphore(%278 : memref<!tpu.dma_semaphore, #tpu.memory_space<semaphore_mem>>) src(%274 : memref<1x128xf32, #tpu.memory_space<any>>) dst(%276 : memref<1x128xf32, #tpu.memory_space<vmem>>)
    %c29_i32 = arith.constant 29 : i32
    %279 = arith.addi %17, %c29_i32 : i32
    %280 = arith.index_cast %arg0 : i32 to index
    %281 = arith.index_cast %279 : i32 to index
    %282 = memref.load %arg2[%280, %281] : memref<2x64xi32, #tpu.memory_space<smem>>
    %c0_i32_98 = arith.constant 0 : i32
    %283 = tpu.memref_slice %arg3[%282, %c0_i32_98] : memref<512x128xf32, #tpu.memory_space<any>> -> memref<1x128xf32, #tpu.memory_space<any>>
    %c29_i32_99 = arith.constant 29 : i32
    %c0_i32_100 = arith.constant 0 : i32
    %284 = tpu.memref_slice %arg8[%9, %c29_i32_99, %c0_i32_100] : memref<2x32x128xf32, #tpu.memory_space<vmem>> -> memref<1x1x128xf32, #tpu.memory_space<vmem>>
    %285 = tpu.memref_squeeze %284 : memref<1x1x128xf32, #tpu.memory_space<vmem>> -> memref<1x128xf32, #tpu.memory_space<vmem>>
    %286 = tpu.memref_slice %arg9[%9] : memref<2x!tpu.dma_semaphore, #tpu.memory_space<semaphore_mem>> -> memref<1x!tpu.dma_semaphore, #tpu.memory_space<semaphore_mem>>
    %287 = tpu.memref_squeeze %286 : memref<1x!tpu.dma_semaphore, #tpu.memory_space<semaphore_mem>> -> memref<!tpu.dma_semaphore, #tpu.memory_space<semaphore_mem>>
    tpu.wait_dma2 semaphore(%287 : memref<!tpu.dma_semaphore, #tpu.memory_space<semaphore_mem>>) src(%283 : memref<1x128xf32, #tpu.memory_space<any>>) dst(%285 : memref<1x128xf32, #tpu.memory_space<vmem>>)
    %c30_i32 = arith.constant 30 : i32
    %288 = arith.addi %17, %c30_i32 : i32
    %289 = arith.index_cast %arg0 : i32 to index
    %290 = arith.index_cast %288 : i32 to index
    %291 = memref.load %arg2[%289, %290] : memref<2x64xi32, #tpu.memory_space<smem>>
    %c0_i32_101 = arith.constant 0 : i32
    %292 = tpu.memref_slice %arg3[%291, %c0_i32_101] : memref<512x128xf32, #tpu.memory_space<any>> -> memref<1x128xf32, #tpu.memory_space<any>>
    %c30_i32_102 = arith.constant 30 : i32
    %c0_i32_103 = arith.constant 0 : i32
    %293 = tpu.memref_slice %arg8[%9, %c30_i32_102, %c0_i32_103] : memref<2x32x128xf32, #tpu.memory_space<vmem>> -> memref<1x1x128xf32, #tpu.memory_space<vmem>>
    %294 = tpu.memref_squeeze %293 : memref<1x1x128xf32, #tpu.memory_space<vmem>> -> memref<1x128xf32, #tpu.memory_space<vmem>>
    %295 = tpu.memref_slice %arg9[%9] : memref<2x!tpu.dma_semaphore, #tpu.memory_space<semaphore_mem>> -> memref<1x!tpu.dma_semaphore, #tpu.memory_space<semaphore_mem>>
    %296 = tpu.memref_squeeze %295 : memref<1x!tpu.dma_semaphore, #tpu.memory_space<semaphore_mem>> -> memref<!tpu.dma_semaphore, #tpu.memory_space<semaphore_mem>>
    tpu.wait_dma2 semaphore(%296 : memref<!tpu.dma_semaphore, #tpu.memory_space<semaphore_mem>>) src(%292 : memref<1x128xf32, #tpu.memory_space<any>>) dst(%294 : memref<1x128xf32, #tpu.memory_space<vmem>>)
    %c31_i32 = arith.constant 31 : i32
    %297 = arith.addi %17, %c31_i32 : i32
    %298 = arith.index_cast %arg0 : i32 to index
    %299 = arith.index_cast %297 : i32 to index
    %300 = memref.load %arg2[%298, %299] : memref<2x64xi32, #tpu.memory_space<smem>>
    %c0_i32_104 = arith.constant 0 : i32
    %301 = tpu.memref_slice %arg3[%300, %c0_i32_104] : memref<512x128xf32, #tpu.memory_space<any>> -> memref<1x128xf32, #tpu.memory_space<any>>
    %c31_i32_105 = arith.constant 31 : i32
    %c0_i32_106 = arith.constant 0 : i32
    %302 = tpu.memref_slice %arg8[%9, %c31_i32_105, %c0_i32_106] : memref<2x32x128xf32, #tpu.memory_space<vmem>> -> memref<1x1x128xf32, #tpu.memory_space<vmem>>
    %303 = tpu.memref_squeeze %302 : memref<1x1x128xf32, #tpu.memory_space<vmem>> -> memref<1x128xf32, #tpu.memory_space<vmem>>
    %304 = tpu.memref_slice %arg9[%9] : memref<2x!tpu.dma_semaphore, #tpu.memory_space<semaphore_mem>> -> memref<1x!tpu.dma_semaphore, #tpu.memory_space<semaphore_mem>>
    %305 = tpu.memref_squeeze %304 : memref<1x!tpu.dma_semaphore, #tpu.memory_space<semaphore_mem>> -> memref<!tpu.dma_semaphore, #tpu.memory_space<semaphore_mem>>
    tpu.wait_dma2 semaphore(%305 : memref<!tpu.dma_semaphore, #tpu.memory_space<semaphore_mem>>) src(%301 : memref<1x128xf32, #tpu.memory_space<any>>) dst(%303 : memref<1x128xf32, #tpu.memory_space<vmem>>)
    %306 = arith.index_cast %9 : i32 to index
    %c0 = arith.constant 0 : index
    %c0_107 = arith.constant 0 : index
    %307 = vector.load %arg8[%306, %c0, %c0_107] : memref<2x32x128xf32, #tpu.memory_space<vmem>>, vector<1x32x128xf32>
    %308 = vector.shape_cast %307 : vector<1x32x128xf32> to vector<32x128xf32>
    %c0_108 = arith.constant 0 : index
    %c0_109 = arith.constant 0 : index
    %309 = vector.load %arg4[%c0_108, %c0_109] : memref<32x128xf32, #tpu.memory_space<vmem>>, vector<32x128xf32>
    %310 = arith.addf %308, %309 : vector<32x128xf32>
    %cst = arith.constant dense<0.000000e+00> : vector<32xf32>
    %311 = vector.multi_reduction <add>, %310, %cst [1] : vector<32x128xf32> to vector<32xf32>
    %312 = vector.shape_cast %311 : vector<32xf32> to vector<32x1xf32>
    %cst_110 = arith.constant 1.280000e+02 : f32
    %313 = vector.broadcast %cst_110 : f32 to vector<32x1xf32>
    %314 = arith.divf %312, %313 : vector<32x1xf32>
    %315 = vector.broadcast %314 : vector<32x1xf32> to vector<32x128xf32>
    %316 = arith.subf %310, %315 : vector<32x128xf32>
    %317 = arith.mulf %316, %316 : vector<32x128xf32>
    %cst_111 = arith.constant dense<0.000000e+00> : vector<32xf32>
    %318 = vector.multi_reduction <add>, %317, %cst_111 [1] : vector<32x128xf32> to vector<32xf32>
    %319 = vector.shape_cast %318 : vector<32xf32> to vector<32x1xf32>
    %cst_112 = arith.constant 1.280000e+02 : f32
    %320 = vector.broadcast %cst_112 : f32 to vector<32x1xf32>
    %321 = arith.divf %319, %320 : vector<32x1xf32>
    %cst_113 = arith.constant 9.99999996E-13 : f32
    %322 = vector.broadcast %cst_113 : f32 to vector<32x1xf32>
    %323 = arith.addf %321, %322 : vector<32x1xf32>
    %324 = math.rsqrt %323 : vector<32x1xf32>
    %325 = vector.broadcast %324 : vector<32x1xf32> to vector<32x128xf32>
    %326 = arith.mulf %316, %325 : vector<32x128xf32>
    %c0_114 = arith.constant 0 : index
    %c0_115 = arith.constant 0 : index
    %327 = vector.load %arg5[%c0_114, %c0_115] : memref<1x128xf32, #tpu.memory_space<vmem>>, vector<1x128xf32>
    %328 = vector.broadcast %327 : vector<1x128xf32> to vector<32x128xf32>
    %329 = arith.mulf %326, %328 : vector<32x128xf32>
    %c0_116 = arith.constant 0 : index
    %c0_117 = arith.constant 0 : index
    %330 = vector.load %arg6[%c0_116, %c0_117] : memref<1x128xf32, #tpu.memory_space<vmem>>, vector<1x128xf32>
    %331 = vector.broadcast %330 : vector<1x128xf32> to vector<32x128xf32>
    %332 = arith.addf %329, %331 : vector<32x128xf32>
    %c0_118 = arith.constant 0 : index
    %c0_119 = arith.constant 0 : index
    %333 = vector.load %arg7[%c0_118, %c0_119] : memref<32x128xf32, #tpu.memory_space<vmem>>, vector<32x128xf32>
    tpu.vector_store %arg7[%c0_118, %c0_119], %332 {strides = array<i32>} : memref<32x128xf32, #tpu.memory_space<vmem>>, vector<32x128xf32>,
    return
  }
  func.func @transform_1(%arg0: i32, %arg1: i32, %arg2: memref<2x64xi32, #tpu.memory_space<smem>>) -> (i32, i32) {
    %c0_i32 = arith.constant 0 : i32
    %c0_i32_0 = arith.constant 0 : i32
    return %arg1, %c0_i32 : i32, i32
  }
  func.func @transform_2(%arg0: i32, %arg1: i32, %arg2: memref<2x64xi32, #tpu.memory_space<smem>>) -> (i32, i32) {
    %c0_i32 = arith.constant 0 : i32
    %c0_i32_0 = arith.constant 0 : i32
    %c0_i32_1 = arith.constant 0 : i32
    return %c0_i32, %c0_i32_0 : i32, i32
  }
  func.func @transform_3(%arg0: i32, %arg1: i32, %arg2: memref<2x64xi32, #tpu.memory_space<smem>>) -> (i32, i32) {
    %c0_i32 = arith.constant 0 : i32
    %c0_i32_0 = arith.constant 0 : i32
    %c0_i32_1 = arith.constant 0 : i32
    return %c0_i32, %c0_i32_0 : i32, i32
  }
  func.func @transform_4(%arg0: i32, %arg1: i32, %arg2: memref<2x64xi32, #tpu.memory_space<smem>>) -> (i32, i32) {
    %c2_i32 = arith.constant 2 : i32
    %0 = arith.muli %arg0, %c2_i32 : i32
    %1 = arith.addi %0, %arg1 : i32
    %c0_i32 = arith.constant 0 : i32
    %c0_i32_0 = arith.constant 0 : i32
    return %1, %c0_i32 : i32, i32
  }
}

</mosaic_0001>

<bundles_post_ra>
// kernel: tpu_custom_call.1
= control target key start
LH: loop header
LB: loop body
LE: loop exit
PB: predicated region body
PF: predicated region fallthrough
CT: control target
= control target key end

     0   :  { %s4177_s18 = smov [#allocation5]   ;;  %s5598_s0 = inlined_call_operand.hbm [shape: s32[2,64], index: 0, kind: input, shape index: {}]   ;;  %s5599_s1 = inlined_call_operand.hbm [shape: f32[512,128], index: 1, kind: input, shape index: {}]   ;;  %s5600_s2 = inlined_call_operand.hbm [shape: f32[128,128], index: 2, kind: input, shape index: {}]   ;;  %s5601_s3 = inlined_call_operand.vmem [shape: f32[1,128], index: 3, kind: input, shape index: {}]   ;;  %s5602_s4 = inlined_call_operand.vmem [shape: f32[1,128], index: 4, kind: input, shape index: {}]   ;;  %s5603_s5 = inlined_call_operand.hbm [shape: f32[128,128], index: 5, kind: output, shape index: {}]  }
   0x1   :  { %5621 = sst [smem:[#allocation159_spill]] %s5600_s2 }
   0x2   :  { %5622 = sst [smem:[#allocation160_spill]] %s5601_s3 }
   0x3   :  { %5623 = sst [smem:[#allocation161_spill]] %s5602_s4 }
   0x4   :  { %5624 = sst [smem:[#allocation162_spill]] %s5603_s5 }
   0x5   :  { %11 = dma.hbm_to_smem %s5598_s0, 32, %s4177_s18, [#allocation4] }
   0x6   :  { %4121 = dma.done.wait [#allocation4], 32 }
   0x7   :  { %4122 = vsyncadd [#allocation4], 4294967264 }
   0x8   :  { %13 = sfence }
   0x9   :  { %14 = vsyncpa [#allocation7], 0 }
   0xa   :  { %16 = vsyncpa [#allocation7 + $0x1], 0 }
   0xb   :  { %17 = vsyncpa [#allocation8], 0 }
   0xc   :  { %19 = vsyncpa [#allocation8 + $0x1], 0  ;;  %s4250_s21 = smov 0   ;;  %s4252_s22 = smov 0  }
   0xd   :  { %s4254_s23 = smov 0   ;;  %s4256_s24 = smov 0  }
   0xe   :  { %s4258_s25 = smov 0   ;;  %s4260_s26 = smov 0  }
   0xf   :  { %s4262_s0 = smov 0   ;;  %s4264_s27 = smov 0  }
  0x10   :  { %s4266_s28 = smov 0   ;;  %s4268_s29 = smov 0  }
  0x11   :  { %s4270_s30 = smov 0  }
  0x12 LB: > { %5625 = sst [smem:[#allocation144_spill]] %s4135_s21  ;;  %s2298_s6 = sadd.s32 4294967295, %s4175_s30   ;;  %s4175_s30 = sphi %s4270_s30, %s25_s30   ;;  %s4171_s29 = sphi %s4268_s29, %s5665_s29   ;;  %s4167_s28 = sphi %s4266_s28, %s5664_s28   ;;  %s4163_s27 = sphi %s4264_s27, %s5663_s27   ;;  %s4159_s0 = sphi %s4262_s0, %s5662_s0   ;;  %s4155_s26 = sphi %s4260_s26, %s5661_s26   ;;  %s4151_s25 = sphi %s4258_s25, %s5660_s25   ;;  %s4147_s24 = sphi %s4256_s24, %s5659_s24   ;;  %s4143_s23 = sphi %s4254_s23, %s5658_s23   ;;  %s4139_s22 = sphi %s4252_s22, %s5657_s22   ;;  %s4135_s21 = sphi %s4250_s21, %s5656_s21  }
  0x13   : > { %5626 = sst [smem:[#allocation145_spill]] %s4139_s22  ;;  %s2299_s7 = sadd.s32 4294967294, %s4175_s30  }
  0x14   : > { %5627 = sst [smem:[#allocation146_spill]] %s4143_s23  ;;  %s34_s8 = sadd.s32 1, %s4167_s28 }
  0x15   : > { %5628 = sst [smem:[#allocation147_spill]] %s4151_s25  ;;  %s37_s9 = sadd.s32 1, %s4171_s29 }
  0x16   : > { %5629 = sst [smem:[#allocation148_spill]] %s4155_s26  ;;  %p35_p0 = scmp.ge.s32.totalorder %s34_s8, 2 }
  0x17   : > { %5630 = sst [smem:[#allocation149_spill]] %s4167_s28  ;;  %s44_s10 = sadd.s32 1, %s4155_s26 }
  0x18   : > { %5631 = sst [smem:[#allocation150_spill]] %s4171_s29  ;;  %p51_p1 = scmp.ne.s32.totalorder %s4155_s26, %s4151_s25 }
  0x19   : > { %5632 = sst [smem:[#allocation151_spill]] %s4175_s30  ;;  %p52_p2 = scmp.eq.s32.totalorder %s4175_s30, 0 }
  0x1a   : > { %s5667_s8 = smov (%p35_p0, %s34_s8), 0  ;;  %s5669_s9 = smov (!%p35_p0, %s37_s9), %s4171_s29 }
  0x1b   : > { %5633 = sst [smem:[#allocation152_spill]] %s5667_s8  ;;  %s41_s11 = ssub.s32 %s4167_s28, %s5667_s8 }
  0x1c   : > { %p4316_p3 = por %p52_p2, %p51_p1  ;;  %p39_p4 = scmp.ge.s32.totalorder %s5669_s9, 2 }
  0x1d   : > { %p42_p5 = scmp.eq.s32.totalorder %s41_s11, 0  ;;  %p57_p6 = scmp.ne.s32.totalorder %s4151_s25, %s4147_s24 }
  0x1e   : > { %p58_p7 = scmp.eq.s32.totalorder %s2298_s6, 0  ;;  %s5671_s9 = smov (%p39_p4, %s5669_s9), 0 }
  0x1f   : > { %5635 = sst [smem:[#allocation153_spill]] %s5671_s9  ;;  %s2300_s15 = sshll.u32 %s4171_s29, 1 }
  0x20   : > { %s4324_s13 = scalar_select %p42_p5, %s4155_s26, %s44_s10  }
  0x21   : > { %p4326_p8 = por %p58_p7, %p57_p6  ;;  %s110_s16 = sadd.s32 %s4167_s28, %s2300_s15 }
  0x22   : > { %5636 = sst [smem:[#allocation154_spill]] %s4324_s13  ;;  %s2301_s17 = sshll.u32 %s5671_s9, 1 }
  0x23   : > { %s112_s18 = sadd.s32 %s2301_s17, %s5667_s8  ;;  %s116_s19 = sadd.s32 1, %s4143_s23 }
  0x24   : > { %s113_s20 = ssub.s32 %s110_s16, %s112_s18  ;;  %p126_p9 = scmp.ne.s32.totalorder %s4143_s23, %s4139_s22 }
  0x25   : > { %p114_p10 = scmp.eq.s32.totalorder %s113_s20, 0  ;;  %p127_p11 = scmp.eq.s32.totalorder %s2298_s6, 3 }
  0x26   : > { %p132_p12 = scmp.ne.s32.totalorder %s4139_s22, %s4135_s21  ;;  %p133_p13 = scmp.eq.s32.totalorder %s2299_s7, 3 }
  0x27   : > { %s4340_s24 = scalar_select %p114_p10, %s4143_s23, %s116_s19  }
  0x28   : > { %p4342_p0 = por %p127_p11, %p126_p9  ;;  %p4346_p1 = por %p133_p13, %p132_p12 }
  0x29   : > { %5638 = sst [smem:[#allocation155_spill]] %s4340_s24  ;;  %p2472_p2 = scmp.lt.s32.totalorder %s4175_s30, 4 }
  0x2a   : > { %s5639_s10 = scalar_select %p4342_p0, 1, 0 }
  0x2b   : > { %s5641_s11 = scalar_select %p4346_p1, 1, 0 }
  0x2c   : > { %5640 = sst [smem:[#allocation156_spill]] %s5639_s10  ;;  %s159_s15 = sand.u32 1, %s4155_s26  }
  0x2d   : > { %5642 = sst [smem:[#allocation157_spill]] %s5641_s11  ;;  %s2456_s17 = sshll.u32 %s4167_s28, 9 }
  0x2e   : > { %s2304_s16 = sshll.u32 %s159_s15, 5  ;;  %s5643_s2 = sld [smem:[#allocation159_spill]] }
  0x2f   : > { %s163_s20 = scalar_lea.vmem [#allocation6], %s2304_s16  ;;  %p4358_p4 = pnand %p2472_p2, %p4316_p3 }
  0x30   : > { %s170_s7 = sshll.u32 %s163_s20, 4  ;;  %s160_s8 = scalar_lea.sflag [#allocation7], %s159_s15  ;;  %s171_s7 = int_to_ptr.vmem [resolvable:$true] %s170_s7 }
  0x31   : > { %p2617_p5 = pneg %p4358_p4  ;;  %s2628_s29 = scalar_lea.vmem %s171_s7, 512 }
  0x32   : > { %p2629_p6 = scmp.ne.s32.totalorder %s171_s7, %s2628_s29  ;;  %s4178_s28 = smov [#allocation6]  }
  0x33   : > { %s2633_s13 = sshll.u32 %s4178_s28, 4  ;;  %s2634_s13 = int_to_ptr.vmem [resolvable:$false] %s2633_s13 }
  0x34   : > { %s169_s6 = scalar_lea.hbm %s5643_s2, %s2456_s17  ;;  %p2631_p7 = pnand %p2629_p6, %p2617_p5 }
  0x35   : > { %s2635_s9 = scalar_lea.vmem %s2634_s13, 1024  ;;  %p2636_p10 = scmp.lt.s32.totalorder %s171_s7, %s2634_s13 }
  0x36   : > { %p2632_p9 = pneg %p2631_p7  ;;  %p2637_p11 = scmp.lt.s32.totalorder %s2635_s9, %s2628_s29 }
  0x38   : > { %p2638_p12 = por %p2637_p11, %p2636_p10 }
  0x3a   : > { %p2639_p3 = pnand %p2638_p12, %p2632_p9 }
  0x3c   : > { %2642 = shalt.err (!%p2639_p3)
}
  0x3d   : > { %s4179_s12 = smov 128   ;;  %s4180_s15 = smov 8  }
  0x3e   : > { %2467 = dma.hbm_to_vmem [thread:$0]  (!%p4358_p4), %s169_s6, 512, %s171_s7, %s160_s8, %s4179_s12, %s4179_s12, %s4180_s15  }
  0x3f   : > { %p2307_p13 = scmp.ge.s32.totalorder %s4175_s30, 1  ;;  %p178_p2 = scmp.lt.s32.totalorder %s4175_s30, 5 }
  0x41   : > { %p179_p5 = pnand %p2307_p13, %p178_p2 }
  0x43   : > { %182 = sbr.rel (%p179_p5) target bundleno = 1817 (0x719), region = 32 }
  0x48   : > { %s184_s28 = sand.u32 1, %s4151_s25  }
  0x49   : > { %s2308_s17 = sshll.u32 %s184_s28, 5  ;;  %s185_s13 = scalar_lea.sflag [#allocation7], %s184_s28 }
  0x4a   : > { %s4369_s29 = scalar_lea.vmem [#allocation6], %s2308_s17 }
  0x4b   : > { %4124 = dma.done.wait (%p4326_p8), %s185_s13, 512  }
  0x4c   : > { %4126 = vsyncadd (%p4326_p8), %s185_s13, 4294966784  ;;  %s5608_s8 = sand.u32 1, %s4139_s22   ;;  %p215_p4 = scmp.lt.s32.totalorder %s4159_s0, 0 }
  0x4d   : > { %s2309_s16 = sshll.u32 %s5608_s8, 5  ;;  %s216_s18 = ssub.s32 0, %s4159_s0 }
  0x4e   : > { %s2310_s6 = smin.u32 %s4159_s0, %s216_s18  ;;  %s4383_s14 = scalar_lea.vmem [#allocation9], %s2309_s16 }
  0x4f   : > { %s218_s20 = sand.u32 1, %s2310_s6   ;;  %5645 = sst [smem:[#allocation158_spill]] %s4383_s14 }
  0x50   : > { %s219_s7 = ssub.s32 0, %s218_s20  ;;  %p2313_p8 = scmp.ne.s32.totalorder %s4159_s0, 0 }
  0x51   : > { %s5673_s7 = smov (!%p215_p4, %s219_s7), %s218_s20  ;;  %s4387_s9 = sshll.u32 (!%p2313_p8), %s4163_s27, 7 }
  0x52   : > { %p2312_p6 = scmp.lt.s32.totalorder %s5673_s7, 0  ;;  %s225_s19 = sadd.s32 2, %s5673_s7 }
  0x53   : > { %230 = sbr.rel (%p2313_p8) target bundleno = 738 (0x2e2), region = 40  ;;  %s232_s12 = sld [smem:[#allocation5 + %s4387_s9]] (!%p2313_p8) }
  0x54   : > { %s5675_s19 = smov (!%p2312_p6, %s225_s19), %s5673_s7  ;;  %s4181_s15 = smov (!%p2313_p8), [#allocation2]  }
  0x55   : > { %s242_s28 = sshll.u32 (!%p2313_p8), %s4181_s15, 4  ;;  %s246_s17 = sadd.s32 (!%p2313_p8), 1, %s4387_s9  ;;  %s4390_s28 = int_to_ptr.vmem [resolvable:$true] %s242_s28 }
  0x56   : > { %s4393_s13 = sld [smem:[#allocation5 + %s246_s17]] (!%p2313_p8)  ;;  %s4182_s16 = smov (!%p2313_p8), [#allocation2 + $0x1]  }
  0x57   : > { %s258_s18 = sshll.u32 (!%p2313_p8), %s4182_s16, 4  ;;  %s262_s6 = sadd.s32 (!%p2313_p8), 2, %s4387_s9  ;;  %s4396_s18 = int_to_ptr.vmem [resolvable:$true] %s258_s18 }
  0x58   : > { %s4398_s20 = sld [smem:[#allocation5 + %s262_s6]]  ;;  %s278_s7 = sadd.s32 3, %s4387_s9 }
  0x59   : > { %s2315_s8 = sshll.u32 %s232_s12, 4  ;;  %s4183_s2 = smov [#allocation2 + $0x2]  }
  0x5a   : > { %s274_s26 = sshll.u32 %s4183_s2, 4  ;;  %s234_s15 = scalar_lea.hbm %s5599_s1, %s2315_s8  ;;  %s4404_s26 = int_to_ptr.vmem [resolvable:$true] %s274_s26 }
  0x5b   : > { %s2643_s23 = scalar_lea.hbm %s234_s15, 16  ;;  %s4409_s16 = scalar_lea.hbm %s5599_s1, 8192 }
  0x5c   : > { %p2644_p7 = scmp.ne.s32.totalorder %s234_s15, %s2643_s23  ;;  %p2646_p9 = scmp.lt.s32.totalorder %s234_s15, %s5599_s1 }
  0x5d   : > { %p2647_p10 = scmp.lt.s32.totalorder %s4409_s16, %s2643_s23 }
  0x5f   : > { %p2648_p11 = por %p2647_p10, %p2646_p9 }
  0x61   : > { %p2649_p12 = pnand %p2648_p11, %p2644_p7 }
  0x63   : > { %2652 = shalt.err (!%p2649_p12)  }
  0x64   : > { %s2653_s2 = scalar_lea.vmem %s4390_s28, 16  ;;  %s4418_s25 = scalar_lea.vmem %s4390_s28, 1024 }
  0x65   : > { %p2654_p3 = scmp.ne.s32.totalorder %s4390_s28, %s2653_s2  ;;  %p2658_p13 = scmp.lt.s32.totalorder %s4390_s28, %s4390_s28 }
  0x66   : > { %p2659_p2 = scmp.lt.s32.totalorder %s4418_s25, %s2653_s2 }
  0x68   : > { %p2660_p5 = por %p2659_p2, %p2658_p13 }
  0x6a   : > { %p2661_p4 = pnand %p2660_p5, %p2654_p3 }
  0x6c   : > { %2664 = shalt.err (!%p2661_p4)  }
  0x6d   : > { %245 = dma.hbm_to_vmem [thread:$0]  %s234_s15, 16, %s4390_s28, [#allocation3] }
  0x6e   : > { %s2316_s21 = sshll.u32 %s4393_s13, 4  ;;  %s4425_s23 = sld [smem:[#allocation5 + %s278_s7]] }
  0x6f   : > { %s249_s8 = scalar_lea.hbm %s5599_s1, %s2316_s21  ;;  %s2317_s12 = sshll.u32 %s4398_s20, 4 }
  0x70   : > { %s2665_s17 = scalar_lea.hbm %s249_s8, 16  ;;  %p2668_p8 = scmp.lt.s32.totalorder %s249_s8, %s5599_s1 }
  0x71   : > { %p2666_p6 = scmp.ne.s32.totalorder %s249_s8, %s2665_s17  ;;  %p2669_p7 = scmp.lt.s32.totalorder %s4409_s16, %s2665_s17 }
  0x73   : > { %p2670_p9 = por %p2669_p7, %p2668_p8 }
  0x75   : > { %p2671_p10 = pnand %p2670_p9, %p2666_p6 }
  0x77   : > { %2674 = shalt.err (!%p2671_p10)  }
  0x78   : > { %s2675_s13 = scalar_lea.vmem %s4396_s18, 16  ;;  %p2680_p12 = scmp.lt.s32.totalorder %s4396_s18, %s4390_s28 }
  0x79   : > { %p2676_p11 = scmp.ne.s32.totalorder %s4396_s18, %s2675_s13  ;;  %p2681_p3 = scmp.lt.s32.totalorder %s4418_s25, %s2675_s13 }
  0x7b   : > { %p2682_p13 = por %p2681_p3, %p2680_p12 }
  0x7d   : > { %p2683_p2 = pnand %p2682_p13, %p2676_p11 }
  0x7f   : > { %2686 = shalt.err (!%p2683_p2)  }
  0x80   : > { %261 = dma.hbm_to_vmem [thread:$0]  %s249_s8, 16, %s4396_s18, [#allocation3] }
  0x81   : > { %s265_s15 = scalar_lea.hbm %s5599_s1, %s2317_s12 }
  0x82   : > { %s2687_s21 = scalar_lea.hbm %s265_s15, 16  ;;  %p2690_p4 = scmp.lt.s32.totalorder %s265_s15, %s5599_s1 }
  0x83   : > { %p2688_p5 = scmp.ne.s32.totalorder %s265_s15, %s2687_s21  ;;  %p2691_p6 = scmp.lt.s32.totalorder %s4409_s16, %s2687_s21 }
  0x85   : > { %p2692_p8 = por %p2691_p6, %p2690_p4 }
  0x87   : > { %p2693_p7 = pnand %p2692_p8, %p2688_p5 }
  0x89   : > { %2696 = shalt.err (!%p2693_p7)  }
  0x8a   : > { %s2697_s18 = scalar_lea.vmem %s4404_s26, 16  ;;  %p2702_p10 = scmp.lt.s32.totalorder %s4404_s26, %s4390_s28 }
  0x8b   : > { %p2698_p9 = scmp.ne.s32.totalorder %s4404_s26, %s2697_s18  ;;  %p2703_p11 = scmp.lt.s32.totalorder %s4418_s25, %s2697_s18 }
  0x8d   : > { %p2704_p12 = por %p2703_p11, %p2702_p10 }
  0x8f   : > { %p2705_p3 = pnand %p2704_p12, %p2698_p9 }
  0x91   : > { %2708 = shalt.err (!%p2705_p3)  }
  0x92   : > { %277 = dma.hbm_to_vmem [thread:$0]  %s265_s15, 16, %s4404_s26, [#allocation3] }
  0x93   : > { %s4184_s8 = smov [#allocation2 + $0x3]   ;;  %s294_s17 = sadd.s32 4, %s4387_s9 }
  0x94   : > { %s290_s12 = sshll.u32 %s4184_s8, 4  ;;  %s2318_s6 = sshll.u32 %s4425_s23, 4  ;;  %s291_s12 = int_to_ptr.vmem [resolvable:$true] %s290_s12 }
  0x95   : > { %s281_s20 = scalar_lea.hbm %s5599_s1, %s2318_s6  ;;  %s295_s7 = sld [smem:[#allocation5 + %s294_s17]] }
  0x96   : > { %s2709_s21 = scalar_lea.hbm %s281_s20, 16  ;;  %p2712_p2 = scmp.lt.s32.totalorder %s281_s20, %s5599_s1 }
  0x97   : > { %p2710_p13 = scmp.ne.s32.totalorder %s281_s20, %s2709_s21  ;;  %p2713_p5 = scmp.lt.s32.totalorder %s4409_s16, %s2709_s21 }
  0x99   : > { %p2714_p4 = por %p2713_p5, %p2712_p2 }
  0x9b   : > { %p2715_p6 = pnand %p2714_p4, %p2710_p13 }
  0x9d   : > { %2718 = shalt.err (!%p2715_p6)  }
  0x9e   : > { %s2719_s26 = scalar_lea.vmem %s291_s12, 16  ;;  %p2724_p7 = scmp.lt.s32.totalorder %s291_s12, %s4390_s28 }
  0x9f   : > { %p2720_p8 = scmp.ne.s32.totalorder %s291_s12, %s2719_s26  ;;  %p2725_p9 = scmp.lt.s32.totalorder %s4418_s25, %s2719_s26 }
  0xa1   : > { %p2726_p10 = por %p2725_p9, %p2724_p7 }
  0xa3   : > { %p2727_p11 = pnand %p2726_p10, %p2720_p8 }
  0xa5   : > { %2730 = shalt.err (!%p2727_p11)  }
  0xa6   : > { %293 = dma.hbm_to_vmem [thread:$0]  %s281_s20, 16, %s291_s12, [#allocation3] }
  0xa7   : > { %s310_s23 = sadd.s32 5, %s4387_s9  ;;  %s4185_s15 = smov [#allocation2 + $0x4]  }
  0xa8   : > { %s306_s18 = sshll.u32 %s4185_s15, 4  ;;  %s311_s8 = sld [smem:[#allocation5 + %s310_s23]]  ;;  %s307_s18 = int_to_ptr.vmem [resolvable:$true] %s306_s18 }
  0xa9   : > { %s4186_s17 = smov [#allocation2 + $0x5]   ;;  %s326_s2 = sadd.s32 6, %s4387_s9 }
  0xaa   : > { %s322_s6 = sshll.u32 %s4186_s17, 4  ;;  %s2319_s13 = sshll.u32 %s295_s7, 4  ;;  %s4467_s6 = int_to_ptr.vmem [resolvable:$true] %s322_s6 }
  0xab   : > { %s297_s11 = scalar_lea.hbm %s5599_s1, %s2319_s13  ;;  %s4472_s26 = sld [smem:[#allocation5 + %s326_s2]] }
  0xac   : > { %s2731_s12 = scalar_lea.hbm %s297_s11, 16  ;;  %p2734_p3 = scmp.lt.s32.totalorder %s297_s11, %s5599_s1 }
  0xad   : > { %p2732_p12 = scmp.ne.s32.totalorder %s297_s11, %s2731_s12  ;;  %p2735_p13 = scmp.lt.s32.totalorder %s4409_s16, %s2731_s12 }
  0xaf   : > { %p2736_p2 = por %p2735_p13, %p2734_p3 }
  0xb1   : > { %p2737_p5 = pnand %p2736_p2, %p2732_p12 }
  0xb3   : > { %2740 = shalt.err (!%p2737_p5)  }
  0xb4   : > { %s2741_s23 = scalar_lea.vmem %s307_s18, 16  ;;  %p2746_p6 = scmp.lt.s32.totalorder %s307_s18, %s4390_s28 }
  0xb5   : > { %p2742_p4 = scmp.ne.s32.totalorder %s307_s18, %s2741_s23  ;;  %p2747_p8 = scmp.lt.s32.totalorder %s4418_s25, %s2741_s23 }
  0xb7   : > { %p2748_p7 = por %p2747_p8, %p2746_p6 }
  0xb9   : > { %p2749_p9 = pnand %p2748_p7, %p2742_p4 }
  0xbb   : > { %2752 = shalt.err (!%p2749_p9)  }
  0xbc   : > { %309 = dma.hbm_to_vmem [thread:$0]  %s297_s11, 16, %s307_s18, [#allocation3] }
  0xbd   : > { %s2320_s7 = sshll.u32 %s311_s8, 4  ;;  %s4187_s2 = smov [#allocation2 + $0x6]  }
  0xbe   : > { %s313_s30 = scalar_lea.hbm %s5599_s1, %s2320_s7  ;;  %s338_s13 = sshll.u32 %s4187_s2, 4  ;;  %s339_s13 = int_to_ptr.vmem [resolvable:$true] %s338_s13 }
  0xbf   : > { %s2753_s21 = scalar_lea.hbm %s313_s30, 16  ;;  %p2756_p11 = scmp.lt.s32.totalorder %s313_s30, %s5599_s1 }
  0xc0   : > { %p2754_p10 = scmp.ne.s32.totalorder %s313_s30, %s2753_s21  ;;  %p2757_p12 = scmp.lt.s32.totalorder %s4409_s16, %s2753_s21 }
  0xc2   : > { %p2758_p3 = por %p2757_p12, %p2756_p11 }
  0xc4   : > { %p2759_p13 = pnand %p2758_p3, %p2754_p10 }
  0xc6   : > { %2762 = shalt.err (!%p2759_p13)  }
  0xc7   : > { %s2763_s18 = scalar_lea.vmem %s4467_s6, 16  ;;  %p2768_p5 = scmp.lt.s32.totalorder %s4467_s6, %s4390_s28 }
  0xc8   : > { %p2764_p2 = scmp.ne.s32.totalorder %s4467_s6, %s2763_s18  ;;  %p2769_p4 = scmp.lt.s32.totalorder %s4418_s25, %s2763_s18 }
  0xca   : > { %p2770_p6 = por %p2769_p4, %p2768_p5 }
  0xcc   : > { %p2771_p8 = pnand %p2770_p6, %p2764_p2 }
  0xce   : > { %2774 = shalt.err (!%p2771_p8)  }
  0xcf   : > { %325 = dma.hbm_to_vmem [thread:$0]  %s313_s30, 16, %s4467_s6, [#allocation3] }
  0xd0   : > { %s342_s8 = sadd.s32 7, %s4387_s9  ;;  %s2321_s11 = sshll.u32 %s4472_s26, 4 }
  0xd1   : > { %s343_s20 = sld [smem:[#allocation5 + %s342_s8]]  ;;  %s329_s15 = scalar_lea.hbm %s5599_s1, %s2321_s11 }
  0xd2   : > { %s2775_s17 = scalar_lea.hbm %s329_s15, 16  ;;  %p2778_p9 = scmp.lt.s32.totalorder %s329_s15, %s5599_s1 }
  0xd3   : > { %p2776_p7 = scmp.ne.s32.totalorder %s329_s15, %s2775_s17  ;;  %p2779_p10 = scmp.lt.s32.totalorder %s4409_s16, %s2775_s17 }
  0xd5   : > { %p2780_p11 = por %p2779_p10, %p2778_p9 }
  0xd7   : > { %p2781_p12 = pnand %p2780_p11, %p2776_p7 }
  0xd9   : > { %2784 = shalt.err (!%p2781_p12)  }
  0xda   : > { %s2785_s24 = scalar_lea.vmem %s339_s13, 16  ;;  %p2790_p13 = scmp.lt.s32.totalorder %s339_s13, %s4390_s28 }
  0xdb   : > { %p2786_p3 = scmp.ne.s32.totalorder %s339_s13, %s2785_s24  ;;  %p2791_p2 = scmp.lt.s32.totalorder %s4418_s25, %s2785_s24 }
  0xdd   : > { %p2792_p5 = por %p2791_p2, %p2790_p13 }
  0xdf   : > { %p2793_p4 = pnand %p2792_p5, %p2786_p3 }
  0xe1   : > { %2796 = shalt.err (!%p2793_p4)  }
  0xe2   : > { %341 = dma.hbm_to_vmem [thread:$0]  %s329_s15, 16, %s339_s13, [#allocation3] }
  0xe3   : > { %s4188_s6 = smov [#allocation2 + $0x7]   ;;  %s358_s30 = sadd.s32 8, %s4387_s9 }
  0xe4   : > { %s354_s26 = sshll.u32 %s4188_s6, 4  ;;  %s359_s12 = sld [smem:[#allocation5 + %s358_s30]]  ;;  %s355_s26 = int_to_ptr.vmem [resolvable:$true] %s354_s26 }
  0xe5   : > { %s374_s18 = sadd.s32 9, %s4387_s9  ;;  %s2322_s8 = sshll.u32 %s343_s20, 4 }
  0xe6   : > { %s4189_s11 = smov [#allocation2 + $0x8]   ;;  %s345_s2 = scalar_lea.hbm %s5599_s1, %s2322_s8 }
  0xe7   : > { %s370_s23 = sshll.u32 %s4189_s11, 4  ;;  %s2797_s21 = scalar_lea.hbm %s345_s2, 16  ;;  %s4509_s23 = int_to_ptr.vmem [resolvable:$true] %s370_s23 }
  0xe8   : > { %p2798_p6 = scmp.ne.s32.totalorder %s345_s2, %s2797_s21  ;;  %p2800_p8 = scmp.lt.s32.totalorder %s345_s2, %s5599_s1 }
  0xe9   : > { %p2801_p7 = scmp.lt.s32.totalorder %s4409_s16, %s2797_s21 }
  0xeb   : > { %p2802_p9 = por %p2801_p7, %p2800_p8 }
  0xed   : > { %p2803_p10 = pnand %p2802_p9, %p2798_p6 }
  0xef   : > { %2806 = shalt.err (!%p2803_p10)  }
  0xf0   : > { %s2807_s24 = scalar_lea.vmem %s355_s26, 16  ;;  %p2812_p12 = scmp.lt.s32.totalorder %s355_s26, %s4390_s28 }
  0xf1   : > { %p2808_p11 = scmp.ne.s32.totalorder %s355_s26, %s2807_s24  ;;  %p2813_p3 = scmp.lt.s32.totalorder %s4418_s25, %s2807_s24 }
  0xf3   : > { %p2814_p13 = por %p2813_p3, %p2812_p12 }
  0xf5   : > { %p2815_p2 = pnand %p2814_p13, %p2808_p11 }
  0xf7   : > { %2818 = shalt.err (!%p2815_p2)  }
  0xf8   : > { %357 = dma.hbm_to_vmem [thread:$0]  %s345_s2, 16, %s355_s26, [#allocation3] }
  0xf9   : > { %s375_s20 = sld [smem:[#allocation5 + %s374_s18]]  ;;  %s2323_s6 = sshll.u32 %s359_s12, 4 }
  0xfa   : > { %s4190_s30 = smov [#allocation2 + $0x9]   ;;  %s361_s17 = scalar_lea.hbm %s5599_s1, %s2323_s6 }
  0xfb   : > { %s386_s8 = sshll.u32 %s4190_s30, 4  ;;  %s2819_s21 = scalar_lea.hbm %s361_s17, 16  ;;  %s4520_s8 = int_to_ptr.vmem [resolvable:$true] %s386_s8 }
  0xfc   : > { %p2820_p5 = scmp.ne.s32.totalorder %s361_s17, %s2819_s21  ;;  %p2822_p4 = scmp.lt.s32.totalorder %s361_s17, %s5599_s1 }
  0xfd   : > { %p2823_p6 = scmp.lt.s32.totalorder %s4409_s16, %s2819_s21 }
  0xff   : > { %p2824_p8 = por %p2823_p6, %p2822_p4 }
 0x101   : > { %p2825_p7 = pnand %p2824_p8, %p2820_p5 }
 0x103   : > { %2828 = shalt.err (!%p2825_p7)  }
 0x104   : > { %s2829_s26 = scalar_lea.vmem %s4509_s23, 16  ;;  %p2834_p10 = scmp.lt.s32.totalorder %s4509_s23, %s4390_s28 }
 0x105   : > { %p2830_p9 = scmp.ne.s32.totalorder %s4509_s23, %s2829_s26  ;;  %p2835_p11 = scmp.lt.s32.totalorder %s4418_s25, %s2829_s26 }
 0x107   : > { %p2836_p12 = por %p2835_p11, %p2834_p10 }
 0x109   : > { %p2837_p3 = pnand %p2836_p12, %p2830_p9 }
 0x10b   : > { %2840 = shalt.err (!%p2837_p3)  }
 0x10c   : > { %373 = dma.hbm_to_vmem [thread:$0]  %s361_s17, 16, %s4509_s23, [#allocation3] }
 0x10d   : > { %s390_s12 = sadd.s32 10, %s4387_s9  ;;  %s4191_s2 = smov [#allocation2 + $0xa]  }
 0x10e   : > { %s4533_s18 = sld [smem:[#allocation5 + %s390_s12]]  ;;  %s402_s24 = sshll.u32 %s4191_s2, 4  ;;  %s4535_s24 = int_to_ptr.vmem [resolvable:$true] %s402_s24 }
 0x10f   : > { %s2324_s6 = sshll.u32 %s375_s20, 4  ;;  %s406_s21 = sadd.s32 11, %s4387_s9 }
 0x110   : > { %s377_s7 = scalar_lea.hbm %s5599_s1, %s2324_s6 }
 0x111   : > { %s2841_s13 = scalar_lea.hbm %s377_s7, 16  ;;  %p2844_p2 = scmp.lt.s32.totalorder %s377_s7, %s5599_s1 }
 0x112   : > { %p2842_p13 = scmp.ne.s32.totalorder %s377_s7, %s2841_s13  ;;  %p2845_p5 = scmp.lt.s32.totalorder %s4409_s16, %s2841_s13 }
 0x114   : > { %p2846_p4 = por %p2845_p5, %p2844_p2 }
 0x116   : > { %p2847_p6 = pnand %p2846_p4, %p2842_p13 }
 0x118   : > { %2850 = shalt.err (!%p2847_p6)  }
 0x119   : > { %s2851_s23 = scalar_lea.vmem %s4520_s8, 16  ;;  %p2856_p7 = scmp.lt.s32.totalorder %s4520_s8, %s4390_s28 }
 0x11a   : > { %p2852_p8 = scmp.ne.s32.totalorder %s4520_s8, %s2851_s23  ;;  %p2857_p9 = scmp.lt.s32.totalorder %s4418_s25, %s2851_s23 }
 0x11c   : > { %p2858_p10 = por %p2857_p9, %p2856_p7 }
 0x11e   : > { %p2859_p11 = pnand %p2858_p10, %p2852_p8 }
 0x120   : > { %2862 = shalt.err (!%p2859_p11)  }
 0x121   : > { %389 = dma.hbm_to_vmem [thread:$0]  %s377_s7, 16, %s4520_s8, [#allocation3] }
 0x122   : > { %s407_s20 = sld [smem:[#allocation5 + %s406_s21]]  ;;  %s4192_s17 = smov [#allocation2 + $0xb]  }
 0x123   : > { %s418_s12 = sshll.u32 %s4192_s17, 4  ;;  %s422_s2 = sadd.s32 12, %s4387_s9  ;;  %s4553_s12 = int_to_ptr.vmem [resolvable:$true] %s418_s12 }
 0x124   : > { %s2325_s6 = sshll.u32 %s4533_s18, 4  ;;  %s4558_s15 = sld [smem:[#allocation5 + %s422_s2]] }
 0x125   : > { %s393_s13 = scalar_lea.hbm %s5599_s1, %s2325_s6 }
 0x126   : > { %s2863_s26 = scalar_lea.hbm %s393_s13, 16  ;;  %p2866_p3 = scmp.lt.s32.totalorder %s393_s13, %s5599_s1 }
 0x127   : > { %p2864_p12 = scmp.ne.s32.totalorder %s393_s13, %s2863_s26  ;;  %p2867_p13 = scmp.lt.s32.totalorder %s4409_s16, %s2863_s26 }
 0x129   : > { %p2868_p2 = por %p2867_p13, %p2866_p3 }
 0x12b   : > { %p2869_p5 = pnand %p2868_p2, %p2864_p12 }
 0x12d   : > { %2872 = shalt.err (!%p2869_p5)  }
 0x12e   : > { %s2873_s8 = scalar_lea.vmem %s4535_s24, 16  ;;  %p2878_p6 = scmp.lt.s32.totalorder %s4535_s24, %s4390_s28 }
 0x12f   : > { %p2874_p4 = scmp.ne.s32.totalorder %s4535_s24, %s2873_s8  ;;  %p2879_p8 = scmp.lt.s32.totalorder %s4418_s25, %s2873_s8 }
 0x131   : > { %p2880_p7 = por %p2879_p8, %p2878_p6 }
 0x133   : > { %p2881_p9 = pnand %p2880_p7, %p2874_p4 }
 0x135   : > { %2884 = shalt.err (!%p2881_p9)  }
 0x136   : > { %405 = dma.hbm_to_vmem [thread:$0]  %s393_s13, 16, %s4535_s24, [#allocation3] }
 0x137   : > { %s438_s5 = sadd.s32 13, %s4387_s9  ;;  %s2326_s18 = sshll.u32 %s407_s20, 4 }
 0x138   : > { %s4193_s7 = smov [#allocation2 + $0xc]   ;;  %s409_s6 = scalar_lea.hbm %s5599_s1, %s2326_s18 }
 0x139   : > { %s434_s21 = sshll.u32 %s4193_s7, 4  ;;  %s2885_s30 = scalar_lea.hbm %s409_s6, 16  ;;  %s4574_s21 = int_to_ptr.vmem [resolvable:$true] %s434_s21 }
 0x13a   : > { %p2886_p10 = scmp.ne.s32.totalorder %s409_s6, %s2885_s30  ;;  %p2888_p11 = scmp.lt.s32.totalorder %s409_s6, %s5599_s1 }
 0x13b   : > { %p2889_p12 = scmp.lt.s32.totalorder %s4409_s16, %s2885_s30 }
 0x13d   : > { %p2890_p3 = por %p2889_p12, %p2888_p11 }
 0x13f   : > { %p2891_p13 = pnand %p2890_p3, %p2886_p10 }
 0x141   : > { %2894 = shalt.err (!%p2891_p13)  }
 0x142   : > { %s2895_s24 = scalar_lea.vmem %s4553_s12, 16  ;;  %p2900_p5 = scmp.lt.s32.totalorder %s4553_s12, %s4390_s28 }
 0x143   : > { %p2896_p2 = scmp.ne.s32.totalorder %s4553_s12, %s2895_s24  ;;  %p2901_p4 = scmp.lt.s32.totalorder %s4418_s25, %s2895_s24 }
 0x145   : > { %p2902_p6 = por %p2901_p4, %p2900_p5 }
 0x147   : > { %p2903_p8 = pnand %p2902_p6, %p2896_p2 }
 0x149   : > { %2906 = shalt.err (!%p2903_p8)  }
 0x14a   : > { %421 = dma.hbm_to_vmem [thread:$0]  %s409_s6, 16, %s4553_s12, [#allocation3] }
 0x14b   : > { %s2327_s20 = sshll.u32 %s4558_s15, 4  ;;  %s439_s13 = sld [smem:[#allocation5 + %s438_s5]] }
 0x14c   : > { %s425_s18 = scalar_lea.hbm %s5599_s1, %s2327_s20 }
 0x14d   : > { %s2907_s7 = scalar_lea.hbm %s425_s18, 16  ;;  %p2910_p9 = scmp.lt.s32.totalorder %s425_s18, %s5599_s1 }
 0x14e   : > { %p2908_p7 = scmp.ne.s32.totalorder %s425_s18, %s2907_s7  ;;  %p2911_p10 = scmp.lt.s32.totalorder %s4409_s16, %s2907_s7 }
 0x150   : > { %p2912_p11 = por %p2911_p10, %p2910_p9 }
 0x152   : > { %p2913_p12 = pnand %p2912_p11, %p2908_p7 }
 0x154   : > { %2916 = shalt.err (!%p2913_p12)  }
 0x155   : > { %s2917_s12 = scalar_lea.vmem %s4574_s21, 16  ;;  %p2922_p13 = scmp.lt.s32.totalorder %s4574_s21, %s4390_s28 }
 0x156   : > { %p2918_p3 = scmp.ne.s32.totalorder %s4574_s21, %s2917_s12  ;;  %p2923_p2 = scmp.lt.s32.totalorder %s4418_s25, %s2917_s12 }
 0x158   : > { %p2924_p5 = por %p2923_p2, %p2922_p13 }
 0x15a   : > { %p2925_p4 = pnand %p2924_p5, %p2918_p3 }
 0x15c   : > { %2928 = shalt.err (!%p2925_p4)  }
 0x15d   : > { %437 = dma.hbm_to_vmem [thread:$0]  %s425_s18, 16, %s4574_s21, [#allocation3] }
 0x15e   : > { %s4194_s15 = smov [#allocation2 + $0xd]   ;;  %s454_s6 = sadd.s32 14, %s4387_s9 }
 0x15f   : > { %s450_s5 = sshll.u32 %s4194_s15, 4  ;;  %s455_s30 = sld [smem:[#allocation5 + %s454_s6]]  ;;  %s451_s5 = int_to_ptr.vmem [resolvable:$true] %s450_s5 }
 0x160   : > { %s470_s11 = sadd.s32 15, %s4387_s9  ;;  %s2328_s26 = sshll.u32 %s439_s13, 4 }
 0x161   : > { %s4195_s24 = smov [#allocation2 + $0xe]   ;;  %s441_s7 = scalar_lea.hbm %s5599_s1, %s2328_s26 }
 0x162   : > { %s466_s20 = sshll.u32 %s4195_s24, 4  ;;  %s2929_s17 = scalar_lea.hbm %s441_s7, 16  ;;  %s4605_s20 = int_to_ptr.vmem [resolvable:$true] %s466_s20 }
 0x163   : > { %p2930_p6 = scmp.ne.s32.totalorder %s441_s7, %s2929_s17  ;;  %p2932_p8 = scmp.lt.s32.totalorder %s441_s7, %s5599_s1 }
 0x164   : > { %p2933_p7 = scmp.lt.s32.totalorder %s4409_s16, %s2929_s17 }
 0x166   : > { %p2934_p9 = por %p2933_p7, %p2932_p8 }
 0x168   : > { %p2935_p10 = pnand %p2934_p9, %p2930_p6 }
 0x16a   : > { %2938 = shalt.err (!%p2935_p10)  }
 0x16b   : > { %s2939_s21 = scalar_lea.vmem %s451_s5, 16  ;;  %p2944_p12 = scmp.lt.s32.totalorder %s451_s5, %s4390_s28 }
 0x16c   : > { %p2940_p11 = scmp.ne.s32.totalorder %s451_s5, %s2939_s21  ;;  %p2945_p3 = scmp.lt.s32.totalorder %s4418_s25, %s2939_s21 }
 0x16e   : > { %p2946_p13 = por %p2945_p3, %p2944_p12 }
 0x170   : > { %p2947_p2 = pnand %p2946_p13, %p2940_p11 }
 0x172   : > { %2950 = shalt.err (!%p2947_p2)  }
 0x173   : > { %453 = dma.hbm_to_vmem [thread:$0]  %s441_s7, 16, %s451_s5, [#allocation3] }
 0x174   : > { %s471_s13 = sld [smem:[#allocation5 + %s470_s11]]  ;;  %s2329_s18 = sshll.u32 %s455_s30, 4 }
 0x175   : > { %s4196_s15 = smov [#allocation2 + $0xf]   ;;  %s457_s23 = scalar_lea.hbm %s5599_s1, %s2329_s18 }
 0x176   : > { %s482_s6 = sshll.u32 %s4196_s15, 4  ;;  %s2951_s8 = scalar_lea.hbm %s457_s23, 16  ;;  %s4616_s6 = int_to_ptr.vmem [resolvable:$true] %s482_s6 }
 0x177   : > { %p2952_p5 = scmp.ne.s32.totalorder %s457_s23, %s2951_s8  ;;  %p2954_p4 = scmp.lt.s32.totalorder %s457_s23, %s5599_s1 }
 0x178   : > { %p2955_p6 = scmp.lt.s32.totalorder %s4409_s16, %s2951_s8 }
 0x17a   : > { %p2956_p8 = por %p2955_p6, %p2954_p4 }
 0x17c   : > { %p2957_p7 = pnand %p2956_p8, %p2952_p5 }
 0x17e   : > { %2960 = shalt.err (!%p2957_p7)  }
 0x17f   : > { %s2961_s5 = scalar_lea.vmem %s4605_s20, 16  ;;  %p2966_p10 = scmp.lt.s32.totalorder %s4605_s20, %s4390_s28 }
 0x180   : > { %p2962_p9 = scmp.ne.s32.totalorder %s4605_s20, %s2961_s5  ;;  %p2967_p11 = scmp.lt.s32.totalorder %s4418_s25, %s2961_s5 }
 0x182   : > { %p2968_p12 = por %p2967_p11, %p2966_p10 }
 0x184   : > { %p2969_p3 = pnand %p2968_p12, %p2962_p9 }
 0x186   : > { %2972 = shalt.err (!%p2969_p3)  }
 0x187   : > { %469 = dma.hbm_to_vmem [thread:$0]  %s457_s23, 16, %s4605_s20, [#allocation3] }
 0x188   : > { %s486_s30 = sadd.s32 16, %s4387_s9  ;;  %s4197_s7 = smov [#allocation2 + $0x10]  }
 0x189   : > { %s4629_s11 = sld [smem:[#allocation5 + %s486_s30]]  ;;  %s498_s12 = sshll.u32 %s4197_s7, 4  ;;  %s4631_s12 = int_to_ptr.vmem [resolvable:$true] %s498_s12 }
 0x18a   : > { %s2330_s21 = sshll.u32 %s471_s13, 4  ;;  %s502_s24 = sadd.s32 17, %s4387_s9 }
 0x18b   : > { %s473_s26 = scalar_lea.hbm %s5599_s1, %s2330_s21 }
 0x18c   : > { %s2973_s8 = scalar_lea.hbm %s473_s26, 16  ;;  %p2976_p2 = scmp.lt.s32.totalorder %s473_s26, %s5599_s1 }
 0x18d   : > { %p2974_p13 = scmp.ne.s32.totalorder %s473_s26, %s2973_s8  ;;  %p2977_p5 = scmp.lt.s32.totalorder %s4409_s16, %s2973_s8 }
 0x18f   : > { %p2978_p4 = por %p2977_p5, %p2976_p2 }
 0x191   : > { %p2979_p6 = pnand %p2978_p4, %p2974_p13 }
 0x193   : > { %2982 = shalt.err (!%p2979_p6)  }
 0x194   : > { %s2983_s20 = scalar_lea.vmem %s4616_s6, 16  ;;  %p2988_p7 = scmp.lt.s32.totalorder %s4616_s6, %s4390_s28 }
 0x195   : > { %p2984_p8 = scmp.ne.s32.totalorder %s4616_s6, %s2983_s20  ;;  %p2989_p9 = scmp.lt.s32.totalorder %s4418_s25, %s2983_s20 }
 0x197   : > { %p2990_p10 = por %p2989_p9, %p2988_p7 }
 0x199   : > { %p2991_p11 = pnand %p2990_p10, %p2984_p8 }
 0x19b   : > { %2994 = shalt.err (!%p2991_p11)  }
 0x19c   : > { %485 = dma.hbm_to_vmem [thread:$0]  %s473_s26, 16, %s4616_s6, [#allocation3] }
 0x19d   : > { %s503_s13 = sld [smem:[#allocation5 + %s502_s24]]  ;;  %s4198_s23 = smov [#allocation2 + $0x11]  }
 0x19e   : > { %s514_s5 = sshll.u32 %s4198_s23, 4  ;;  %s518_s30 = sadd.s32 18, %s4387_s9  ;;  %s4649_s5 = int_to_ptr.vmem [resolvable:$true] %s514_s5 }
 0x19f   : > { %s2331_s7 = sshll.u32 %s4629_s11, 4  ;;  %s4654_s8 = sld [smem:[#allocation5 + %s518_s30]] }
 0x1a0   : > { %s489_s15 = scalar_lea.hbm %s5599_s1, %s2331_s7 }
 0x1a1   : > { %s2995_s17 = scalar_lea.hbm %s489_s15, 16  ;;  %p2998_p3 = scmp.lt.s32.totalorder %s489_s15, %s5599_s1 }
 0x1a2   : > { %p2996_p12 = scmp.ne.s32.totalorder %s489_s15, %s2995_s17  ;;  %p2999_p13 = scmp.lt.s32.totalorder %s4409_s16, %s2995_s17 }
 0x1a4   : > { %p3000_p2 = por %p2999_p13, %p2998_p3 }
 0x1a6   : > { %p3001_p5 = pnand %p3000_p2, %p2996_p12 }
 0x1a8   : > { %3004 = shalt.err (!%p3001_p5)  }
 0x1a9   : > { %s3005_s6 = scalar_lea.vmem %s4631_s12, 16  ;;  %p3010_p6 = scmp.lt.s32.totalorder %s4631_s12, %s4390_s28 }
 0x1aa   : > { %p3006_p4 = scmp.ne.s32.totalorder %s4631_s12, %s3005_s6  ;;  %p3011_p8 = scmp.lt.s32.totalorder %s4418_s25, %s3005_s6 }
 0x1ac   : > { %p3012_p7 = por %p3011_p8, %p3010_p6 }
 0x1ae   : > { %p3013_p9 = pnand %p3012_p7, %p3006_p4 }
 0x1b0   : > { %3016 = shalt.err (!%p3013_p9)  }
 0x1b1   : > { %501 = dma.hbm_to_vmem [thread:$0]  %s489_s15, 16, %s4631_s12, [#allocation3] }
 0x1b2   : > { %s534_s11 = sadd.s32 19, %s4387_s9  ;;  %s2332_s26 = sshll.u32 %s503_s13, 4 }
 0x1b3   : > { %s4199_s24 = smov [#allocation2 + $0x12]   ;;  %s505_s21 = scalar_lea.hbm %s5599_s1, %s2332_s26 }
 0x1b4   : > { %s530_s23 = sshll.u32 %s4199_s24, 4  ;;  %s3017_s18 = scalar_lea.hbm %s505_s21, 16  ;;  %s4670_s23 = int_to_ptr.vmem [resolvable:$true] %s530_s23 }
 0x1b5   : > { %p3018_p10 = scmp.ne.s32.totalorder %s505_s21, %s3017_s18  ;;  %p3020_p11 = scmp.lt.s32.totalorder %s505_s21, %s5599_s1 }
 0x1b6   : > { %p3021_p12 = scmp.lt.s32.totalorder %s4409_s16, %s3017_s18 }
 0x1b8   : > { %p3022_p3 = por %p3021_p12, %p3020_p11 }
 0x1ba   : > { %p3023_p13 = pnand %p3022_p3, %p3018_p10 }
 0x1bc   : > { %3026 = shalt.err (!%p3023_p13)  }
 0x1bd   : > { %s3027_s12 = scalar_lea.vmem %s4649_s5, 16  ;;  %p3032_p5 = scmp.lt.s32.totalorder %s4649_s5, %s4390_s28 }
 0x1be   : > { %p3028_p2 = scmp.ne.s32.totalorder %s4649_s5, %s3027_s12  ;;  %p3033_p4 = scmp.lt.s32.totalorder %s4418_s25, %s3027_s12 }
 0x1c0   : > { %p3034_p6 = por %p3033_p4, %p3032_p5 }
 0x1c2   : > { %p3035_p8 = pnand %p3034_p6, %p3028_p2 }
 0x1c4   : > { %3038 = shalt.err (!%p3035_p8)  }
 0x1c5   : > { %517 = dma.hbm_to_vmem [thread:$0]  %s505_s21, 16, %s4649_s5, [#allocation3] }
 0x1c6   : > { %s2333_s13 = sshll.u32 %s4654_s8, 4  ;;  %s535_s15 = sld [smem:[#allocation5 + %s534_s11]] }
 0x1c7   : > { %s521_s26 = scalar_lea.hbm %s5599_s1, %s2333_s13 }
 0x1c8   : > { %s3039_s24 = scalar_lea.hbm %s521_s26, 16  ;;  %p3042_p9 = scmp.lt.s32.totalorder %s521_s26, %s5599_s1 }
 0x1c9   : > { %p3040_p7 = scmp.ne.s32.totalorder %s521_s26, %s3039_s24  ;;  %p3043_p10 = scmp.lt.s32.totalorder %s4409_s16, %s3039_s24 }
 0x1cb   : > { %p3044_p11 = por %p3043_p10, %p3042_p9 }
 0x1cd   : > { %p3045_p12 = pnand %p3044_p11, %p3040_p7 }
 0x1cf   : > { %3048 = shalt.err (!%p3045_p12)  }
 0x1d0   : > { %s3049_s5 = scalar_lea.vmem %s4670_s23, 16  ;;  %p3054_p13 = scmp.lt.s32.totalorder %s4670_s23, %s4390_s28 }
 0x1d1   : > { %p3050_p3 = scmp.ne.s32.totalorder %s4670_s23, %s3049_s5  ;;  %p3055_p2 = scmp.lt.s32.totalorder %s4418_s25, %s3049_s5 }
 0x1d3   : > { %p3056_p5 = por %p3055_p2, %p3054_p13 }
 0x1d5   : > { %p3057_p4 = pnand %p3056_p5, %p3050_p3 }
 0x1d7   : > { %3060 = shalt.err (!%p3057_p4)  }
 0x1d8   : > { %533 = dma.hbm_to_vmem [thread:$0]  %s521_s26, 16, %s4670_s23, [#allocation3] }
 0x1d9   : > { %s4200_s8 = smov [#allocation2 + $0x13]   ;;  %s550_s21 = sadd.s32 20, %s4387_s9 }
 0x1da   : > { %s546_s11 = sshll.u32 %s4200_s8, 4  ;;  %s551_s18 = sld [smem:[#allocation5 + %s550_s21]]  ;;  %s547_s11 = int_to_ptr.vmem [resolvable:$true] %s546_s11 }
 0x1db   : > { %s566_s17 = sadd.s32 21, %s4387_s9  ;;  %s2334_s2 = sshll.u32 %s535_s15, 4 }
 0x1dc   : > { %s4201_s12 = smov [#allocation2 + $0x14]   ;;  %s537_s24 = scalar_lea.hbm %s5599_s1, %s2334_s2 }
 0x1dd   : > { %s562_s13 = sshll.u32 %s4201_s12, 4  ;;  %s3061_s30 = scalar_lea.hbm %s537_s24, 16  ;;  %s4701_s13 = int_to_ptr.vmem [resolvable:$true] %s562_s13 }
 0x1de   : > { %p3062_p6 = scmp.ne.s32.totalorder %s537_s24, %s3061_s30  ;;  %p3064_p8 = scmp.lt.s32.totalorder %s537_s24, %s5599_s1 }
 0x1df   : > { %p3065_p7 = scmp.lt.s32.totalorder %s4409_s16, %s3061_s30 }
 0x1e1   : > { %p3066_p9 = por %p3065_p7, %p3064_p8 }
 0x1e3   : > { %p3067_p10 = pnand %p3066_p9, %p3062_p6 }
 0x1e5   : > { %3070 = shalt.err (!%p3067_p10)  }
 0x1e6   : > { %s3071_s23 = scalar_lea.vmem %s547_s11, 16  ;;  %p3076_p12 = scmp.lt.s32.totalorder %s547_s11, %s4390_s28 }
 0x1e7   : > { %p3072_p11 = scmp.ne.s32.totalorder %s547_s11, %s3071_s23  ;;  %p3077_p3 = scmp.lt.s32.totalorder %s4418_s25, %s3071_s23 }
 0x1e9   : > { %p3078_p13 = por %p3077_p3, %p3076_p12 }
 0x1eb   : > { %p3079_p2 = pnand %p3078_p13, %p3072_p11 }
 0x1ed   : > { %3082 = shalt.err (!%p3079_p2)  }
 0x1ee   : > { %549 = dma.hbm_to_vmem [thread:$0]  %s537_s24, 16, %s547_s11, [#allocation3] }
 0x1ef   : > { %s567_s15 = sld [smem:[#allocation5 + %s566_s17]]  ;;  %s2335_s26 = sshll.u32 %s551_s18, 4 }
 0x1f0   : > { %s4202_s8 = smov [#allocation2 + $0x15]   ;;  %s553_s20 = scalar_lea.hbm %s5599_s1, %s2335_s26 }
 0x1f1   : > { %s578_s21 = sshll.u32 %s4202_s8, 4  ;;  %s3083_s6 = scalar_lea.hbm %s553_s20, 16  ;;  %s4712_s21 = int_to_ptr.vmem [resolvable:$true] %s578_s21 }
 0x1f2   : > { %p3084_p5 = scmp.ne.s32.totalorder %s553_s20, %s3083_s6  ;;  %p3086_p4 = scmp.lt.s32.totalorder %s553_s20, %s5599_s1 }
 0x1f3   : > { %p3087_p6 = scmp.lt.s32.totalorder %s4409_s16, %s3083_s6 }
 0x1f5   : > { %p3088_p8 = por %p3087_p6, %p3086_p4 }
 0x1f7   : > { %p3089_p7 = pnand %p3088_p8, %p3084_p5 }
 0x1f9   : > { %3092 = shalt.err (!%p3089_p7)  }
 0x1fa   : > { %s3093_s11 = scalar_lea.vmem %s4701_s13, 16  ;;  %p3098_p10 = scmp.lt.s32.totalorder %s4701_s13, %s4390_s28 }
 0x1fb   : > { %p3094_p9 = scmp.ne.s32.totalorder %s4701_s13, %s3093_s11  ;;  %p3099_p11 = scmp.lt.s32.totalorder %s4418_s25, %s3093_s11 }
 0x1fd   : > { %p3100_p12 = por %p3099_p11, %p3098_p10 }
 0x1ff   : > { %p3101_p3 = pnand %p3100_p12, %p3094_p9 }
 0x201   : > { %3104 = shalt.err (!%p3101_p3)  }
 0x202   : > { %565 = dma.hbm_to_vmem [thread:$0]  %s553_s20, 16, %s4701_s13, [#allocation3] }
 0x203   : > { %s582_s18 = sadd.s32 22, %s4387_s9  ;;  %s4203_s24 = smov [#allocation2 + $0x16]  }
 0x204   : > { %s4725_s17 = sld [smem:[#allocation5 + %s582_s18]]  ;;  %s594_s5 = sshll.u32 %s4203_s24, 4  ;;  %s4727_s5 = int_to_ptr.vmem [resolvable:$true] %s594_s5 }
 0x205   : > { %s2336_s23 = sshll.u32 %s567_s15, 4  ;;  %s598_s12 = sadd.s32 23, %s4387_s9 }
 0x206   : > { %s569_s2 = scalar_lea.hbm %s5599_s1, %s2336_s23 }
 0x207   : > { %s3105_s6 = scalar_lea.hbm %s569_s2, 16  ;;  %p3108_p2 = scmp.lt.s32.totalorder %s569_s2, %s5599_s1 }
 0x208   : > { %p3106_p13 = scmp.ne.s32.totalorder %s569_s2, %s3105_s6  ;;  %p3109_p5 = scmp.lt.s32.totalorder %s4409_s16, %s3105_s6 }
 0x20a   : > { %p3110_p4 = por %p3109_p5, %p3108_p2 }
 0x20c   : > { %p3111_p6 = pnand %p3110_p4, %p3106_p13 }
 0x20e   : > { %3114 = shalt.err (!%p3111_p6)  }
 0x20f   : > { %s3115_s13 = scalar_lea.vmem %s4712_s21, 16  ;;  %p3120_p7 = scmp.lt.s32.totalorder %s4712_s21, %s4390_s28 }
 0x210   : > { %p3116_p8 = scmp.ne.s32.totalorder %s4712_s21, %s3115_s13  ;;  %p3121_p9 = scmp.lt.s32.totalorder %s4418_s25, %s3115_s13 }
 0x212   : > { %p3122_p10 = por %p3121_p9, %p3120_p7 }
 0x214   : > { %p3123_p11 = pnand %p3122_p10, %p3116_p8 }
 0x216   : > { %3126 = shalt.err (!%p3123_p11)  }
 0x217   : > { %581 = dma.hbm_to_vmem [thread:$0]  %s569_s2, 16, %s4712_s21, [#allocation3] }
 0x218   : > { %s599_s15 = sld [smem:[#allocation5 + %s598_s12]]  ;;  %s4204_s20 = smov [#allocation2 + $0x17]  }
 0x219   : > { %s610_s11 = sshll.u32 %s4204_s20, 4  ;;  %s614_s18 = sadd.s32 24, %s4387_s9  ;;  %s4745_s11 = int_to_ptr.vmem [resolvable:$true] %s610_s11 }
 0x21a   : > { %s2337_s24 = sshll.u32 %s4725_s17, 4  ;;  %s4750_s6 = sld [smem:[#allocation5 + %s614_s18]] }
 0x21b   : > { %s585_s8 = scalar_lea.hbm %s5599_s1, %s2337_s24 }
 0x21c   : > { %s3127_s30 = scalar_lea.hbm %s585_s8, 16  ;;  %p3130_p3 = scmp.lt.s32.totalorder %s585_s8, %s5599_s1 }
 0x21d   : > { %p3128_p12 = scmp.ne.s32.totalorder %s585_s8, %s3127_s30  ;;  %p3131_p13 = scmp.lt.s32.totalorder %s4409_s16, %s3127_s30 }
 0x21f   : > { %p3132_p2 = por %p3131_p13, %p3130_p3 }
 0x221   : > { %p3133_p5 = pnand %p3132_p2, %p3128_p12 }
 0x223   : > { %3136 = shalt.err (!%p3133_p5)  }
 0x224   : > { %s3137_s21 = scalar_lea.vmem %s4727_s5, 16  ;;  %p3142_p6 = scmp.lt.s32.totalorder %s4727_s5, %s4390_s28 }
 0x225   : > { %p3138_p4 = scmp.ne.s32.totalorder %s4727_s5, %s3137_s21  ;;  %p3143_p8 = scmp.lt.s32.totalorder %s4418_s25, %s3137_s21 }
 0x227   : > { %p3144_p7 = por %p3143_p8, %p3142_p6 }
 0x229   : > { %p3145_p9 = pnand %p3144_p7, %p3138_p4 }
 0x22b   : > { %3148 = shalt.err (!%p3145_p9)  }
 0x22c   : > { %597 = dma.hbm_to_vmem [thread:$0]  %s585_s8, 16, %s4727_s5, [#allocation3] }
 0x22d   : > { %s630_s17 = sadd.s32 25, %s4387_s9  ;;  %s2338_s2 = sshll.u32 %s599_s15, 4 }
 0x22e   : > { %s4205_s12 = smov [#allocation2 + $0x18]   ;;  %s601_s23 = scalar_lea.hbm %s5599_s1, %s2338_s2 }
 0x22f   : > { %s626_s20 = sshll.u32 %s4205_s12, 4  ;;  %s3149_s26 = scalar_lea.hbm %s601_s23, 16  ;;  %s4766_s20 = int_to_ptr.vmem [resolvable:$true] %s626_s20 }
 0x230   : > { %p3150_p10 = scmp.ne.s32.totalorder %s601_s23, %s3149_s26  ;;  %p3152_p11 = scmp.lt.s32.totalorder %s601_s23, %s5599_s1 }
 0x231   : > { %p3153_p12 = scmp.lt.s32.totalorder %s4409_s16, %s3149_s26 }
 0x233   : > { %p3154_p3 = por %p3153_p12, %p3152_p11 }
 0x235   : > { %p3155_p13 = pnand %p3154_p3, %p3150_p10 }
 0x237   : > { %3158 = shalt.err (!%p3155_p13)  }
 0x238   : > { %s3159_s5 = scalar_lea.vmem %s4745_s11, 16  ;;  %p3164_p5 = scmp.lt.s32.totalorder %s4745_s11, %s4390_s28 }
 0x239   : > { %p3160_p2 = scmp.ne.s32.totalorder %s4745_s11, %s3159_s5  ;;  %p3165_p4 = scmp.lt.s32.totalorder %s4418_s25, %s3159_s5 }
 0x23b   : > { %p3166_p6 = por %p3165_p4, %p3164_p5 }
 0x23d   : > { %p3167_p8 = pnand %p3166_p6, %p3160_p2 }
 0x23f   : > { %3170 = shalt.err (!%p3167_p8)  }
 0x240   : > { %613 = dma.hbm_to_vmem [thread:$0]  %s601_s23, 16, %s4745_s11, [#allocation3] }
 0x241   : > { %s2339_s15 = sshll.u32 %s4750_s6, 4  ;;  %s631_s8 = sld [smem:[#allocation5 + %s630_s17]] }
 0x242   : > { %s617_s2 = scalar_lea.hbm %s5599_s1, %s2339_s15 }
 0x243   : > { %s3171_s12 = scalar_lea.hbm %s617_s2, 16  ;;  %p3174_p9 = scmp.lt.s32.totalorder %s617_s2, %s5599_s1 }
 0x244   : > { %p3172_p7 = scmp.ne.s32.totalorder %s617_s2, %s3171_s12  ;;  %p3175_p10 = scmp.lt.s32.totalorder %s4409_s16, %s3171_s12 }
 0x246   : > { %p3176_p11 = por %p3175_p10, %p3174_p9 }
 0x248   : > { %p3177_p12 = pnand %p3176_p11, %p3172_p7 }
 0x24a   : > { %3180 = shalt.err (!%p3177_p12)  }
 0x24b   : > { %s3181_s11 = scalar_lea.vmem %s4766_s20, 16  ;;  %p3186_p13 = scmp.lt.s32.totalorder %s4766_s20, %s4390_s28 }
 0x24c   : > { %p3182_p3 = scmp.ne.s32.totalorder %s4766_s20, %s3181_s11  ;;  %p3187_p2 = scmp.lt.s32.totalorder %s4418_s25, %s3181_s11 }
 0x24e   : > { %p3188_p5 = por %p3187_p2, %p3186_p13 }
 0x250   : > { %p3189_p4 = pnand %p3188_p5, %p3182_p3 }
 0x252   : > { %3192 = shalt.err (!%p3189_p4)  }
 0x253   : > { %629 = dma.hbm_to_vmem [thread:$0]  %s617_s2, 16, %s4766_s20, [#allocation3] }
 0x254   : > { %s4206_s6 = smov [#allocation2 + $0x19]   ;;  %s646_s23 = sadd.s32 26, %s4387_s9 }
 0x255   : > { %s642_s17 = sshll.u32 %s4206_s6, 4  ;;  %s647_s26 = sld [smem:[#allocation5 + %s646_s23]]  ;;  %s643_s17 = int_to_ptr.vmem [resolvable:$true] %s642_s17 }
 0x256   : > { %s662_s30 = sadd.s32 27, %s4387_s9  ;;  %s2340_s7 = sshll.u32 %s631_s8, 4 }
 0x257   : > { %s4207_s5 = smov [#allocation2 + $0x1a]   ;;  %s633_s12 = scalar_lea.hbm %s5599_s1, %s2340_s7 }
 0x258   : > { %s658_s15 = sshll.u32 %s4207_s5, 4  ;;  %s3193_s18 = scalar_lea.hbm %s633_s12, 16  ;;  %s4797_s15 = int_to_ptr.vmem [resolvable:$true] %s658_s15 }
 0x259   : > { %p3194_p6 = scmp.ne.s32.totalorder %s633_s12, %s3193_s18  ;;  %p3196_p8 = scmp.lt.s32.totalorder %s633_s12, %s5599_s1 }
 0x25a   : > { %p3197_p7 = scmp.lt.s32.totalorder %s4409_s16, %s3193_s18 }
 0x25c   : > { %p3198_p9 = por %p3197_p7, %p3196_p8 }
 0x25e   : > { %p3199_p10 = pnand %p3198_p9, %p3194_p6 }
 0x260   : > { %3202 = shalt.err (!%p3199_p10)  }
 0x261   : > { %s3203_s20 = scalar_lea.vmem %s643_s17, 16  ;;  %p3208_p12 = scmp.lt.s32.totalorder %s643_s17, %s4390_s28 }
 0x262   : > { %p3204_p11 = scmp.ne.s32.totalorder %s643_s17, %s3203_s20  ;;  %p3209_p3 = scmp.lt.s32.totalorder %s4418_s25, %s3203_s20 }
 0x264   : > { %p3210_p13 = por %p3209_p3, %p3208_p12 }
 0x266   : > { %p3211_p2 = pnand %p3210_p13, %p3204_p11 }
 0x268   : > { %3214 = shalt.err (!%p3211_p2)  }
 0x269   : > { %645 = dma.hbm_to_vmem [thread:$0]  %s633_s12, 16, %s643_s17, [#allocation3] }
 0x26a   : > { %s663_s8 = sld [smem:[#allocation5 + %s662_s30]]  ;;  %s2341_s2 = sshll.u32 %s647_s26, 4 }
 0x26b   : > { %s4208_s6 = smov [#allocation2 + $0x1b]   ;;  %s649_s13 = scalar_lea.hbm %s5599_s1, %s2341_s2 }
 0x26c   : > { %s674_s23 = sshll.u32 %s4208_s6, 4  ;;  %s3215_s21 = scalar_lea.hbm %s649_s13, 16  ;;  %s4808_s23 = int_to_ptr.vmem [resolvable:$true] %s674_s23 }
 0x26d   : > { %p3216_p5 = scmp.ne.s32.totalorder %s649_s13, %s3215_s21  ;;  %p3218_p4 = scmp.lt.s32.totalorder %s649_s13, %s5599_s1 }
 0x26e   : > { %p3219_p6 = scmp.lt.s32.totalorder %s4409_s16, %s3215_s21 }
 0x270   : > { %p3220_p8 = por %p3219_p6, %p3218_p4 }
 0x272   : > { %p3221_p7 = pnand %p3220_p8, %p3216_p5 }
 0x274   : > { %3224 = shalt.err (!%p3221_p7)  }
 0x275   : > { %s3225_s17 = scalar_lea.vmem %s4797_s15, 16  ;;  %p3230_p10 = scmp.lt.s32.totalorder %s4797_s15, %s4390_s28 }
 0x276   : > { %p3226_p9 = scmp.ne.s32.totalorder %s4797_s15, %s3225_s17  ;;  %p3231_p11 = scmp.lt.s32.totalorder %s4418_s25, %s3225_s17 }
 0x278   : > { %p3232_p12 = por %p3231_p11, %p3230_p10 }
 0x27a   : > { %p3233_p3 = pnand %p3232_p12, %p3226_p9 }
 0x27c   : > { %3236 = shalt.err (!%p3233_p3)  }
 0x27d   : > { %661 = dma.hbm_to_vmem [thread:$0]  %s649_s13, 16, %s4797_s15, [#allocation3] }
 0x27e   : > { %s678_s26 = sadd.s32 28, %s4387_s9  ;;  %s4209_s12 = smov [#allocation2 + $0x1c]  }
 0x27f   : > { %s4821_s30 = sld [smem:[#allocation5 + %s678_s26]]  ;;  %s690_s11 = sshll.u32 %s4209_s12, 4  ;;  %s4823_s11 = int_to_ptr.vmem [resolvable:$true] %s690_s11 }
 0x280   : > { %s2342_s20 = sshll.u32 %s663_s8, 4  ;;  %s694_s5 = sadd.s32 29, %s4387_s9 }
 0x281   : > { %s665_s7 = scalar_lea.hbm %s5599_s1, %s2342_s20 }
 0x282   : > { %s3237_s21 = scalar_lea.hbm %s665_s7, 16  ;;  %p3240_p2 = scmp.lt.s32.totalorder %s665_s7, %s5599_s1 }
 0x283   : > { %p3238_p13 = scmp.ne.s32.totalorder %s665_s7, %s3237_s21  ;;  %p3241_p5 = scmp.lt.s32.totalorder %s4409_s16, %s3237_s21 }
 0x285   : > { %p3242_p4 = por %p3241_p5, %p3240_p2 }
 0x287   : > { %p3243_p6 = pnand %p3242_p4, %p3238_p13 }
 0x289   : > { %3246 = shalt.err (!%p3243_p6)  }
 0x28a   : > { %s3247_s15 = scalar_lea.vmem %s4808_s23, 16  ;;  %p3252_p7 = scmp.lt.s32.totalorder %s4808_s23, %s4390_s28 }
 0x28b   : > { %p3248_p8 = scmp.ne.s32.totalorder %s4808_s23, %s3247_s15  ;;  %p3253_p9 = scmp.lt.s32.totalorder %s4418_s25, %s3247_s15 }
 0x28d   : > { %p3254_p10 = por %p3253_p9, %p3252_p7 }
 0x28f   : > { %p3255_p11 = pnand %p3254_p10, %p3248_p8 }
 0x291   : > { %3258 = shalt.err (!%p3255_p11)  }
 0x292   : > { %677 = dma.hbm_to_vmem [thread:$0]  %s665_s7, 16, %s4808_s23, [#allocation3] }
 0x293   : > { %s695_s8 = sld [smem:[#allocation5 + %s694_s5]]  ;;  %s4210_s13 = smov [#allocation2 + $0x1d]  }
 0x294   : > { %s706_s17 = sshll.u32 %s4210_s13, 4  ;;  %s710_s26 = sadd.s32 30, %s4387_s9  ;;  %s4841_s17 = int_to_ptr.vmem [resolvable:$true] %s706_s17 }
 0x295   : > { %s2343_s12 = sshll.u32 %s4821_s30, 4  ;;  %s4846_s21 = sld [smem:[#allocation5 + %s710_s26]] }
 0x296   : > { %s681_s6 = scalar_lea.hbm %s5599_s1, %s2343_s12 }
 0x297   : > { %s3259_s18 = scalar_lea.hbm %s681_s6, 16  ;;  %p3262_p3 = scmp.lt.s32.totalorder %s681_s6, %s5599_s1 }
 0x298   : > { %p3260_p12 = scmp.ne.s32.totalorder %s681_s6, %s3259_s18  ;;  %p3263_p13 = scmp.lt.s32.totalorder %s4409_s16, %s3259_s18 }
 0x29a   : > { %p3264_p2 = por %p3263_p13, %p3262_p3 }
 0x29c   : > { %p3265_p5 = pnand %p3264_p2, %p3260_p12 }
 0x29e   : > { %3268 = shalt.err (!%p3265_p5)  }
 0x29f   : > { %s3269_s23 = scalar_lea.vmem %s4823_s11, 16  ;;  %p3274_p6 = scmp.lt.s32.totalorder %s4823_s11, %s4390_s28 }
 0x2a0   : > { %p3270_p4 = scmp.ne.s32.totalorder %s4823_s11, %s3269_s23  ;;  %p3275_p8 = scmp.lt.s32.totalorder %s4418_s25, %s3269_s23 }
 0x2a2   : > { %p3276_p7 = por %p3275_p8, %p3274_p6 }
 0x2a4   : > { %p3277_p9 = pnand %p3276_p7, %p3270_p4 }
 0x2a6   : > { %3280 = shalt.err (!%p3277_p9)  }
 0x2a7   : > { %693 = dma.hbm_to_vmem [thread:$0]  %s681_s6, 16, %s4823_s11, [#allocation3] }
 0x2a8   : > { %s726_s30 = sadd.s32 31, %s4387_s9  ;;  %s2344_s7 = sshll.u32 %s695_s8, 4 }
 0x2a9   : > { %s4211_s5 = smov [#allocation2 + $0x1e]   ;;  %s697_s20 = scalar_lea.hbm %s5599_s1, %s2344_s7 }
 0x2aa   : > { %s722_s13 = sshll.u32 %s4211_s5, 4  ;;  %s3281_s2 = scalar_lea.hbm %s697_s20, 16  ;;  %s4862_s13 = int_to_ptr.vmem [resolvable:$true] %s722_s13 }
 0x2ab   : > { %p3282_p10 = scmp.ne.s32.totalorder %s697_s20, %s3281_s2  ;;  %p3284_p11 = scmp.lt.s32.totalorder %s697_s20, %s5599_s1 }
 0x2ac   : > { %p3285_p12 = scmp.lt.s32.totalorder %s4409_s16, %s3281_s2 }
 0x2ae   : > { %p3286_p3 = por %p3285_p12, %p3284_p11 }
 0x2b0   : > { %p3287_p13 = pnand %p3286_p3, %p3282_p10 }
 0x2b2   : > { %3290 = shalt.err (!%p3287_p13)  }
 0x2b3   : > { %s3291_s9 = scalar_lea.vmem %s4841_s17, 16  ;;  %p3296_p5 = scmp.lt.s32.totalorder %s4841_s17, %s4390_s28 }
 0x2b4   : > { %p3292_p2 = scmp.ne.s32.totalorder %s4841_s17, %s3291_s9  ;;  %p3297_p4 = scmp.lt.s32.totalorder %s4418_s25, %s3291_s9 }
 0x2b6   : > { %p3298_p6 = por %p3297_p4, %p3296_p5 }
 0x2b8   : > { %p3299_p8 = pnand %p3298_p6, %p3292_p2 }
 0x2ba   : > { %3302 = shalt.err (!%p3299_p8)  }
 0x2bb   : > { %709 = dma.hbm_to_vmem [thread:$0]  %s697_s20, 16, %s4841_s17, [#allocation3] }
 0x2bc   : > { %s2345_s11 = sshll.u32 %s4846_s21, 4  ;;  %s727_s8 = sld [smem:[#allocation5 + %s726_s30]] }
 0x2bd   : > { %s713_s23 = scalar_lea.hbm %s5599_s1, %s2345_s11 }
 0x2be   : > { %s3303_s7 = scalar_lea.hbm %s713_s23, 16  ;;  %p3306_p9 = scmp.lt.s32.totalorder %s713_s23, %s5599_s1 }
 0x2bf   : > { %p3304_p7 = scmp.ne.s32.totalorder %s713_s23, %s3303_s7  ;;  %p3307_p10 = scmp.lt.s32.totalorder %s4409_s16, %s3303_s7 }
 0x2c1   : > { %p3308_p11 = por %p3307_p10, %p3306_p9 }
 0x2c3   : > { %p3309_p12 = pnand %p3308_p11, %p3304_p7 }
 0x2c5   : > { %3312 = shalt.err (!%p3309_p12)  }
 0x2c6   : > { %s3313_s17 = scalar_lea.vmem %s4862_s13, 16  ;;  %p3318_p13 = scmp.lt.s32.totalorder %s4862_s13, %s4390_s28 }
 0x2c7   : > { %p3314_p3 = scmp.ne.s32.totalorder %s4862_s13, %s3313_s17  ;;  %p3319_p2 = scmp.lt.s32.totalorder %s4418_s25, %s3313_s17 }
 0x2c9   : > { %p3320_p5 = por %p3319_p2, %p3318_p13 }
 0x2cb   : > { %p3321_p4 = pnand %p3320_p5, %p3314_p3 }
 0x2cd   : > { %3324 = shalt.err (!%p3321_p4)  }
 0x2ce   : > { %725 = dma.hbm_to_vmem [thread:$0]  %s713_s23, 16, %s4862_s13, [#allocation3] }
 0x2cf   : > { %s4212_s21 = smov [#allocation2 + $0x1f]   ;;  %s2346_s12 = sshll.u32 %s727_s8, 4 }
 0x2d0   : > { %s738_s30 = sshll.u32 %s4212_s21, 4  ;;  %s729_s18 = scalar_lea.hbm %s5599_s1, %s2346_s12  ;;  %s739_s30 = int_to_ptr.vmem [resolvable:$true] %s738_s30 }
 0x2d1   : > { %s3325_s24 = scalar_lea.hbm %s729_s18, 16  ;;  %p3328_p8 = scmp.lt.s32.totalorder %s729_s18, %s5599_s1 }
 0x2d2   : > { %p3326_p6 = scmp.ne.s32.totalorder %s729_s18, %s3325_s24  ;;  %p3329_p7 = scmp.lt.s32.totalorder %s4409_s16, %s3325_s24 }
 0x2d4   : > { %p3330_p9 = por %p3329_p7, %p3328_p8 }
 0x2d6   : > { %p3331_p10 = pnand %p3330_p9, %p3326_p6 }
 0x2d8   : > { %3334 = shalt.err (!%p3331_p10)  }
 0x2d9   : > { %s3335_s6 = scalar_lea.vmem %s739_s30, 16  ;;  %p3340_p12 = scmp.lt.s32.totalorder %s739_s30, %s4390_s28 }
 0x2da   : > { %p3336_p11 = scmp.ne.s32.totalorder %s739_s30, %s3335_s6  ;;  %p3341_p3 = scmp.lt.s32.totalorder %s4418_s25, %s3335_s6 }
 0x2dc   : > { %p3342_p13 = por %p3341_p3, %p3340_p12 }
 0x2de   : > { %p3343_p2 = pnand %p3342_p13, %p3336_p11 }
 0x2e0   : > { %3346 = shalt.err (!%p3343_p2)  }
 0x2e1   : > { %741 = dma.hbm_to_vmem [thread:$0]  %s729_s18, 16, %s739_s30, [#allocation3] }
 0x2e2 PF: > { %s742_s13 = sadd.s32 1, %s4159_s0 }
 0x2e3   : > { %p2347_p5 = scmp.ge.s32.totalorder %s742_s13, 2 }
 0x2e4   : > { %s747_s16 = ssub.s32 (!%p2347_p5), 1, %s5675_s19  ;;  %s2457_s8 = sshll.u32 (!%p2347_p5), %s4159_s0, 5 }
 0x2e5   : > { %746 = sbr.rel (%p2347_p5) target bundleno = 1482 (0x5ca), region = 172  ;;  %s4900_s15 = sadd.s32 (!%p2347_p5), 32, %s2457_s8 }
 0x2e6   : > { %s2351_s28 = sshll.u32 (!%p2347_p5), %s747_s16, 5  ;;  %s749_s25 = sshra.s32 (!%p2347_p5), %s4900_s15, 7 }
 0x2e7   : > { %s754_s23 = sand.u32 (!%p2347_p5), 127, %s4900_s15  ;;  %s751_s7 = sadd.s32 (!%p2347_p5), %s4163_s27, %s749_s25 }
 0x2e8   : > { %s2349_s5 = sshll.u32 (!%p2347_p5), %s751_s7, 7  ;;  %s4905_s17 = scalar_lea.vmem (!%p2347_p5), [#allocation2], %s2351_s28 }
 0x2e9   : > { %s755_s26 = sadd.s32 (!%p2347_p5), %s2349_s5, %s754_s23  ;;  %s769_s21 = sshll.u32 (!%p2347_p5), %s4905_s17, 4  ;;  %s4908_s21 = int_to_ptr.vmem [resolvable:$true] %s769_s21 }
 0x2ea   : > { %s756_s30 = sld [smem:[#allocation5 + %s755_s26]]  ;;  %s773_s12 = sadd.s32 1, %s4900_s15 }
 0x2eb   : > { %s2099_s20 = scalar_lea.vmem %s4905_s17, 1 [#allocation2]  ;;  %s774_s2 = sshra.s32 %s773_s12, 7 }
 0x2ec   : > { %s779_s18 = sand.u32 127, %s773_s12  ;;  %s776_s24 = sadd.s32 %s4163_s27, %s774_s2 }
 0x2ed   : > { %s793_s9 = sshll.u32 %s2099_s20, 4  ;;  %s2352_s11 = sshll.u32 %s776_s24, 7  ;;  %s4913_s9 = int_to_ptr.vmem [resolvable:$true] %s793_s9 }
 0x2ee   : > { %s780_s6 = sadd.s32 %s2352_s11, %s779_s18  ;;  %s797_s13 = sadd.s32 2, %s4900_s15 }
 0x2ef   : > { %s4916_s28 = sld [smem:[#allocation5 + %s780_s6]]  ;;  %s798_s5 = sshra.s32 %s797_s13, 7 }
 0x2f0   : > { %s2350_s8 = sshll.u32 %s756_s30, 4  ;;  %s4921_s26 = scalar_lea.sflag [#allocation3], %s747_s16 }
 0x2f1   : > { %s758_s7 = scalar_lea.hbm %s5599_s1, %s2350_s8  ;;  %s4926_s20 = scalar_lea.hbm %s5599_s1, 8192 }
 0x2f2   : > { %s3347_s10 = scalar_lea.hbm %s758_s7, 16  ;;  %p3350_p6 = scmp.lt.s32.totalorder %s758_s7, %s5599_s1 }
 0x2f3   : > { %p3348_p4 = scmp.ne.s32.totalorder %s758_s7, %s3347_s10  ;;  %p3351_p8 = scmp.lt.s32.totalorder %s4926_s20, %s3347_s10 }
 0x2f5   : > { %p3352_p7 = por %p3351_p8, %p3350_p6 }
 0x2f7   : > { %p3353_p9 = pnand %p3352_p7, %p3348_p4 }
 0x2f9   : > { %3356 = shalt.err (!%p3353_p9)  }
 0x2fa   : > { %s3357_s16 = scalar_lea.vmem %s4908_s21, 16  ;;  %s4213_s30 = smov [#allocation2]  }
 0x2fb   : > { %p3358_p10 = scmp.ne.s32.totalorder %s4908_s21, %s3357_s16  ;;  %s3359_s11 = sshll.u32 %s4213_s30, 4  ;;  %s4934_s11 = int_to_ptr.vmem [resolvable:$false] %s3359_s11 }
 0x2fc   : > { %s4937_s6 = scalar_lea.vmem %s4934_s11, 1024  ;;  %p3362_p11 = scmp.lt.s32.totalorder %s4908_s21, %s4934_s11 }
 0x2fd   : > { %p3363_p12 = scmp.lt.s32.totalorder %s4937_s6, %s3357_s16 }
 0x2ff   : > { %p3364_p3 = por %p3363_p12, %p3362_p11 }
 0x301   : > { %p3365_p13 = pnand %p3364_p3, %p3358_p10 }
 0x303   : > { %3368 = shalt.err (!%p3365_p13)  }
 0x304   : > { %772 = dma.hbm_to_vmem [thread:$0]  %s758_s7, 16, %s4908_s21, %s4921_s26 }
 0x305   : > { %s800_s10 = sadd.s32 %s4163_s27, %s798_s5  ;;  %s803_s8 = sand.u32 127, %s797_s13 }
 0x306   : > { %s2355_s25 = sshll.u32 %s800_s10, 7  ;;  %s2104_s23 = scalar_lea.vmem %s4905_s17, 2 [#allocation2] }
 0x307   : > { %s804_s12 = sadd.s32 %s2355_s25, %s803_s8  ;;  %s817_s2 = sshll.u32 %s2104_s23, 4  ;;  %s4950_s2 = int_to_ptr.vmem [resolvable:$true] %s817_s2 }
 0x308   : > { %s2353_s24 = sshll.u32 %s4916_s28, 4  ;;  %s805_s18 = sld [smem:[#allocation5 + %s804_s12]] }
 0x309   : > { %s783_s22 = scalar_lea.hbm %s5599_s1, %s2353_s24 }
 0x30a   : > { %s3369_s4 = scalar_lea.hbm %s783_s22, 16  ;;  %p3372_p5 = scmp.lt.s32.totalorder %s783_s22, %s5599_s1 }
 0x30b   : > { %p3370_p2 = scmp.ne.s32.totalorder %s783_s22, %s3369_s4  ;;  %p3373_p4 = scmp.lt.s32.totalorder %s4926_s20, %s3369_s4 }
 0x30d   : > { %p3374_p6 = por %p3373_p4, %p3372_p5 }
 0x30f   : > { %p3375_p8 = pnand %p3374_p6, %p3370_p2 }
 0x311   : > { %3378 = shalt.err (!%p3375_p8)  }
 0x312   : > { %s3379_s21 = scalar_lea.vmem %s4913_s9, 16  ;;  %p3384_p9 = scmp.lt.s32.totalorder %s4913_s9, %s4934_s11 }
 0x313   : > { %p3380_p7 = scmp.ne.s32.totalorder %s4913_s9, %s3379_s21  ;;  %p3385_p10 = scmp.lt.s32.totalorder %s4937_s6, %s3379_s21 }
 0x315   : > { %p3386_p11 = por %p3385_p10, %p3384_p9 }
 0x317   : > { %p3387_p12 = pnand %p3386_p11, %p3380_p7 }
 0x319   : > { %3390 = shalt.err (!%p3387_p12)  }
 0x31a   : > { %796 = dma.hbm_to_vmem [thread:$0]  %s783_s22, 16, %s4913_s9, %s4921_s26 }
 0x31b   : > { %s821_s3 = sadd.s32 3, %s4900_s15  ;;  %s2109_s4 = scalar_lea.vmem %s4905_s17, 3 [#allocation2] }
 0x31c   : > { %s822_s14 = sshra.s32 %s821_s3, 7  ;;  %s827_s13 = sand.u32 127, %s821_s3 }
 0x31d   : > { %s824_s28 = sadd.s32 %s4163_s27, %s822_s14  ;;  %s841_s7 = sshll.u32 %s2109_s4, 4  ;;  %s4980_s7 = int_to_ptr.vmem [resolvable:$true] %s841_s7 }
 0x31e   : > { %s2356_s5 = sshll.u32 %s805_s18, 4  ;;  %s2358_s10 = sshll.u32 %s824_s28, 7 }
 0x31f   : > { %s807_s23 = scalar_lea.hbm %s5599_s1, %s2356_s5  ;;  %s828_s12 = sadd.s32 %s2358_s10, %s827_s13 }
 0x320   : > { %s3391_s24 = scalar_lea.hbm %s807_s23, 16  ;;  %p3394_p13 = scmp.lt.s32.totalorder %s807_s23, %s5599_s1 }
 0x321   : > { %p3392_p3 = scmp.ne.s32.totalorder %s807_s23, %s3391_s24  ;;  %p3395_p2 = scmp.lt.s32.totalorder %s4926_s20, %s3391_s24 }
 0x323   : > { %p3396_p5 = por %p3395_p2, %p3394_p13 }
 0x325   : > { %p3397_p4 = pnand %p3396_p5, %p3392_p3 }
 0x327   : > { %3400 = shalt.err (!%p3397_p4)  }
 0x328   : > { %s3401_s22 = scalar_lea.vmem %s4950_s2, 16  ;;  %p3406_p8 = scmp.lt.s32.totalorder %s4950_s2, %s4934_s11 }
 0x329   : > { %p3402_p6 = scmp.ne.s32.totalorder %s4950_s2, %s3401_s22  ;;  %p3407_p7 = scmp.lt.s32.totalorder %s4937_s6, %s3401_s22 }
 0x32b   : > { %p3408_p9 = por %p3407_p7, %p3406_p8 }
 0x32d   : > { %p3409_p10 = pnand %p3408_p9, %p3402_p6 }
 0x32f   : > { %3412 = shalt.err (!%p3409_p10)  }
 0x330   : > { %820 = dma.hbm_to_vmem [thread:$0]  %s807_s23, 16, %s4950_s2, %s4921_s26 }
 0x331   : > { %s829_s9 = sld [smem:[#allocation5 + %s828_s12]]  ;;  %s845_s18 = sadd.s32 4, %s4900_s15 }
 0x332   : > { %s2114_s21 = scalar_lea.vmem %s4905_s17, 4 [#allocation2]  ;;  %s846_s3 = sshra.s32 %s845_s18, 7 }
 0x333   : > { %s851_s4 = sand.u32 127, %s845_s18  ;;  %s848_s14 = sadd.s32 %s4163_s27, %s846_s3 }
 0x334   : > { %s865_s13 = sshll.u32 %s2114_s21, 4  ;;  %s2361_s28 = sshll.u32 %s848_s14, 7  ;;  %s4985_s13 = int_to_ptr.vmem [resolvable:$true] %s865_s13 }
 0x335   : > { %s852_s5 = sadd.s32 %s2361_s28, %s851_s4  ;;  %s869_s10 = sadd.s32 5, %s4900_s15 }
 0x336   : > { %s853_s25 = sld [smem:[#allocation5 + %s852_s5]]  ;;  %s870_s23 = sshra.s32 %s869_s10, 7 }
 0x337   : > { %s2359_s8 = sshll.u32 %s829_s9, 4 }
 0x338   : > { %s831_s2 = scalar_lea.hbm %s5599_s1, %s2359_s8 }
 0x339   : > { %s3413_s12 = scalar_lea.hbm %s831_s2, 16  ;;  %p3416_p12 = scmp.lt.s32.totalorder %s831_s2, %s5599_s1 }
 0x33a   : > { %p3414_p11 = scmp.ne.s32.totalorder %s831_s2, %s3413_s12  ;;  %p3417_p3 = scmp.lt.s32.totalorder %s4926_s20, %s3413_s12 }
 0x33c   : > { %p3418_p13 = por %p3417_p3, %p3416_p12 }
 0x33e   : > { %p3419_p2 = pnand %p3418_p13, %p3414_p11 }
 0x340   : > { %3422 = shalt.err (!%p3419_p2)  }
 0x341   : > { %s3423_s9 = scalar_lea.vmem %s4980_s7, 16  ;;  %p3428_p4 = scmp.lt.s32.totalorder %s4980_s7, %s4934_s11 }
 0x342   : > { %p3424_p5 = scmp.ne.s32.totalorder %s4980_s7, %s3423_s9  ;;  %p3429_p6 = scmp.lt.s32.totalorder %s4937_s6, %s3423_s9 }
 0x344   : > { %p3430_p8 = por %p3429_p6, %p3428_p4 }
 0x346   : > { %p3431_p7 = pnand %p3430_p8, %p3424_p5 }
 0x348   : > { %3434 = shalt.err (!%p3431_p7)  }
 0x349   : > { %844 = dma.hbm_to_vmem [thread:$0]  %s831_s2, 16, %s4980_s7, %s4921_s26 }
 0x34a   : > { %s872_s18 = sadd.s32 %s4163_s27, %s870_s23  ;;  %s875_s21 = sand.u32 127, %s869_s10 }
 0x34b   : > { %s2364_s3 = sshll.u32 %s872_s18, 7  ;;  %s2119_s4 = scalar_lea.vmem %s4905_s17, 5 [#allocation2] }
 0x34c   : > { %s876_s14 = sadd.s32 %s2364_s3, %s875_s21  ;;  %s889_s28 = sshll.u32 %s2119_s4, 4  ;;  %s5007_s28 = int_to_ptr.vmem [resolvable:$true] %s889_s28 }
 0x34d   : > { %s2362_s5 = sshll.u32 %s853_s25, 4  ;;  %s877_s8 = sld [smem:[#allocation5 + %s876_s14]] }
 0x34e   : > { %s855_s12 = scalar_lea.hbm %s5599_s1, %s2362_s5 }
 0x34f   : > { %s3435_s16 = scalar_lea.hbm %s855_s12, 16  ;;  %p3438_p10 = scmp.lt.s32.totalorder %s855_s12, %s5599_s1 }
 0x350   : > { %p3436_p9 = scmp.ne.s32.totalorder %s855_s12, %s3435_s16  ;;  %p3439_p11 = scmp.lt.s32.totalorder %s4926_s20, %s3435_s16 }
 0x352   : > { %p3440_p12 = por %p3439_p11, %p3438_p10 }
 0x354   : > { %p3441_p3 = pnand %p3440_p12, %p3436_p9 }
 0x356   : > { %3444 = shalt.err (!%p3441_p3)  }
 0x357   : > { %s3445_s7 = scalar_lea.vmem %s4985_s13, 16  ;;  %p3450_p2 = scmp.lt.s32.totalorder %s4985_s13, %s4934_s11 }
 0x358   : > { %p3446_p13 = scmp.ne.s32.totalorder %s4985_s13, %s3445_s7  ;;  %p3451_p5 = scmp.lt.s32.totalorder %s4937_s6, %s3445_s7 }
 0x35a   : > { %p3452_p4 = por %p3451_p5, %p3450_p2 }
 0x35c   : > { %p3453_p6 = pnand %p3452_p4, %p3446_p13 }
 0x35e   : > { %3456 = shalt.err (!%p3453_p6)  }
 0x35f   : > { %868 = dma.hbm_to_vmem [thread:$0]  %s855_s12, 16, %s4985_s13, %s4921_s26 }
 0x360   : > { %s893_s10 = sadd.s32 6, %s4900_s15  ;;  %s2124_s25 = scalar_lea.vmem %s4905_s17, 6 [#allocation2] }
 0x361   : > { %s894_s2 = sshra.s32 %s893_s10, 7  ;;  %s899_s23 = sand.u32 127, %s893_s10 }
 0x362   : > { %s896_s18 = sadd.s32 %s4163_s27, %s894_s2  ;;  %s913_s21 = sshll.u32 %s2124_s25, 4  ;;  %s5037_s21 = int_to_ptr.vmem [resolvable:$true] %s913_s21 }
 0x363   : > { %s2365_s3 = sshll.u32 %s877_s8, 4  ;;  %s2367_s4 = sshll.u32 %s896_s18, 7 }
 0x364   : > { %s879_s24 = scalar_lea.hbm %s5599_s1, %s2365_s3  ;;  %s900_s30 = sadd.s32 %s2367_s4, %s899_s23 }
 0x365   : > { %s3457_s16 = scalar_lea.hbm %s879_s24, 16  ;;  %p3460_p7 = scmp.lt.s32.totalorder %s879_s24, %s5599_s1 }
 0x366   : > { %p3458_p8 = scmp.ne.s32.totalorder %s879_s24, %s3457_s16  ;;  %p3461_p9 = scmp.lt.s32.totalorder %s4926_s20, %s3457_s16 }
 0x368   : > { %p3462_p10 = por %p3461_p9, %p3460_p7 }
 0x36a   : > { %p3463_p11 = pnand %p3462_p10, %p3458_p8 }
 0x36c   : > { %3466 = shalt.err (!%p3463_p11)  }
 0x36d   : > { %s3467_s13 = scalar_lea.vmem %s5007_s28, 16  ;;  %p3472_p3 = scmp.lt.s32.totalorder %s5007_s28, %s4934_s11 }
 0x36e   : > { %p3468_p12 = scmp.ne.s32.totalorder %s5007_s28, %s3467_s13  ;;  %p3473_p13 = scmp.lt.s32.totalorder %s4937_s6, %s3467_s13 }
 0x370   : > { %p3474_p2 = por %p3473_p13, %p3472_p3 }
 0x372   : > { %p3475_p5 = pnand %p3474_p2, %p3468_p12 }
 0x374   : > { %3478 = shalt.err (!%p3475_p5)  }
 0x375   : > { %892 = dma.hbm_to_vmem [thread:$0]  %s879_s24, 16, %s5007_s28, %s4921_s26 }
 0x376   : > { %s901_s8 = sld [smem:[#allocation5 + %s900_s30]]  ;;  %s917_s12 = sadd.s32 7, %s4900_s15 }
 0x377   : > { %s2129_s7 = scalar_lea.vmem %s4905_s17, 7 [#allocation2]  ;;  %s918_s10 = sshra.s32 %s917_s12, 7 }
 0x378   : > { %s923_s25 = sand.u32 127, %s917_s12  ;;  %s920_s2 = sadd.s32 %s4163_s27, %s918_s10 }
 0x379   : > { %s937_s23 = sshll.u32 %s2129_s7, 4  ;;  %s2370_s18 = sshll.u32 %s920_s2, 7  ;;  %s5042_s23 = int_to_ptr.vmem [resolvable:$true] %s937_s23 }
 0x37a   : > { %s924_s3 = sadd.s32 %s2370_s18, %s923_s25  ;;  %s941_s4 = sadd.s32 8, %s4900_s15 }
 0x37b   : > { %s925_s5 = sld [smem:[#allocation5 + %s924_s3]]  ;;  %s942_s24 = sshra.s32 %s941_s4, 7 }
 0x37c   : > { %s2368_s14 = sshll.u32 %s901_s8, 4 }
 0x37d   : > { %s903_s28 = scalar_lea.hbm %s5599_s1, %s2368_s14 }
 0x37e   : > { %s3479_s30 = scalar_lea.hbm %s903_s28, 16  ;;  %p3482_p6 = scmp.lt.s32.totalorder %s903_s28, %s5599_s1 }
 0x37f   : > { %p3480_p4 = scmp.ne.s32.totalorder %s903_s28, %s3479_s30  ;;  %p3483_p8 = scmp.lt.s32.totalorder %s4926_s20, %s3479_s30 }
 0x381   : > { %p3484_p7 = por %p3483_p8, %p3482_p6 }
 0x383   : > { %p3485_p9 = pnand %p3484_p7, %p3480_p4 }
 0x385   : > { %3488 = shalt.err (!%p3485_p9)  }
 0x386   : > { %s3489_s8 = scalar_lea.vmem %s5037_s21, 16  ;;  %p3494_p11 = scmp.lt.s32.totalorder %s5037_s21, %s4934_s11 }
 0x387   : > { %p3490_p10 = scmp.ne.s32.totalorder %s5037_s21, %s3489_s8  ;;  %p3495_p12 = scmp.lt.s32.totalorder %s4937_s6, %s3489_s8 }
 0x389   : > { %p3496_p3 = por %p3495_p12, %p3494_p11 }
 0x38b   : > { %p3497_p13 = pnand %p3496_p3, %p3490_p10 }
 0x38d   : > { %3500 = shalt.err (!%p3497_p13)  }
 0x38e   : > { %916 = dma.hbm_to_vmem [thread:$0]  %s903_s28, 16, %s5037_s21, %s4921_s26 }
 0x38f   : > { %s944_s12 = sadd.s32 %s4163_s27, %s942_s24  ;;  %s947_s7 = sand.u32 127, %s941_s4 }
 0x390   : > { %s2373_s10 = sshll.u32 %s944_s12, 7  ;;  %s2134_s25 = scalar_lea.vmem %s4905_s17, 8 [#allocation2] }
 0x391   : > { %s948_s2 = sadd.s32 %s2373_s10, %s947_s7  ;;  %s961_s18 = sshll.u32 %s2134_s25, 4  ;;  %s5064_s18 = int_to_ptr.vmem [resolvable:$true] %s961_s18 }
 0x392   : > { %s2371_s3 = sshll.u32 %s925_s5, 4  ;;  %s949_s14 = sld [smem:[#allocation5 + %s948_s2]] }
 0x393   : > { %s927_s30 = scalar_lea.hbm %s5599_s1, %s2371_s3 }
 0x394   : > { %s3501_s9 = scalar_lea.hbm %s927_s30, 16  ;;  %p3504_p5 = scmp.lt.s32.totalorder %s927_s30, %s5599_s1 }
 0x395   : > { %p3502_p2 = scmp.ne.s32.totalorder %s927_s30, %s3501_s9  ;;  %p3505_p4 = scmp.lt.s32.totalorder %s4926_s20, %s3501_s9 }
 0x397   : > { %p3506_p6 = por %p3505_p4, %p3504_p5 }
 0x399   : > { %p3507_p8 = pnand %p3506_p6, %p3502_p2 }
 0x39b   : > { %3510 = shalt.err (!%p3507_p8)  }
 0x39c   : > { %s3511_s21 = scalar_lea.vmem %s5042_s23, 16  ;;  %p3516_p9 = scmp.lt.s32.totalorder %s5042_s23, %s4934_s11 }
 0x39d   : > { %p3512_p7 = scmp.ne.s32.totalorder %s5042_s23, %s3511_s21  ;;  %p3517_p10 = scmp.lt.s32.totalorder %s4937_s6, %s3511_s21 }
 0x39f   : > { %p3518_p11 = por %p3517_p10, %p3516_p9 }
 0x3a1   : > { %p3519_p12 = pnand %p3518_p11, %p3512_p7 }
 0x3a3   : > { %3522 = shalt.err (!%p3519_p12)  }
 0x3a4   : > { %940 = dma.hbm_to_vmem [thread:$0]  %s927_s30, 16, %s5042_s23, %s4921_s26 }
 0x3a5   : > { %s965_s4 = sadd.s32 9, %s4900_s15  ;;  %s2139_s5 = scalar_lea.vmem %s4905_s17, 9 [#allocation2] }
 0x3a6   : > { %s966_s28 = sshra.s32 %s965_s4, 7  ;;  %s971_s24 = sand.u32 127, %s965_s4 }
 0x3a7   : > { %s968_s12 = sadd.s32 %s4163_s27, %s966_s28  ;;  %s985_s7 = sshll.u32 %s2139_s5, 4  ;;  %s5094_s7 = int_to_ptr.vmem [resolvable:$true] %s985_s7 }
 0x3a8   : > { %s2374_s10 = sshll.u32 %s949_s14, 4  ;;  %s2376_s25 = sshll.u32 %s968_s12, 7 }
 0x3a9   : > { %s951_s16 = scalar_lea.hbm %s5599_s1, %s2374_s10  ;;  %s972_s22 = sadd.s32 %s2376_s25, %s971_s24 }
 0x3aa   : > { %s3523_s9 = scalar_lea.hbm %s951_s16, 16  ;;  %p3526_p13 = scmp.lt.s32.totalorder %s951_s16, %s5599_s1 }
 0x3ab   : > { %p3524_p3 = scmp.ne.s32.totalorder %s951_s16, %s3523_s9  ;;  %p3527_p2 = scmp.lt.s32.totalorder %s4926_s20, %s3523_s9 }
 0x3ad   : > { %p3528_p5 = por %p3527_p2, %p3526_p13 }
 0x3af   : > { %p3529_p4 = pnand %p3528_p5, %p3524_p3 }
 0x3b1   : > { %3532 = shalt.err (!%p3529_p4)  }
 0x3b2   : > { %s3533_s23 = scalar_lea.vmem %s5064_s18, 16  ;;  %p3538_p8 = scmp.lt.s32.totalorder %s5064_s18, %s4934_s11 }
 0x3b3   : > { %p3534_p6 = scmp.ne.s32.totalorder %s5064_s18, %s3533_s23  ;;  %p3539_p7 = scmp.lt.s32.totalorder %s4937_s6, %s3533_s23 }
 0x3b5   : > { %p3540_p9 = por %p3539_p7, %p3538_p8 }
 0x3b7   : > { %p3541_p10 = pnand %p3540_p9, %p3534_p6 }
 0x3b9   : > { %3544 = shalt.err (!%p3541_p10)  }
 0x3ba   : > { %964 = dma.hbm_to_vmem [thread:$0]  %s951_s16, 16, %s5064_s18, %s4921_s26 }
 0x3bb   : > { %s973_s14 = sld [smem:[#allocation5 + %s972_s22]]  ;;  %s989_s30 = sadd.s32 10, %s4900_s15 }
 0x3bc   : > { %s2144_s21 = scalar_lea.vmem %s4905_s17, 10 [#allocation2]  ;;  %s990_s4 = sshra.s32 %s989_s30, 7 }
 0x3bd   : > { %s995_s5 = sand.u32 127, %s989_s30  ;;  %s992_s28 = sadd.s32 %s4163_s27, %s990_s4 }
 0x3be   : > { %s1009_s24 = sshll.u32 %s2144_s21, 4  ;;  %s2379_s12 = sshll.u32 %s992_s28, 7  ;;  %s5099_s24 = int_to_ptr.vmem [resolvable:$true] %s1009_s24 }
 0x3bf   : > { %s996_s10 = sadd.s32 %s2379_s12, %s995_s5  ;;  %s1013_s25 = sadd.s32 11, %s4900_s15 }
 0x3c0   : > { %s997_s3 = sld [smem:[#allocation5 + %s996_s10]]  ;;  %s1014_s16 = sshra.s32 %s1013_s25, 7 }
 0x3c1   : > { %s2377_s2 = sshll.u32 %s973_s14, 4 }
 0x3c2   : > { %s975_s18 = scalar_lea.hbm %s5599_s1, %s2377_s2 }
 0x3c3   : > { %s3545_s22 = scalar_lea.hbm %s975_s18, 16  ;;  %p3548_p12 = scmp.lt.s32.totalorder %s975_s18, %s5599_s1 }
 0x3c4   : > { %p3546_p11 = scmp.ne.s32.totalorder %s975_s18, %s3545_s22  ;;  %p3549_p3 = scmp.lt.s32.totalorder %s4926_s20, %s3545_s22 }
 0x3c6   : > { %p3550_p13 = por %p3549_p3, %p3548_p12 }
 0x3c8   : > { %p3551_p2 = pnand %p3550_p13, %p3546_p11 }
 0x3ca   : > { %3554 = shalt.err (!%p3551_p2)  }
 0x3cb   : > { %s3555_s14 = scalar_lea.vmem %s5094_s7, 16  ;;  %p3560_p4 = scmp.lt.s32.totalorder %s5094_s7, %s4934_s11 }
 0x3cc   : > { %p3556_p5 = scmp.ne.s32.totalorder %s5094_s7, %s3555_s14  ;;  %p3561_p6 = scmp.lt.s32.totalorder %s4937_s6, %s3555_s14 }
 0x3ce   : > { %p3562_p8 = por %p3561_p6, %p3560_p4 }
 0x3d0   : > { %p3563_p7 = pnand %p3562_p8, %p3556_p5 }
 0x3d2   : > { %3566 = shalt.err (!%p3563_p7)  }
 0x3d3   : > { %988 = dma.hbm_to_vmem [thread:$0]  %s975_s18, 16, %s5094_s7, %s4921_s26 }
 0x3d4   : > { %s1016_s30 = sadd.s32 %s4163_s27, %s1014_s16  ;;  %s1019_s21 = sand.u32 127, %s1013_s25 }
 0x3d5   : > { %s2382_s4 = sshll.u32 %s1016_s30, 7  ;;  %s2149_s5 = scalar_lea.vmem %s4905_s17, 11 [#allocation2] }
 0x3d6   : > { %s1020_s28 = sadd.s32 %s2382_s4, %s1019_s21  ;;  %s1033_s12 = sshll.u32 %s2149_s5, 4  ;;  %s5121_s12 = int_to_ptr.vmem [resolvable:$true] %s1033_s12 }
 0x3d7   : > { %s2380_s10 = sshll.u32 %s997_s3, 4  ;;  %s1021_s2 = sld [smem:[#allocation5 + %s1020_s28]] }
 0x3d8   : > { %s999_s22 = scalar_lea.hbm %s5599_s1, %s2380_s10 }
 0x3d9   : > { %s3567_s8 = scalar_lea.hbm %s999_s22, 16  ;;  %p3570_p10 = scmp.lt.s32.totalorder %s999_s22, %s5599_s1 }
 0x3da   : > { %p3568_p9 = scmp.ne.s32.totalorder %s999_s22, %s3567_s8  ;;  %p3571_p11 = scmp.lt.s32.totalorder %s4926_s20, %s3567_s8 }
 0x3dc   : > { %p3572_p12 = por %p3571_p11, %p3570_p10 }
 0x3de   : > { %p3573_p3 = pnand %p3572_p12, %p3568_p9 }
 0x3e0   : > { %3576 = shalt.err (!%p3573_p3)  }
 0x3e1   : > { %s3577_s7 = scalar_lea.vmem %s5099_s24, 16  ;;  %p3582_p2 = scmp.lt.s32.totalorder %s5099_s24, %s4934_s11 }
 0x3e2   : > { %p3578_p13 = scmp.ne.s32.totalorder %s5099_s24, %s3577_s7  ;;  %p3583_p5 = scmp.lt.s32.totalorder %s4937_s6, %s3577_s7 }
 0x3e4   : > { %p3584_p4 = por %p3583_p5, %p3582_p2 }
 0x3e6   : > { %p3585_p6 = pnand %p3584_p4, %p3578_p13 }
 0x3e8   : > { %3588 = shalt.err (!%p3585_p6)  }
 0x3e9   : > { %1012 = dma.hbm_to_vmem [thread:$0]  %s999_s22, 16, %s5099_s24, %s4921_s26 }
 0x3ea   : > { %s1037_s25 = sadd.s32 12, %s4900_s15  ;;  %s2154_s3 = scalar_lea.vmem %s4905_s17, 12 [#allocation2] }
 0x3eb   : > { %s1038_s18 = sshra.s32 %s1037_s25, 7  ;;  %s1043_s16 = sand.u32 127, %s1037_s25 }
 0x3ec   : > { %s1040_s30 = sadd.s32 %s4163_s27, %s1038_s18  ;;  %s1057_s21 = sshll.u32 %s2154_s3, 4  ;;  %s5151_s21 = int_to_ptr.vmem [resolvable:$true] %s1057_s21 }
 0x3ed   : > { %s2383_s4 = sshll.u32 %s1021_s2, 4  ;;  %s2385_s5 = sshll.u32 %s1040_s30, 7 }
 0x3ee   : > { %s1023_s9 = scalar_lea.hbm %s5599_s1, %s2383_s4  ;;  %s1044_s13 = sadd.s32 %s2385_s5, %s1043_s16 }
 0x3ef   : > { %s3589_s8 = scalar_lea.hbm %s1023_s9, 16  ;;  %p3592_p7 = scmp.lt.s32.totalorder %s1023_s9, %s5599_s1 }
 0x3f0   : > { %p3590_p8 = scmp.ne.s32.totalorder %s1023_s9, %s3589_s8  ;;  %p3593_p9 = scmp.lt.s32.totalorder %s4926_s20, %s3589_s8 }
 0x3f2   : > { %p3594_p10 = por %p3593_p9, %p3592_p7 }
 0x3f4   : > { %p3595_p11 = pnand %p3594_p10, %p3590_p8 }
 0x3f6   : > { %3598 = shalt.err (!%p3595_p11)  }
 0x3f7   : > { %s3599_s24 = scalar_lea.vmem %s5121_s12, 16  ;;  %p3604_p3 = scmp.lt.s32.totalorder %s5121_s12, %s4934_s11 }
 0x3f8   : > { %p3600_p12 = scmp.ne.s32.totalorder %s5121_s12, %s3599_s24  ;;  %p3605_p13 = scmp.lt.s32.totalorder %s4937_s6, %s3599_s24 }
 0x3fa   : > { %p3606_p2 = por %p3605_p13, %p3604_p3 }
 0x3fc   : > { %p3607_p5 = pnand %p3606_p2, %p3600_p12 }
 0x3fe   : > { %3610 = shalt.err (!%p3607_p5)  }
 0x3ff   : > { %1036 = dma.hbm_to_vmem [thread:$0]  %s1023_s9, 16, %s5121_s12, %s4921_s26 }
 0x400   : > { %s1045_s2 = sld [smem:[#allocation5 + %s1044_s13]]  ;;  %s1061_s22 = sadd.s32 13, %s4900_s15 }
 0x401   : > { %s2159_s7 = scalar_lea.vmem %s4905_s17, 13 [#allocation2]  ;;  %s1062_s25 = sshra.s32 %s1061_s22, 7 }
 0x402   : > { %s1067_s3 = sand.u32 127, %s1061_s22  ;;  %s1064_s18 = sadd.s32 %s4163_s27, %s1062_s25 }
 0x403   : > { %s1081_s16 = sshll.u32 %s2159_s7, 4  ;;  %s2388_s30 = sshll.u32 %s1064_s18, 7  ;;  %s5156_s16 = int_to_ptr.vmem [resolvable:$true] %s1081_s16 }
 0x404   : > { %s1068_s4 = sadd.s32 %s2388_s30, %s1067_s3  ;;  %s1085_s5 = sadd.s32 14, %s4900_s15 }
 0x405   : > { %s1069_s10 = sld [smem:[#allocation5 + %s1068_s4]]  ;;  %s1086_s9 = sshra.s32 %s1085_s5, 7 }
 0x406   : > { %s2386_s28 = sshll.u32 %s1045_s2, 4 }
 0x407   : > { %s1047_s12 = scalar_lea.hbm %s5599_s1, %s2386_s28 }
 0x408   : > { %s3611_s13 = scalar_lea.hbm %s1047_s12, 16  ;;  %p3614_p6 = scmp.lt.s32.totalorder %s1047_s12, %s5599_s1 }
 0x409   : > { %p3612_p4 = scmp.ne.s32.totalorder %s1047_s12, %s3611_s13  ;;  %p3615_p8 = scmp.lt.s32.totalorder %s4926_s20, %s3611_s13 }
 0x40b   : > { %p3616_p7 = por %p3615_p8, %p3614_p6 }
 0x40d   : > { %p3617_p9 = pnand %p3616_p7, %p3612_p4 }
 0x40f   : > { %3620 = shalt.err (!%p3617_p9)  }
 0x410   : > { %s3621_s2 = scalar_lea.vmem %s5151_s21, 16  ;;  %p3626_p11 = scmp.lt.s32.totalorder %s5151_s21, %s4934_s11 }
 0x411   : > { %p3622_p10 = scmp.ne.s32.totalorder %s5151_s21, %s3621_s2  ;;  %p3627_p12 = scmp.lt.s32.totalorder %s4937_s6, %s3621_s2 }
 0x413   : > { %p3628_p3 = por %p3627_p12, %p3626_p11 }
 0x415   : > { %p3629_p13 = pnand %p3628_p3, %p3622_p10 }
 0x417   : > { %3632 = shalt.err (!%p3629_p13)  }
 0x418   : > { %1060 = dma.hbm_to_vmem [thread:$0]  %s1047_s12, 16, %s5151_s21, %s4921_s26 }
 0x419   : > { %s1088_s22 = sadd.s32 %s4163_s27, %s1086_s9  ;;  %s1091_s7 = sand.u32 127, %s1085_s5 }
 0x41a   : > { %s2391_s25 = sshll.u32 %s1088_s22, 7  ;;  %s2164_s3 = scalar_lea.vmem %s4905_s17, 14 [#allocation2] }
 0x41b   : > { %s1092_s18 = sadd.s32 %s2391_s25, %s1091_s7  ;;  %s1105_s30 = sshll.u32 %s2164_s3, 4  ;;  %s5178_s30 = int_to_ptr.vmem [resolvable:$true] %s1105_s30 }
 0x41c   : > { %s2389_s4 = sshll.u32 %s1069_s10, 4  ;;  %s1093_s28 = sld [smem:[#allocation5 + %s1092_s18]] }
 0x41d   : > { %s1071_s13 = scalar_lea.hbm %s5599_s1, %s2389_s4 }
 0x41e   : > { %s3633_s14 = scalar_lea.hbm %s1071_s13, 16  ;;  %p3636_p5 = scmp.lt.s32.totalorder %s1071_s13, %s5599_s1 }
 0x41f   : > { %p3634_p2 = scmp.ne.s32.totalorder %s1071_s13, %s3633_s14  ;;  %p3637_p4 = scmp.lt.s32.totalorder %s4926_s20, %s3633_s14 }
 0x421   : > { %p3638_p6 = por %p3637_p4, %p3636_p5 }
 0x423   : > { %p3639_p8 = pnand %p3638_p6, %p3634_p2 }
 0x425   : > { %3642 = shalt.err (!%p3639_p8)  }
 0x426   : > { %s3643_s21 = scalar_lea.vmem %s5156_s16, 16  ;;  %p3648_p9 = scmp.lt.s32.totalorder %s5156_s16, %s4934_s11 }
 0x427   : > { %p3644_p7 = scmp.ne.s32.totalorder %s5156_s16, %s3643_s21  ;;  %p3649_p10 = scmp.lt.s32.totalorder %s4937_s6, %s3643_s21 }
 0x429   : > { %p3650_p11 = por %p3649_p10, %p3648_p9 }
 0x42b   : > { %p3651_p12 = pnand %p3650_p11, %p3644_p7 }
 0x42d   : > { %3654 = shalt.err (!%p3651_p12)  }
 0x42e   : > { %1084 = dma.hbm_to_vmem [thread:$0]  %s1071_s13, 16, %s5156_s16, %s4921_s26 }
 0x42f   : > { %s1109_s5 = sadd.s32 15, %s4900_s15  ;;  %s2169_s10 = scalar_lea.vmem %s4905_s17, 15 [#allocation2] }
 0x430   : > { %s1110_s12 = sshra.s32 %s1109_s5, 7  ;;  %s1115_s9 = sand.u32 127, %s1109_s5 }
 0x431   : > { %s1112_s22 = sadd.s32 %s4163_s27, %s1110_s12  ;;  %s1129_s7 = sshll.u32 %s2169_s10, 4  ;;  %s5208_s7 = int_to_ptr.vmem [resolvable:$true] %s1129_s7 }
 0x432   : > { %s2392_s25 = sshll.u32 %s1093_s28, 4  ;;  %s2394_s3 = sshll.u32 %s1112_s22, 7 }
 0x433   : > { %s1095_s8 = scalar_lea.hbm %s5599_s1, %s2392_s25  ;;  %s1116_s23 = sadd.s32 %s2394_s3, %s1115_s9 }
 0x434   : > { %s3655_s14 = scalar_lea.hbm %s1095_s8, 16  ;;  %p3658_p13 = scmp.lt.s32.totalorder %s1095_s8, %s5599_s1 }
 0x435   : > { %p3656_p3 = scmp.ne.s32.totalorder %s1095_s8, %s3655_s14  ;;  %p3659_p2 = scmp.lt.s32.totalorder %s4926_s20, %s3655_s14 }
 0x437   : > { %p3660_p5 = por %p3659_p2, %p3658_p13 }
 0x439   : > { %p3661_p4 = pnand %p3660_p5, %p3656_p3 }
 0x43b   : > { %3664 = shalt.err (!%p3661_p4)  }
 0x43c   : > { %s3665_s16 = scalar_lea.vmem %s5178_s30, 16  ;;  %p3670_p8 = scmp.lt.s32.totalorder %s5178_s30, %s4934_s11 }
 0x43d   : > { %p3666_p6 = scmp.ne.s32.totalorder %s5178_s30, %s3665_s16  ;;  %p3671_p7 = scmp.lt.s32.totalorder %s4937_s6, %s3665_s16 }
 0x43f   : > { %p3672_p9 = por %p3671_p7, %p3670_p8 }
 0x441   : > { %p3673_p10 = pnand %p3672_p9, %p3666_p6 }
 0x443   : > { %3676 = shalt.err (!%p3673_p10)  }
 0x444   : > { %1108 = dma.hbm_to_vmem [thread:$0]  %s1095_s8, 16, %s5178_s30, %s4921_s26 }
 0x445   : > { %s1117_s28 = sld [smem:[#allocation5 + %s1116_s23]]  ;;  %s1133_s13 = sadd.s32 16, %s4900_s15 }
 0x446   : > { %s2174_s21 = scalar_lea.vmem %s4905_s17, 16 [#allocation2]  ;;  %s1134_s5 = sshra.s32 %s1133_s13, 7 }
 0x447   : > { %s1139_s10 = sand.u32 127, %s1133_s13  ;;  %s1136_s12 = sadd.s32 %s4163_s27, %s1134_s5 }
 0x448   : > { %s1153_s9 = sshll.u32 %s2174_s21, 4  ;;  %s2397_s22 = sshll.u32 %s1136_s12, 7  ;;  %s5213_s9 = int_to_ptr.vmem [resolvable:$true] %s1153_s9 }
 0x449   : > { %s1140_s25 = sadd.s32 %s2397_s22, %s1139_s10  ;;  %s1157_s3 = sadd.s32 17, %s4900_s15 }
 0x44a   : > { %s1141_s4 = sld [smem:[#allocation5 + %s1140_s25]]  ;;  %s1158_s8 = sshra.s32 %s1157_s3, 7 }
 0x44b   : > { %s2395_s18 = sshll.u32 %s1117_s28, 4 }
 0x44c   : > { %s1119_s30 = scalar_lea.hbm %s5599_s1, %s2395_s18 }
 0x44d   : > { %s3677_s23 = scalar_lea.hbm %s1119_s30, 16  ;;  %p3680_p12 = scmp.lt.s32.totalorder %s1119_s30, %s5599_s1 }
 0x44e   : > { %p3678_p11 = scmp.ne.s32.totalorder %s1119_s30, %s3677_s23  ;;  %p3681_p3 = scmp.lt.s32.totalorder %s4926_s20, %s3677_s23 }
 0x450   : > { %p3682_p13 = por %p3681_p3, %p3680_p12 }
 0x452   : > { %p3683_p2 = pnand %p3682_p13, %p3678_p11 }
 0x454   : > { %3686 = shalt.err (!%p3683_p2)  }
 0x455   : > { %s3687_s28 = scalar_lea.vmem %s5208_s7, 16  ;;  %p3692_p4 = scmp.lt.s32.totalorder %s5208_s7, %s4934_s11 }
 0x456   : > { %p3688_p5 = scmp.ne.s32.totalorder %s5208_s7, %s3687_s28  ;;  %p3693_p6 = scmp.lt.s32.totalorder %s4937_s6, %s3687_s28 }
 0x458   : > { %p3694_p8 = por %p3693_p6, %p3692_p4 }
 0x45a   : > { %p3695_p7 = pnand %p3694_p8, %p3688_p5 }
 0x45c   : > { %3698 = shalt.err (!%p3695_p7)  }
 0x45d   : > { %1132 = dma.hbm_to_vmem [thread:$0]  %s1119_s30, 16, %s5208_s7, %s4921_s26 }
 0x45e   : > { %s1160_s13 = sadd.s32 %s4163_s27, %s1158_s8  ;;  %s1163_s21 = sand.u32 127, %s1157_s3 }
 0x45f   : > { %s2400_s5 = sshll.u32 %s1160_s13, 7  ;;  %s2179_s10 = scalar_lea.vmem %s4905_s17, 17 [#allocation2] }
 0x460   : > { %s1164_s12 = sadd.s32 %s2400_s5, %s1163_s21  ;;  %s1177_s22 = sshll.u32 %s2179_s10, 4  ;;  %s5235_s22 = int_to_ptr.vmem [resolvable:$true] %s1177_s22 }
 0x461   : > { %s2398_s25 = sshll.u32 %s1141_s4, 4  ;;  %s1165_s18 = sld [smem:[#allocation5 + %s1164_s12]] }
 0x462   : > { %s1143_s23 = scalar_lea.hbm %s5599_s1, %s2398_s25 }
 0x463   : > { %s3699_s2 = scalar_lea.hbm %s1143_s23, 16  ;;  %p3702_p10 = scmp.lt.s32.totalorder %s1143_s23, %s5599_s1 }
 0x464   : > { %p3700_p9 = scmp.ne.s32.totalorder %s1143_s23, %s3699_s2  ;;  %p3703_p11 = scmp.lt.s32.totalorder %s4926_s20, %s3699_s2 }
 0x466   : > { %p3704_p12 = por %p3703_p11, %p3702_p10 }
 0x468   : > { %p3705_p3 = pnand %p3704_p12, %p3700_p9 }
 0x46a   : > { %3708 = shalt.err (!%p3705_p3)  }
 0x46b   : > { %s3709_s7 = scalar_lea.vmem %s5213_s9, 16  ;;  %p3714_p2 = scmp.lt.s32.totalorder %s5213_s9, %s4934_s11 }
 0x46c   : > { %p3710_p13 = scmp.ne.s32.totalorder %s5213_s9, %s3709_s7  ;;  %p3715_p5 = scmp.lt.s32.totalorder %s4937_s6, %s3709_s7 }
 0x46e   : > { %p3716_p4 = por %p3715_p5, %p3714_p2 }
 0x470   : > { %p3717_p6 = pnand %p3716_p4, %p3710_p13 }
 0x472   : > { %3720 = shalt.err (!%p3717_p6)  }
 0x473   : > { %1156 = dma.hbm_to_vmem [thread:$0]  %s1143_s23, 16, %s5213_s9, %s4921_s26 }
 0x474   : > { %s1181_s3 = sadd.s32 18, %s4900_s15  ;;  %s2184_s4 = scalar_lea.vmem %s4905_s17, 18 [#allocation2] }
 0x475   : > { %s1182_s30 = sshra.s32 %s1181_s3, 7  ;;  %s1187_s8 = sand.u32 127, %s1181_s3 }
 0x476   : > { %s1184_s13 = sadd.s32 %s4163_s27, %s1182_s30  ;;  %s1201_s21 = sshll.u32 %s2184_s4, 4  ;;  %s5265_s21 = int_to_ptr.vmem [resolvable:$true] %s1201_s21 }
 0x477   : > { %s2401_s5 = sshll.u32 %s1165_s18, 4  ;;  %s2403_s10 = sshll.u32 %s1184_s13, 7 }
 0x478   : > { %s1167_s14 = scalar_lea.hbm %s5599_s1, %s2401_s5  ;;  %s1188_s24 = sadd.s32 %s2403_s10, %s1187_s8 }
 0x479   : > { %s3721_s2 = scalar_lea.hbm %s1167_s14, 16  ;;  %p3724_p7 = scmp.lt.s32.totalorder %s1167_s14, %s5599_s1 }
 0x47a   : > { %p3722_p8 = scmp.ne.s32.totalorder %s1167_s14, %s3721_s2  ;;  %p3725_p9 = scmp.lt.s32.totalorder %s4926_s20, %s3721_s2 }
 0x47c   : > { %p3726_p10 = por %p3725_p9, %p3724_p7 }
 0x47e   : > { %p3727_p11 = pnand %p3726_p10, %p3722_p8 }
 0x480   : > { %3730 = shalt.err (!%p3727_p11)  }
 0x481   : > { %s3731_s9 = scalar_lea.vmem %s5235_s22, 16  ;;  %p3736_p3 = scmp.lt.s32.totalorder %s5235_s22, %s4934_s11 }
 0x482   : > { %p3732_p12 = scmp.ne.s32.totalorder %s5235_s22, %s3731_s9  ;;  %p3737_p13 = scmp.lt.s32.totalorder %s4937_s6, %s3731_s9 }
 0x484   : > { %p3738_p2 = por %p3737_p13, %p3736_p3 }
 0x486   : > { %p3739_p5 = pnand %p3738_p2, %p3732_p12 }
 0x488   : > { %3742 = shalt.err (!%p3739_p5)  }
 0x489   : > { %1180 = dma.hbm_to_vmem [thread:$0]  %s1167_s14, 16, %s5235_s22, %s4921_s26 }
 0x48a   : > { %s1189_s18 = sld [smem:[#allocation5 + %s1188_s24]]  ;;  %s1205_s23 = sadd.s32 19, %s4900_s15 }
 0x48b   : > { %s2189_s7 = scalar_lea.vmem %s4905_s17, 19 [#allocation2]  ;;  %s1206_s3 = sshra.s32 %s1205_s23, 7 }
 0x48c   : > { %s1211_s4 = sand.u32 127, %s1205_s23  ;;  %s1208_s30 = sadd.s32 %s4163_s27, %s1206_s3 }
 0x48d   : > { %s1225_s8 = sshll.u32 %s2189_s7, 4  ;;  %s2406_s13 = sshll.u32 %s1208_s30, 7  ;;  %s5270_s8 = int_to_ptr.vmem [resolvable:$true] %s1225_s8 }
 0x48e   : > { %s1212_s5 = sadd.s32 %s2406_s13, %s1211_s4  ;;  %s1229_s10 = sadd.s32 20, %s4900_s15 }
 0x48f   : > { %s1213_s25 = sld [smem:[#allocation5 + %s1212_s5]]  ;;  %s1230_s14 = sshra.s32 %s1229_s10, 7 }
 0x490   : > { %s2404_s12 = sshll.u32 %s1189_s18, 4 }
 0x491   : > { %s1191_s22 = scalar_lea.hbm %s5599_s1, %s2404_s12 }
 0x492   : > { %s3743_s24 = scalar_lea.hbm %s1191_s22, 16  ;;  %p3746_p6 = scmp.lt.s32.totalorder %s1191_s22, %s5599_s1 }
 0x493   : > { %p3744_p4 = scmp.ne.s32.totalorder %s1191_s22, %s3743_s24  ;;  %p3747_p8 = scmp.lt.s32.totalorder %s4926_s20, %s3743_s24 }
 0x495   : > { %p3748_p7 = por %p3747_p8, %p3746_p6 }
 0x497   : > { %p3749_p9 = pnand %p3748_p7, %p3744_p4 }
 0x499   : > { %3752 = shalt.err (!%p3749_p9)  }
 0x49a   : > { %s3753_s18 = scalar_lea.vmem %s5265_s21, 16  ;;  %p3758_p11 = scmp.lt.s32.totalorder %s5265_s21, %s4934_s11 }
 0x49b   : > { %p3754_p10 = scmp.ne.s32.totalorder %s5265_s21, %s3753_s18  ;;  %p3759_p12 = scmp.lt.s32.totalorder %s4937_s6, %s3753_s18 }
 0x49d   : > { %p3760_p3 = por %p3759_p12, %p3758_p11 }
 0x49f   : > { %p3761_p13 = pnand %p3760_p3, %p3754_p10 }
 0x4a1   : > { %3764 = shalt.err (!%p3761_p13)  }
 0x4a2   : > { %1204 = dma.hbm_to_vmem [thread:$0]  %s1191_s22, 16, %s5265_s21, %s4921_s26 }
 0x4a3   : > { %s1232_s23 = sadd.s32 %s4163_s27, %s1230_s14  ;;  %s1235_s7 = sand.u32 127, %s1229_s10 }
 0x4a4   : > { %s2409_s3 = sshll.u32 %s1232_s23, 7  ;;  %s2194_s4 = scalar_lea.vmem %s4905_s17, 20 [#allocation2] }
 0x4a5   : > { %s1236_s30 = sadd.s32 %s2409_s3, %s1235_s7  ;;  %s1249_s13 = sshll.u32 %s2194_s4, 4  ;;  %s5292_s13 = int_to_ptr.vmem [resolvable:$true] %s1249_s13 }
 0x4a6   : > { %s2407_s5 = sshll.u32 %s1213_s25, 4  ;;  %s1237_s12 = sld [smem:[#allocation5 + %s1236_s30]] }
 0x4a7   : > { %s1215_s24 = scalar_lea.hbm %s5599_s1, %s2407_s5 }
 0x4a8   : > { %s3765_s28 = scalar_lea.hbm %s1215_s24, 16  ;;  %p3768_p5 = scmp.lt.s32.totalorder %s1215_s24, %s5599_s1 }
 0x4a9   : > { %p3766_p2 = scmp.ne.s32.totalorder %s1215_s24, %s3765_s28  ;;  %p3769_p4 = scmp.lt.s32.totalorder %s4926_s20, %s3765_s28 }
 0x4ab   : > { %p3770_p6 = por %p3769_p4, %p3768_p5 }
 0x4ad   : > { %p3771_p8 = pnand %p3770_p6, %p3766_p2 }
 0x4af   : > { %3774 = shalt.err (!%p3771_p8)  }
 0x4b0   : > { %s3775_s21 = scalar_lea.vmem %s5270_s8, 16  ;;  %p3780_p9 = scmp.lt.s32.totalorder %s5270_s8, %s4934_s11 }
 0x4b1   : > { %p3776_p7 = scmp.ne.s32.totalorder %s5270_s8, %s3775_s21  ;;  %p3781_p10 = scmp.lt.s32.totalorder %s4937_s6, %s3775_s21 }
 0x4b3   : > { %p3782_p11 = por %p3781_p10, %p3780_p9 }
 0x4b5   : > { %p3783_p12 = pnand %p3782_p11, %p3776_p7 }
 0x4b7   : > { %3786 = shalt.err (!%p3783_p12)  }
 0x4b8   : > { %1228 = dma.hbm_to_vmem [thread:$0]  %s1215_s24, 16, %s5270_s8, %s4921_s26 }
 0x4b9   : > { %s1253_s10 = sadd.s32 21, %s4900_s15  ;;  %s2199_s25 = scalar_lea.vmem %s4905_s17, 21 [#allocation2] }
 0x4ba   : > { %s1254_s22 = sshra.s32 %s1253_s10, 7  ;;  %s1259_s14 = sand.u32 127, %s1253_s10 }
 0x4bb   : > { %s1256_s23 = sadd.s32 %s4163_s27, %s1254_s22  ;;  %s1273_s7 = sshll.u32 %s2199_s25, 4  ;;  %s5322_s7 = int_to_ptr.vmem [resolvable:$true] %s1273_s7 }
 0x4bc   : > { %s2410_s3 = sshll.u32 %s1237_s12, 4  ;;  %s2412_s4 = sshll.u32 %s1256_s23, 7 }
 0x4bd   : > { %s1239_s2 = scalar_lea.hbm %s5599_s1, %s2410_s3  ;;  %s1260_s16 = sadd.s32 %s2412_s4, %s1259_s14 }
 0x4be   : > { %s3787_s28 = scalar_lea.hbm %s1239_s2, 16  ;;  %p3790_p13 = scmp.lt.s32.totalorder %s1239_s2, %s5599_s1 }
 0x4bf   : > { %p3788_p3 = scmp.ne.s32.totalorder %s1239_s2, %s3787_s28  ;;  %p3791_p2 = scmp.lt.s32.totalorder %s4926_s20, %s3787_s28 }
 0x4c1   : > { %p3792_p5 = por %p3791_p2, %p3790_p13 }
 0x4c3   : > { %p3793_p4 = pnand %p3792_p5, %p3788_p3 }
 0x4c5   : > { %3796 = shalt.err (!%p3793_p4)  }
 0x4c6   : > { %s3797_s8 = scalar_lea.vmem %s5292_s13, 16  ;;  %p3802_p8 = scmp.lt.s32.totalorder %s5292_s13, %s4934_s11 }
 0x4c7   : > { %p3798_p6 = scmp.ne.s32.totalorder %s5292_s13, %s3797_s8  ;;  %p3803_p7 = scmp.lt.s32.totalorder %s4937_s6, %s3797_s8 }
 0x4c9   : > { %p3804_p9 = por %p3803_p7, %p3802_p8 }
 0x4cb   : > { %p3805_p10 = pnand %p3804_p9, %p3798_p6 }
 0x4cd   : > { %3808 = shalt.err (!%p3805_p10)  }
 0x4ce   : > { %1252 = dma.hbm_to_vmem [thread:$0]  %s1239_s2, 16, %s5292_s13, %s4921_s26 }
 0x4cf   : > { %s1261_s12 = sld [smem:[#allocation5 + %s1260_s16]]  ;;  %s1277_s24 = sadd.s32 22, %s4900_s15 }
 0x4d0   : > { %s2204_s21 = scalar_lea.vmem %s4905_s17, 22 [#allocation2]  ;;  %s1278_s10 = sshra.s32 %s1277_s24, 7 }
 0x4d1   : > { %s1283_s25 = sand.u32 127, %s1277_s24  ;;  %s1280_s22 = sadd.s32 %s4163_s27, %s1278_s10 }
 0x4d2   : > { %s1297_s14 = sshll.u32 %s2204_s21, 4  ;;  %s2415_s23 = sshll.u32 %s1280_s22, 7  ;;  %s5327_s14 = int_to_ptr.vmem [resolvable:$true] %s1297_s14 }
 0x4d3   : > { %s1284_s3 = sadd.s32 %s2415_s23, %s1283_s25  ;;  %s1301_s4 = sadd.s32 23, %s4900_s15 }
 0x4d4   : > { %s1285_s5 = sld [smem:[#allocation5 + %s1284_s3]]  ;;  %s1302_s2 = sshra.s32 %s1301_s4, 7 }
 0x4d5   : > { %s2413_s30 = sshll.u32 %s1261_s12, 4 }
 0x4d6   : > { %s1263_s13 = scalar_lea.hbm %s5599_s1, %s2413_s30 }
 0x4d7   : > { %s3809_s16 = scalar_lea.hbm %s1263_s13, 16  ;;  %p3812_p12 = scmp.lt.s32.totalorder %s1263_s13, %s5599_s1 }
 0x4d8   : > { %p3810_p11 = scmp.ne.s32.totalorder %s1263_s13, %s3809_s16  ;;  %p3813_p3 = scmp.lt.s32.totalorder %s4926_s20, %s3809_s16 }
 0x4da   : > { %p3814_p13 = por %p3813_p3, %p3812_p12 }
 0x4dc   : > { %p3815_p2 = pnand %p3814_p13, %p3810_p11 }
 0x4de   : > { %3818 = shalt.err (!%p3815_p2)  }
 0x4df   : > { %s3819_s12 = scalar_lea.vmem %s5322_s7, 16  ;;  %p3824_p4 = scmp.lt.s32.totalorder %s5322_s7, %s4934_s11 }
 0x4e0   : > { %p3820_p5 = scmp.ne.s32.totalorder %s5322_s7, %s3819_s12  ;;  %p3825_p6 = scmp.lt.s32.totalorder %s4937_s6, %s3819_s12 }
 0x4e2   : > { %p3826_p8 = por %p3825_p6, %p3824_p4 }
 0x4e4   : > { %p3827_p7 = pnand %p3826_p8, %p3820_p5 }
 0x4e6   : > { %3830 = shalt.err (!%p3827_p7)  }
 0x4e7   : > { %1276 = dma.hbm_to_vmem [thread:$0]  %s1263_s13, 16, %s5322_s7, %s4921_s26 }
 0x4e8   : > { %s1304_s24 = sadd.s32 %s4163_s27, %s1302_s2  ;;  %s1307_s21 = sand.u32 127, %s1301_s4 }
 0x4e9   : > { %s2418_s10 = sshll.u32 %s1304_s24, 7  ;;  %s2209_s25 = scalar_lea.vmem %s4905_s17, 23 [#allocation2] }
 0x4ea   : > { %s1308_s22 = sadd.s32 %s2418_s10, %s1307_s21  ;;  %s1321_s23 = sshll.u32 %s2209_s25, 4  ;;  %s5349_s23 = int_to_ptr.vmem [resolvable:$true] %s1321_s23 }
 0x4eb   : > { %s2416_s3 = sshll.u32 %s1285_s5, 4  ;;  %s1309_s30 = sld [smem:[#allocation5 + %s1308_s22]] }
 0x4ec   : > { %s1287_s16 = scalar_lea.hbm %s5599_s1, %s2416_s3 }
 0x4ed   : > { %s3831_s18 = scalar_lea.hbm %s1287_s16, 16  ;;  %p3834_p10 = scmp.lt.s32.totalorder %s1287_s16, %s5599_s1 }
 0x4ee   : > { %p3832_p9 = scmp.ne.s32.totalorder %s1287_s16, %s3831_s18  ;;  %p3835_p11 = scmp.lt.s32.totalorder %s4926_s20, %s3831_s18 }
 0x4f0   : > { %p3836_p12 = por %p3835_p11, %p3834_p10 }
 0x4f2   : > { %p3837_p3 = pnand %p3836_p12, %p3832_p9 }
 0x4f4   : > { %3840 = shalt.err (!%p3837_p3)  }
 0x4f5   : > { %s3841_s7 = scalar_lea.vmem %s5327_s14, 16  ;;  %p3846_p2 = scmp.lt.s32.totalorder %s5327_s14, %s4934_s11 }
 0x4f6   : > { %p3842_p13 = scmp.ne.s32.totalorder %s5327_s14, %s3841_s7  ;;  %p3847_p5 = scmp.lt.s32.totalorder %s4937_s6, %s3841_s7 }
 0x4f8   : > { %p3848_p4 = por %p3847_p5, %p3846_p2 }
 0x4fa   : > { %p3849_p6 = pnand %p3848_p4, %p3842_p13 }
 0x4fc   : > { %3852 = shalt.err (!%p3849_p6)  }
 0x4fd   : > { %1300 = dma.hbm_to_vmem [thread:$0]  %s1287_s16, 16, %s5327_s14, %s4921_s26 }
 0x4fe   : > { %s1325_s4 = sadd.s32 24, %s4900_s15  ;;  %s2214_s5 = scalar_lea.vmem %s4905_s17, 24 [#allocation2] }
 0x4ff   : > { %s1326_s13 = sshra.s32 %s1325_s4, 7  ;;  %s1331_s2 = sand.u32 127, %s1325_s4 }
 0x500   : > { %s1328_s24 = sadd.s32 %s4163_s27, %s1326_s13  ;;  %s1345_s21 = sshll.u32 %s2214_s5, 4  ;;  %s5379_s21 = int_to_ptr.vmem [resolvable:$true] %s1345_s21 }
 0x501   : > { %s2419_s10 = sshll.u32 %s1309_s30, 4  ;;  %s2421_s25 = sshll.u32 %s1328_s24, 7 }
 0x502   : > { %s1311_s28 = scalar_lea.hbm %s5599_s1, %s2419_s10  ;;  %s1332_s9 = sadd.s32 %s2421_s25, %s1331_s2 }
 0x503   : > { %s3853_s18 = scalar_lea.hbm %s1311_s28, 16  ;;  %p3856_p7 = scmp.lt.s32.totalorder %s1311_s28, %s5599_s1 }
 0x504   : > { %p3854_p8 = scmp.ne.s32.totalorder %s1311_s28, %s3853_s18  ;;  %p3857_p9 = scmp.lt.s32.totalorder %s4926_s20, %s3853_s18 }
 0x506   : > { %p3858_p10 = por %p3857_p9, %p3856_p7 }
 0x508   : > { %p3859_p11 = pnand %p3858_p10, %p3854_p8 }
 0x50a   : > { %3862 = shalt.err (!%p3859_p11)  }
 0x50b   : > { %s3863_s14 = scalar_lea.vmem %s5349_s23, 16  ;;  %p3868_p3 = scmp.lt.s32.totalorder %s5349_s23, %s4934_s11 }
 0x50c   : > { %p3864_p12 = scmp.ne.s32.totalorder %s5349_s23, %s3863_s14  ;;  %p3869_p13 = scmp.lt.s32.totalorder %s4937_s6, %s3863_s14 }
 0x50e   : > { %p3870_p2 = por %p3869_p13, %p3868_p3 }
 0x510   : > { %p3871_p5 = pnand %p3870_p2, %p3864_p12 }
 0x512   : > { %3874 = shalt.err (!%p3871_p5)  }
 0x513   : > { %1324 = dma.hbm_to_vmem [thread:$0]  %s1311_s28, 16, %s5349_s23, %s4921_s26 }
 0x514   : > { %s1333_s30 = sld [smem:[#allocation5 + %s1332_s9]]  ;;  %s1349_s16 = sadd.s32 25, %s4900_s15 }
 0x515   : > { %s2219_s7 = scalar_lea.vmem %s4905_s17, 25 [#allocation2]  ;;  %s1350_s4 = sshra.s32 %s1349_s16, 7 }
 0x516   : > { %s1355_s5 = sand.u32 127, %s1349_s16  ;;  %s1352_s13 = sadd.s32 %s4163_s27, %s1350_s4 }
 0x517   : > { %s1369_s2 = sshll.u32 %s2219_s7, 4  ;;  %s2424_s24 = sshll.u32 %s1352_s13, 7  ;;  %s5384_s2 = int_to_ptr.vmem [resolvable:$true] %s1369_s2 }
 0x518   : > { %s1356_s10 = sadd.s32 %s2424_s24, %s1355_s5  ;;  %s1373_s25 = sadd.s32 26, %s4900_s15 }
 0x519   : > { %s1357_s3 = sld [smem:[#allocation5 + %s1356_s10]]  ;;  %s1374_s28 = sshra.s32 %s1373_s25, 7 }
 0x51a   : > { %s2422_s22 = sshll.u32 %s1333_s30, 4 }
 0x51b   : > { %s1335_s23 = scalar_lea.hbm %s5599_s1, %s2422_s22 }
 0x51c   : > { %s3875_s9 = scalar_lea.hbm %s1335_s23, 16  ;;  %p3878_p6 = scmp.lt.s32.totalorder %s1335_s23, %s5599_s1 }
 0x51d   : > { %p3876_p4 = scmp.ne.s32.totalorder %s1335_s23, %s3875_s9  ;;  %p3879_p8 = scmp.lt.s32.totalorder %s4926_s20, %s3875_s9 }
 0x51f   : > { %p3880_p7 = por %p3879_p8, %p3878_p6 }
 0x521   : > { %p3881_p9 = pnand %p3880_p7, %p3876_p4 }
 0x523   : > { %3884 = shalt.err (!%p3881_p9)  }
 0x524   : > { %s3885_s30 = scalar_lea.vmem %s5379_s21, 16  ;;  %p3890_p11 = scmp.lt.s32.totalorder %s5379_s21, %s4934_s11 }
 0x525   : > { %p3886_p10 = scmp.ne.s32.totalorder %s5379_s21, %s3885_s30  ;;  %p3891_p12 = scmp.lt.s32.totalorder %s4937_s6, %s3885_s30 }
 0x527   : > { %p3892_p3 = por %p3891_p12, %p3890_p11 }
 0x529   : > { %p3893_p13 = pnand %p3892_p3, %p3886_p10 }
 0x52b   : > { %3896 = shalt.err (!%p3893_p13)  }
 0x52c   : > { %1348 = dma.hbm_to_vmem [thread:$0]  %s1335_s23, 16, %s5379_s21, %s4921_s26 }
 0x52d   : > { %s1376_s16 = sadd.s32 %s4163_s27, %s1374_s28  ;;  %s1379_s7 = sand.u32 127, %s1373_s25 }
 0x52e   : > { %s2427_s4 = sshll.u32 %s1376_s16, 7  ;;  %s2224_s5 = scalar_lea.vmem %s4905_s17, 26 [#allocation2] }
 0x52f   : > { %s1380_s13 = sadd.s32 %s2427_s4, %s1379_s7  ;;  %s1393_s24 = sshll.u32 %s2224_s5, 4  ;;  %s5406_s24 = int_to_ptr.vmem [resolvable:$true] %s1393_s24 }
 0x530   : > { %s2425_s10 = sshll.u32 %s1357_s3, 4  ;;  %s1381_s22 = sld [smem:[#allocation5 + %s1380_s13]] }
 0x531   : > { %s1359_s9 = scalar_lea.hbm %s5599_s1, %s2425_s10 }
 0x532   : > { %s3897_s12 = scalar_lea.hbm %s1359_s9, 16  ;;  %p3900_p5 = scmp.lt.s32.totalorder %s1359_s9, %s5599_s1 }
 0x533   : > { %p3898_p2 = scmp.ne.s32.totalorder %s1359_s9, %s3897_s12  ;;  %p3901_p4 = scmp.lt.s32.totalorder %s4926_s20, %s3897_s12 }
 0x535   : > { %p3902_p6 = por %p3901_p4, %p3900_p5 }
 0x537   : > { %p3903_p8 = pnand %p3902_p6, %p3898_p2 }
 0x539   : > { %3906 = shalt.err (!%p3903_p8)  }
 0x53a   : > { %s3907_s21 = scalar_lea.vmem %s5384_s2, 16  ;;  %p3912_p9 = scmp.lt.s32.totalorder %s5384_s2, %s4934_s11 }
 0x53b   : > { %p3908_p7 = scmp.ne.s32.totalorder %s5384_s2, %s3907_s21  ;;  %p3913_p10 = scmp.lt.s32.totalorder %s4937_s6, %s3907_s21 }
 0x53d   : > { %p3914_p11 = por %p3913_p10, %p3912_p9 }
 0x53f   : > { %p3915_p12 = pnand %p3914_p11, %p3908_p7 }
 0x541   : > { %3918 = shalt.err (!%p3915_p12)  }
 0x542   : > { %1372 = dma.hbm_to_vmem [thread:$0]  %s1359_s9, 16, %s5384_s2, %s4921_s26 }
 0x543   : > { %s1397_s25 = sadd.s32 27, %s4900_s15  ;;  %s2229_s3 = scalar_lea.vmem %s4905_s17, 27 [#allocation2] }
 0x544   : > { %s1398_s23 = sshra.s32 %s1397_s25, 7  ;;  %s1403_s28 = sand.u32 127, %s1397_s25 }
 0x545   : > { %s1400_s16 = sadd.s32 %s4163_s27, %s1398_s23  ;;  %s1417_s7 = sshll.u32 %s2229_s3, 4  ;;  %s5436_s7 = int_to_ptr.vmem [resolvable:$true] %s1417_s7 }
 0x546   : > { %s2428_s4 = sshll.u32 %s1381_s22, 4  ;;  %s2430_s5 = sshll.u32 %s1400_s16, 7 }
 0x547   : > { %s1383_s18 = scalar_lea.hbm %s5599_s1, %s2428_s4  ;;  %s1404_s8 = sadd.s32 %s2430_s5, %s1403_s28 }
 0x548   : > { %s3919_s12 = scalar_lea.hbm %s1383_s18, 16  ;;  %p3922_p13 = scmp.lt.s32.totalorder %s1383_s18, %s5599_s1 }
 0x549   : > { %p3920_p3 = scmp.ne.s32.totalorder %s1383_s18, %s3919_s12  ;;  %p3923_p2 = scmp.lt.s32.totalorder %s4926_s20, %s3919_s12 }
 0x54b   : > { %p3924_p5 = por %p3923_p2, %p3922_p13 }
 0x54d   : > { %p3925_p4 = pnand %p3924_p5, %p3920_p3 }
 0x54f   : > { %3928 = shalt.err (!%p3925_p4)  }
 0x550   : > { %s3929_s2 = scalar_lea.vmem %s5406_s24, 16  ;;  %p3934_p8 = scmp.lt.s32.totalorder %s5406_s24, %s4934_s11 }
 0x551   : > { %p3930_p6 = scmp.ne.s32.totalorder %s5406_s24, %s3929_s2  ;;  %p3935_p7 = scmp.lt.s32.totalorder %s4937_s6, %s3929_s2 }
 0x553   : > { %p3936_p9 = por %p3935_p7, %p3934_p8 }
 0x555   : > { %p3937_p10 = pnand %p3936_p9, %p3930_p6 }
 0x557   : > { %3940 = shalt.err (!%p3937_p10)  }
 0x558   : > { %1396 = dma.hbm_to_vmem [thread:$0]  %s1383_s18, 16, %s5406_s24, %s4921_s26 }
 0x559   : > { %s1405_s22 = sld [smem:[#allocation5 + %s1404_s8]]  ;;  %s1421_s9 = sadd.s32 28, %s4900_s15 }
 0x55a   : > { %s2234_s21 = scalar_lea.vmem %s4905_s17, 28 [#allocation2]  ;;  %s1422_s25 = sshra.s32 %s1421_s9, 7 }
 0x55b   : > { %s1427_s3 = sand.u32 127, %s1421_s9  ;;  %s1424_s23 = sadd.s32 %s4163_s27, %s1422_s25 }
 0x55c   : > { %s1441_s28 = sshll.u32 %s2234_s21, 4  ;;  %s2433_s16 = sshll.u32 %s1424_s23, 7  ;;  %s5441_s28 = int_to_ptr.vmem [resolvable:$true] %s1441_s28 }
 0x55d   : > { %s1428_s4 = sadd.s32 %s2433_s16, %s1427_s3  ;;  %s1445_s5 = sadd.s32 29, %s4900_s15 }
 0x55e   : > { %s1429_s10 = sld [smem:[#allocation5 + %s1428_s4]]  ;;  %s1446_s18 = sshra.s32 %s1445_s5, 7 }
 0x55f   : > { %s2431_s13 = sshll.u32 %s1405_s22, 4 }
 0x560   : > { %s1407_s24 = scalar_lea.hbm %s5599_s1, %s2431_s13 }
 0x561   : > { %s3941_s8 = scalar_lea.hbm %s1407_s24, 16  ;;  %p3944_p12 = scmp.lt.s32.totalorder %s1407_s24, %s5599_s1 }
 0x562   : > { %p3942_p11 = scmp.ne.s32.totalorder %s1407_s24, %s3941_s8  ;;  %p3945_p3 = scmp.lt.s32.totalorder %s4926_s20, %s3941_s8 }
 0x564   : > { %p3946_p13 = por %p3945_p3, %p3944_p12 }
 0x566   : > { %p3947_p2 = pnand %p3946_p13, %p3942_p11 }
 0x568   : > { %3950 = shalt.err (!%p3947_p2)  }
 0x569   : > { %s3951_s22 = scalar_lea.vmem %s5436_s7, 16  ;;  %p3956_p4 = scmp.lt.s32.totalorder %s5436_s7, %s4934_s11 }
 0x56a   : > { %p3952_p5 = scmp.ne.s32.totalorder %s5436_s7, %s3951_s22  ;;  %p3957_p6 = scmp.lt.s32.totalorder %s4937_s6, %s3951_s22 }
 0x56c   : > { %p3958_p8 = por %p3957_p6, %p3956_p4 }
 0x56e   : > { %p3959_p7 = pnand %p3958_p8, %p3952_p5 }
 0x570   : > { %3962 = shalt.err (!%p3959_p7)  }
 0x571   : > { %1420 = dma.hbm_to_vmem [thread:$0]  %s1407_s24, 16, %s5436_s7, %s4921_s26 }
 0x572   : > { %s1448_s9 = sadd.s32 %s4163_s27, %s1446_s18  ;;  %s1451_s21 = sand.u32 127, %s1445_s5 }
 0x573   : > { %s2436_s25 = sshll.u32 %s1448_s9, 7  ;;  %s2239_s3 = scalar_lea.vmem %s4905_s17, 29 [#allocation2] }
 0x574   : > { %s1452_s23 = sadd.s32 %s2436_s25, %s1451_s21  ;;  %s1465_s16 = sshll.u32 %s2239_s3, 4  ;;  %s1466_s16 = int_to_ptr.vmem [resolvable:$true] %s1465_s16 }
 0x575   : > { %s2434_s4 = sshll.u32 %s1429_s10, 4  ;;  %s1453_s13 = sld [smem:[#allocation5 + %s1452_s23]] }
 0x576   : > { %s1431_s8 = scalar_lea.hbm %s5599_s1, %s2434_s4 }
 0x577   : > { %s3963_s30 = scalar_lea.hbm %s1431_s8, 16  ;;  %p3966_p10 = scmp.lt.s32.totalorder %s1431_s8, %s5599_s1 }
 0x578   : > { %p3964_p9 = scmp.ne.s32.totalorder %s1431_s8, %s3963_s30  ;;  %p3967_p11 = scmp.lt.s32.totalorder %s4926_s20, %s3963_s30 }
 0x57a   : > { %p3968_p12 = por %p3967_p11, %p3966_p10 }
 0x57c   : > { %p3969_p3 = pnand %p3968_p12, %p3964_p9 }
 0x57e   : > { %3972 = shalt.err (!%p3969_p3)  }
 0x57f   : > { %s3973_s7 = scalar_lea.vmem %s5441_s28, 16  ;;  %p3978_p2 = scmp.lt.s32.totalorder %s5441_s28, %s4934_s11 }
 0x580   : > { %p3974_p13 = scmp.ne.s32.totalorder %s5441_s28, %s3973_s7  ;;  %p3979_p5 = scmp.lt.s32.totalorder %s4937_s6, %s3973_s7 }
 0x582   : > { %p3980_p4 = por %p3979_p5, %p3978_p2 }
 0x584   : > { %p3981_p6 = pnand %p3980_p4, %p3974_p13 }
 0x586   : > { %3984 = shalt.err (!%p3981_p6)  }
 0x587   : > { %1444 = dma.hbm_to_vmem [thread:$0]  %s1431_s8, 16, %s5441_s28, %s4921_s26 }
 0x588   : > { %s1469_s5 = sadd.s32 30, %s4900_s15  ;;  %s2244_s9 = scalar_lea.vmem %s4905_s17, 30 [#allocation2] }
 0x589   : > { %s1470_s10 = sshra.s32 %s1469_s5, 7  ;;  %s1475_s24 = sand.u32 127, %s1469_s5 }
 0x58a   : > { %s1472_s18 = sadd.s32 %s4163_s27, %s1470_s10  ;;  %s2437_s21 = sshll.u32 %s1453_s13, 4 }
 0x58b   : > { %s2439_s25 = sshll.u32 %s1472_s18, 7  ;;  %s1455_s4 = scalar_lea.hbm %s5599_s1, %s2437_s21 }
 0x58c   : > { %s1476_s12 = sadd.s32 %s2439_s25, %s1475_s24  ;;  %s3985_s14 = scalar_lea.hbm %s1455_s4, 16 }
 0x58d   : > { %p3986_p8 = scmp.ne.s32.totalorder %s1455_s4, %s3985_s14  ;;  %p3988_p7 = scmp.lt.s32.totalorder %s1455_s4, %s5599_s1 }
 0x58e   : > { %p3989_p9 = scmp.lt.s32.totalorder %s4926_s20, %s3985_s14 }
 0x590   : > { %p3990_p10 = por %p3989_p9, %p3988_p7 }
 0x592   : > { %p3991_p11 = pnand %p3990_p10, %p3986_p8 }
 0x594   : > { %3994 = shalt.err (!%p3991_p11)  }
 0x595   : > { %s3995_s28 = scalar_lea.vmem %s1466_s16, 16  ;;  %p4000_p3 = scmp.lt.s32.totalorder %s1466_s16, %s4934_s11 }
 0x596   : > { %p3996_p12 = scmp.ne.s32.totalorder %s1466_s16, %s3995_s28  ;;  %p4001_p13 = scmp.lt.s32.totalorder %s4937_s6, %s3995_s28 }
 0x598   : > { %p4002_p2 = por %p4001_p13, %p4000_p3 }
 0x59a   : > { %p4003_p5 = pnand %p4002_p2, %p3996_p12 }
 0x59c   : > { %4006 = shalt.err (!%p4003_p5)  }
 0x59d   : > { %1468 = dma.hbm_to_vmem [thread:$0]  %s1455_s4, 16, %s1466_s16, %s4921_s26 }
 0x59e   : > { %s1477_s13 = sld [smem:[#allocation5 + %s1476_s12]]  ;;  %s1489_s8 = sshll.u32 %s2244_s9, 4  ;;  %s1490_s8 = int_to_ptr.vmem [resolvable:$true] %s1489_s8 }
 0x59f   : > { %s1493_s22 = sadd.s32 31, %s4900_s15  ;;  %s2249_s18 = scalar_lea.vmem %s4905_s17, 31 [#allocation2] }
 0x5a0   : > { %s1494_s7 = sshra.s32 %s1493_s22, 7  ;;  %s1499_s5 = sand.u32 127, %s1493_s22 }
 0x5a1   : > { %s1496_s10 = sadd.s32 %s4163_s27, %s1494_s7  ;;  %s1513_s2 = sshll.u32 %s2249_s18, 4  ;;  %s1514_s2 = int_to_ptr.vmem [resolvable:$true] %s1513_s2 }
 0x5a2   : > { %s2442_s24 = sshll.u32 %s1496_s10, 7 }
 0x5a3   : > { %s1500_s21 = sadd.s32 %s2442_s24, %s1499_s5 }
 0x5a4   : > { %s2440_s25 = sshll.u32 %s1477_s13, 4  ;;  %s1501_s3 = sld [smem:[#allocation5 + %s1500_s21]] }
 0x5a5   : > { %s1479_s30 = scalar_lea.hbm %s5599_s1, %s2440_s25 }
 0x5a6   : > { %s4007_s28 = scalar_lea.hbm %s1479_s30, 16  ;;  %p4010_p6 = scmp.lt.s32.totalorder %s1479_s30, %s5599_s1 }
 0x5a7   : > { %p4008_p4 = scmp.ne.s32.totalorder %s1479_s30, %s4007_s28  ;;  %p4011_p8 = scmp.lt.s32.totalorder %s4926_s20, %s4007_s28 }
 0x5a9   : > { %p4012_p7 = por %p4011_p8, %p4010_p6 }
 0x5ab   : > { %p4013_p9 = pnand %p4012_p7, %p4008_p4 }
 0x5ad   : > { %4016 = shalt.err (!%p4013_p9)  }
 0x5ae   : > { %s4017_s15 = scalar_lea.vmem %s1490_s8, 16  ;;  %p4022_p11 = scmp.lt.s32.totalorder %s1490_s8, %s4934_s11 }
 0x5af   : > { %p4018_p10 = scmp.ne.s32.totalorder %s1490_s8, %s4017_s15  ;;  %p4023_p12 = scmp.lt.s32.totalorder %s4937_s6, %s4017_s15 }
 0x5b1   : > { %p4024_p3 = por %p4023_p12, %p4022_p11 }
 0x5b3   : > { %p4025_p13 = pnand %p4024_p3, %p4018_p10 }
 0x5b5   : > { %4028 = shalt.err (!%p4025_p13)  }
 0x5b6   : > { %1492 = dma.hbm_to_vmem [thread:$0]  %s1479_s30, 16, %s1490_s8, %s4921_s26 }
 0x5b7   : > { %s2443_s17 = sshll.u32 %s1501_s3, 4 }
 0x5b8   : > { %s1503_s13 = scalar_lea.hbm %s5599_s1, %s2443_s17 }
 0x5b9   : > { %s4029_s22 = scalar_lea.hbm %s1503_s13, 16  ;;  %p4032_p5 = scmp.lt.s32.totalorder %s1503_s13, %s5599_s1 }
 0x5ba   : > { %p4030_p2 = scmp.ne.s32.totalorder %s1503_s13, %s4029_s22  ;;  %p4033_p4 = scmp.lt.s32.totalorder %s4926_s20, %s4029_s22 }
 0x5bc   : > { %p4034_p6 = por %p4033_p4, %p4032_p5 }
 0x5be   : > { %p4035_p8 = pnand %p4034_p6, %p4030_p2 }
 0x5c0   : > { %4038 = shalt.err (!%p4035_p8)  }
 0x5c1   : > { %s4039_s10 = scalar_lea.vmem %s1514_s2, 16  ;;  %p4044_p9 = scmp.lt.s32.totalorder %s1514_s2, %s4934_s11 }
 0x5c2   : > { %p4040_p7 = scmp.ne.s32.totalorder %s1514_s2, %s4039_s10  ;;  %p4045_p10 = scmp.lt.s32.totalorder %s4937_s6, %s4039_s10 }
 0x5c4   : > { %p4046_p11 = por %p4045_p10, %p4044_p9 }
 0x5c6   : > { %p4047_p12 = pnand %p4046_p11, %p4040_p7 }
 0x5c8   : > { %4050 = shalt.err (!%p4047_p12)  }
 0x5c9   : > { %1516 = dma.hbm_to_vmem [thread:$0]  %s1503_s13, 16, %s1514_s2, %s4921_s26 }
 0x5ca PF: > { %s1526_s8 = scalar_lea.sflag [#allocation3], %s5675_s19 }
 0x5cb   : > { %4127 = dma.done.wait %s1526_s8, 512 }
 0x5cc   : > { %4128 = vsyncadd %s1526_s8, 4294966784  ;;  %s2445_s20 = sshll.u32 %s5675_s19, 5  ;;  %v1877_v1 = vld [vmem:[%s4369_s29] sm:$0xff]  ;;  %v1879_v4 = vld [vmem:[%s4369_s29 + $0x10] sm:$0xff]  ;;  %s5647_s11 = sld [smem:[#allocation160_spill]] }
 0x5cd   : > { %s1872_s24 = scalar_lea.vmem [#allocation2], %s2445_s20  ;;  %v1878_v6 = vld [vmem:[%s4369_s29 + $0x8] sm:$0xff]  ;;  %v1880_v9 = vld [vmem:[%s4369_s29 + $0x18] sm:$0xff]  ;;  %s5646_s29 = sld [smem:[#allocation158_spill]] }
 0x5ce   : > { %v1873_v0 = vld [vmem:[%s1872_s24] sm:$0xff]  ;;  %v1875_v2 = vld [vmem:[%s1872_s24 + $0x10] sm:$0xff]  ;;  %v1874_v5 = vld [vmem:[%s1872_s24 + $0x8] sm:$0xff]  ;;  %s5648_s21 = sld [smem:[#allocation161_spill]]  ;;  %s2449_s25 = sshll.u32 %s4163_s27, 1 }
 0x5cf   : > { %v1881_v3 = vadd.f32 %v1877_v1, %v1873_v0  ;;  %v1883_v7 = vadd.f32 %v1879_v4, %v1875_v2  ;;  %v1876_v8 = vld [vmem:[%s1872_s24 + $0x18] sm:$0xff]  ;;  %v1882_v10 = vadd.f32 %v1878_v6, %v1874_v5  ;;  %s1965_s3 = sadd.s32 %s4159_s0, %s2449_s25  ;;  %s5649_s23 = sld [smem:[#allocation145_spill]] }
 0x5d0   : > { %v1884_v11 = vadd.f32 %v1880_v9, %v1876_v8  ;;  %s2459_s30 = sshll.u32 %s1965_s3, 9  ;;  %s5651_s16 = sld [smem:[#allocation162_spill]] }
 0x5d1   : > { %1885 = vadd.xlane.f32.xlu0 %v1881_v3  ;;  %1889 = vadd.xlane.f32.xlu1 %v1883_v7  ;;  %s4214_s4 = smov [#allocation9]  }
 0x5d2   : > { %v2446_v41 = vld [vmem:[%s5647_s11] ss:$0 sm:$0xff]  ;;  %s4055_s12 = sshll.u32 %s4214_s4, 4  ;;  %s4056_s12 = int_to_ptr.vmem [resolvable:$false] %s4055_s12 }
 0x5d3   : > { %s1972_s2 = sshll.u32 %s5646_s29, 4  ;;  %s4057_s13 = scalar_lea.vmem %s4056_s12, 1024  ;;  %s5533_s2 = int_to_ptr.vmem [resolvable:$true] %s1972_s2 }
 0x5d4   : > { %v2447_v43 = vld [vmem:[%s5648_s21] ss:$0 sm:$0xff]  ;;  %s4051_s17 = scalar_lea.vmem %s5533_s2, 512  ;;  %p4058_p5 = scmp.lt.s32.totalorder %s5533_s2, %s4056_s12 }
 0x5d5   : > { %1887 = vadd.xlane.f32.xlu0 %v1882_v10  ;;  %1891 = vadd.xlane.f32.xlu1 %v1884_v11  ;;  %s5652_s0 = sand.u32 1, %s5649_s23   ;;  %p4052_p3 = scmp.ne.s32.totalorder %s5533_s2, %s4051_s17 }
 0x5d6   : > { %s5531_s9 = scalar_lea.hbm %s5651_s16, %s2459_s30  ;;  %s5538_s15 = scalar_lea.sflag [#allocation8], %s5652_s0 }
 0x5d7   : > { %p4053_p13 = pnand %p4052_p3, %p4342_p0  ;;  %p4059_p4 = scmp.lt.s32.totalorder %s4057_s13, %s4051_s17 }
 0x5d9   : > { %p4054_p2 = pneg %p4053_p13  ;;  %p4060_p6 = por %p4059_p4, %p4058_p5 }
 0x5db   : > { %p4061_p8 = pnand %p4060_p6, %p4054_p2 }
 0x65a   : > { %v1886_v12 = vpop.xlane.xlu0 %1885  ;;  %v1890_v14 = vpop.xlane.xlu1 %1889 }
 0x65b   : > { %v1894_v13 = vmul.f32 0.0078125, %v1886_v12  ;;  %v1896_v15 = vmul.f32 0.0078125, %v1890_v14 }
 0x65d   : > { %v1898_v16 = vsub.f32 %v1881_v3, %v1894_v13  ;;  %v1900_v17 = vsub.f32 %v1883_v7, %v1896_v15 }
 0x65e   : > { %v1888_v18 = vpop.xlane.xlu0 %1887  ;;  %v1892_v21 = vpop.xlane.xlu1 %1891 }
 0x65f   : > { %v1895_v19 = vmul.f32 0.0078125, %v1888_v18  ;;  %v1902_v20 = vmul.f32 %v1898_v16, %v1898_v16  ;;  %v1897_v22 = vmul.f32 0.0078125, %v1892_v21  ;;  %v1904_v24 = vmul.f32 %v1900_v17, %v1900_v17 }
 0x661   : > { %v1899_v23 = vsub.f32 %v1882_v10, %v1895_v19  ;;  %1906 = vadd.xlane.f32.xlu0 %v1902_v20  ;;  %v1901_v25 = vsub.f32 %v1884_v11, %v1897_v22 }
 0x663   : > { %v1903_v26 = vmul.f32 %v1899_v23, %v1899_v23  ;;  %v1905_v27 = vmul.f32 %v1901_v25, %v1901_v25 }
 0x665   : > { %1910 = vadd.xlane.f32.xlu0 %v1904_v24  ;;  %1908 = vadd.xlane.f32.xlu1 %v1903_v26 }
 0x669   : > { %1912 = vadd.xlane.f32.xlu1 %v1905_v27 }
 0x6ea   : > { %v1907_v28 = vpop.xlane.xlu0 %1906 }
 0x6eb   : > { %v1914_v29 = vmul.f32 0.0078125, %v1907_v28 }
 0x6ed   : > { %v1918_v30 = vadd.f32 1e-12, %v1914_v29 }
 0x6ee   : > { %v1909_v31 = vpop.xlane.xlu1 %1908  ;;  %v1911_v32 = vpop.xlane.xlu0 %1910 }
 0x6ef   : > { %2599 = vrsqrt.f32 %v1918_v30  ;;  %v1915_v33 = vmul.f32 0.0078125, %v1909_v31  ;;  %v1916_v34 = vmul.f32 0.0078125, %v1911_v32 }
 0x6f1   : > { %v1919_v35 = vadd.f32 1e-12, %v1915_v33  ;;  %v1920_v36 = vadd.f32 1e-12, %v1916_v34 }
 0x6f2   : > { %v1913_v37 = vpop.xlane.xlu1 %1912 }
 0x6f3   : > { %2601 = vrsqrt.f32 %v1919_v35  ;;  %v1917_v38 = vmul.f32 0.0078125, %v1913_v37 }
 0x6f4   : > { %2603 = vrsqrt.f32 %v1920_v36 }
 0x6f5   : > { %v1921_v39 = vadd.f32 1e-12, %v1917_v38 }
 0x6f7   : > { %2605 = vrsqrt.f32 %v1921_v39 }
 0x6fc   : > { %v2600_v40 = vpop.eup %2599 }
 0x6fd   : > { %v1926_v42 = vmul.f32 %v2600_v40, %v1898_v16 }
 0x6ff   : > { %v1937_v44 = vmul.f32 %v2446_v41, %v1926_v42 }
 0x700   : > { %v2602_v45 = vpop.eup %2601 }
 0x701   : > { %v2604_v46 = vpop.eup %2603  ;;  %v1948_v47 = vadd.f32 %v2447_v43, %v1937_v44  ;;  %v1927_v48 = vmul.f32 %v2602_v45, %v1899_v23 }
 0x702   : > { %v1928_v49 = vmul.f32 %v2604_v46, %v1900_v17 }
 0x703   : > { %1952 = vst [vmem:[%s5646_s29] sm:$0xff] %v1948_v47  ;;  %v1938_v50 = vmul.f32 %v2446_v41, %v1927_v48 }
 0x704   : > { %v2606_v51 = vpop.eup %2605  ;;  %v1939_v52 = vmul.f32 %v2446_v41, %v1928_v49 }
 0x705   : > { %v1949_v53 = vadd.f32 %v2447_v43, %v1938_v50  ;;  %v1929_v54 = vmul.f32 %v2606_v51, %v1901_v25 }
 0x706   : > { %v1950_v55 = vadd.f32 %v2447_v43, %v1939_v52 }
 0x707   : > { %1953 = vst [vmem:[%s5646_s29 + $0x8] sm:$0xff] %v1949_v53  ;;  %v1940_v56 = vmul.f32 %v2446_v41, %v1929_v54 }
 0x708   : > { %1954 = vst [vmem:[%s5646_s29 + $0x10] sm:$0xff] %v1950_v55 }
 0x709   : > { %v1951_v57 = vadd.f32 %v2447_v43, %v1940_v56 }
 0x70b   : > { %1955 = vst [vmem:[%s5646_s29 + $0x18] sm:$0xff] %v1951_v57 }
 0x70c   : > { %4064 = shalt.err (!%p4061_p8)
}
 0x70d   : > { %s4065_s22 = scalar_lea.hbm %s5531_s9, 512  ;;  %s4069_s10 = scalar_lea.hbm %s5651_s16, 2048 }
 0x70e   : > { %p4066_p7 = scmp.ne.s32.totalorder %s5531_s9, %s4065_s22  ;;  %p4070_p11 = scmp.lt.s32.totalorder %s5531_s9, %s5651_s16 }
 0x70f   : > { %p4071_p12 = scmp.lt.s32.totalorder %s4069_s10, %s4065_s22 }
 0x710   : > { %p4067_p9 = pnand %p4066_p7, %p4342_p0 }
 0x711   : > { %p4072_p3 = por %p4071_p12, %p4070_p11 }
 0x712   : > { %p4068_p10 = pneg %p4067_p9 }
 0x714   : > { %p4073_p13 = pnand %p4072_p3, %p4068_p10 }
 0x716   : > { %4076 = shalt.err (!%p4073_p13)
}
 0x717   : > { %s4215_s24 = smov 128   ;;  %s4216_s29 = smov 8  }
 0x718   : > { %2462 = dma.vmem_to_hbm [thread:$0]  (%p4342_p0), %s5533_s2, 512, %s5531_s9, %s5538_s15, %s4215_s24, %s4215_s24, %s4216_s29  }
 0x719 PF: > { %s5653_s19 = sld [smem:[#allocation151_spill]] }
 0x71a   : > { %s5654_s26 = sld [smem:[#allocation144_spill]] }
 0x71f   : > { %p2473_p2 = scmp.ge.s32.totalorder %s5653_s19, 2 }
 0x720   : > { %s1987_s6 = sand.u32 1, %s5654_s26  }
 0x721   : > { %p2469_p5 = pnand %p2473_p2, %p4346_p1  ;;  %s1988_s18 = scalar_lea.sflag [#allocation8], %s1987_s6 }
 0x723   : > { %p2470_p4 = pneg %p2469_p5 }
 0x725   : > { %4130 = dma.done.wait (%p2470_p4), %s1988_s18, 512  }
 0x726   : > { %4132 = vsyncadd (%p2470_p4), %s1988_s18, 4294966784  ;;  %s25_s30 = sadd.s32 1, %s5653_s19   ;;  %s5656_s21 = sld [smem:[#allocation145_spill]] }
 0x727   : > { %p22_p6 = scmp.ge.s32.totalorder %s25_s30, 6   ;;  %s5657_s22 = sld [smem:[#allocation146_spill]] }
 0x728   : > { %s5658_s23 = sld [smem:[#allocation155_spill]] }
 0x729   : > { %s5659_s24 = sld [smem:[#allocation147_spill]] }
 0x72a   : > { %s5660_s25 = sld [smem:[#allocation148_spill]] }
 0x72b   : > { %s5661_s26 = sld [smem:[#allocation154_spill]]  ;;  %24 = sbr.rel (!%p22_p6) target bundleno = 18 (0x12), region = 472 }
 0x72c   : > { %s5662_s0 = sld [smem:[#allocation149_spill]] }
 0x72d   : > { %s5663_s27 = sld [smem:[#allocation150_spill]] }
 0x72e   : > { %s5664_s28 = sld [smem:[#allocation152_spill]] }
 0x72f   : > { %s5665_s29 = sld [smem:[#allocation153_spill]] }
 0x730   :  { %1993 = vsyncpa [#allocation7], 1 }
 0x731   :  { %1995 = vsyncpa [#allocation7 + $0x1], 1 }
 0x732   :  { %1996 = vsyncpa [#allocation8], 1 }
 0x733   :  { %1998 = vsyncpa [#allocation8 + $0x1], 1 }
 0x734   :  { %1999 = vsyncmov [#allocation3] }
 0x737   :  { %s2000_s3 = vpop.sfrf %1999 }
 0x738   :  { %p2454_p0 = scmp.ne.s32.totalorder %s2000_s3, 0 }
 0x73a   :  { %2004 = shalt.err (%p2454_p0)  }
 0x73b   :  { %2006 = vsyncmov [#allocation3 + $0x1] }
 0x73e   :  { %s2007_s14 = vpop.sfrf %2006 }
 0x73f   :  { %p2455_p1 = scmp.ne.s32.totalorder %s2007_s14, 0 }
 0x741   :  { %2011 = shalt.err (%p2455_p1)  }

</bundles_post_ra>
